<compile_context>
chip_gen: v7x
topology: tpu7x:2x2x1
jax: 0.10.0
libtpu: 0.0.40
codegen_flags: <defaults>
</compile_context>

<pallas_src>
import functools

import jax
import jax.numpy as jnp
from jax.experimental import pallas as pl
from jax.experimental.pallas import tpu as pltpu

EPS = 1e-5


def _conv3x3_stats(src_ref, w_ref, acc_ref, *, H, W, C, strip_rows, mm_dtype):
    """reflect-pad(1) -> 3x3 conv, strip-streamed, with fused InstanceNorm stats.

    src_ref: (H, W, C) VMEM ref (any dtype); w_ref: (9C, C) ref in mm_dtype,
    rows ordered (kh, kw, cin).  Writes the f32 conv output into acc_ref
    (H, W, C) and returns per-channel (mean, inv_std), each (1, C) float32,
    accumulated inside the same strip loop (single pass over the data).
    """
    n_strips = H // strip_rows
    w_mat = w_ref[...]                                   # hoisted: reused by every strip

    def strip(s, carry):
        sum_c, sq_c = carry
        r0 = pl.multiple_of(s * strip_rows, strip_rows)
        # Row halo with reflection (row -1 -> 1, row H -> H-2).
        top = jnp.where(r0 == 0, 1, r0 - 1)
        bot = jnp.where(r0 + strip_rows == H, H - 2, r0 + strip_rows)
        rows = jnp.concatenate(
            [src_ref[pl.ds(top, 1)].astype(mm_dtype),
             src_ref[pl.ds(r0, strip_rows)].astype(mm_dtype),
             src_ref[pl.ds(bot, 1)].astype(mm_dtype)], axis=0)       # (TH+2, W, C)
        # Column halo with reflection.
        # TODO(synk): replace the (W+2) concat + misaligned sublane slices with
        # pltpu.roll along W + edge selects to keep the taps in XLU/VPU slots.
        xs = jnp.concatenate([rows[:, 1:2], rows, rows[:, W - 2:W - 1]], axis=1)
        # im2col strip; lane-concat in (kh, kw, cin) order to match w_mat rows.
        col = jnp.concatenate(
            [xs[kh:kh + strip_rows, kw:kw + W]
             for kh in range(3) for kw in range(3)],
            axis=-1).reshape(strip_rows * W, 9 * C)
        a = jnp.dot(col, w_mat, preferred_element_type=jnp.float32)  # (TH*W, C) f32
        acc_ref[pl.ds(r0, strip_rows)] = a.reshape(strip_rows, W, C)
        # Per-strip partial statistics ride along with the matmul loop.
        return (sum_c + jnp.sum(a, axis=0, keepdims=True),
                sq_c + jnp.sum(a * a, axis=0, keepdims=True))

    zeros = jnp.zeros((1, C), jnp.float32)
    sum_c, sq_c = jax.lax.fori_loop(0, n_strips, strip, (zeros, zeros),
                                    unroll=n_strips <= 4)
    inv_n = 1.0 / float(H * W)
    mean = sum_c * inv_n
    # TODO(synk): one-pass E[x^2]-E[x]^2 in f32 can cancel for very large H*W;
    # switch to per-strip shifted moments if that regime matters.
    var = jnp.maximum(sq_c * inv_n - mean * mean, 0.0)
    return mean, jax.lax.rsqrt(var + EPS)


def _resnet_block_kernel(x_ref, w1_ref, w2_ref, o_ref, acc_ref, h_ref, *,
                         strip_rows):
    H, W, C = x_ref.shape
    mm_dtype = h_ref.dtype
    n_strips = H // strip_rows

    # Stage 1: reflect-pad -> conv1 -> InstanceNorm -> ReLU (hidden stays in VMEM).
    mean1, inv1 = _conv3x3_stats(x_ref, w1_ref, acc_ref, H=H, W=W, C=C,
                                 strip_rows=strip_rows, mm_dtype=mm_dtype)

    @pl.loop(0, n_strips)
    def _(s):
        r0 = pl.multiple_of(s * strip_rows, strip_rows)
        a = acc_ref[pl.ds(r0, strip_rows)]
        h_ref[pl.ds(r0, strip_rows)] = jnp.maximum(
            (a - mean1) * inv1, 0.0).astype(mm_dtype)

    # Stage 2: reflect-pad -> conv2 -> InstanceNorm, then residual add (f32).
    mean2, inv2 = _conv3x3_stats(h_ref, w2_ref, acc_ref, H=H, W=W, C=C,
                                 strip_rows=strip_rows, mm_dtype=mm_dtype)

    @pl.loop(0, n_strips)
    def _(s):
        r0 = pl.multiple_of(s * strip_rows, strip_rows)
        a = acc_ref[pl.ds(r0, strip_rows)]
        res = x_ref[pl.ds(r0, strip_rows)].astype(jnp.float32)
        o_ref[pl.ds(r0, strip_rows)] = ((a - mean2) * inv2 + res).astype(o_ref.dtype)


def _pick_strip_rows(H, W, C, mm_bytes):
    """Largest divisor of H whose im2col strip fits a ~4 MiB budget (and at
    least two strips once H >= 16, so strip temporaries stay bounded)."""
    budget = 4 << 20
    cap = H // 2 if H >= 16 else H
    best = 1
    for th in range(1, cap + 1):
        if H % th == 0 and (th + 2) * (W + 2) * 9 * C * mm_bytes <= budget:
            best = th
    return best


def _vmem_limit_bytes(H, W, C, in_bytes, mm_bytes, strip_rows):
    acc = H * W * C * 4                        # resident f32 conv accumulator
    hid = H * W * C * mm_bytes                 # resident hidden activation
    io = 2 * (H * W * C * in_bytes) * 2        # x and out blocks, double-buffered
    wts = 2 * (9 * C * C * mm_bytes) * 2       # both weight mats, double-buffered
    # Per-strip temporaries: row halo, padded strip, 9 taps + lane-concat im2col,
    # f32 matmul output + squares (generous upper bound).
    strip = (strip_rows + 2) * (W + 2) * C * mm_bytes * 20 + strip_rows * W * C * 4 * 3
    est = acc + hid + io + wts + strip + (2 << 20)
    try:
        cap = pltpu.get_tpu_info().vmem_capacity_bytes
    except Exception:  # pragma: no cover - conservative fallback (v7x per-core size)
        cap = 64 << 20
    return int(min(max(est, 16 << 20), cap - (8 << 20)))


@functools.partial(jax.jit, static_argnames=("matmul_dtype",))
def resnet_block_forward(x_nchw, w1, b1, w2, b2, *, matmul_dtype=None):
    """ResnetBlock forward. x_nchw: (B, C, H, W); w*: (3, 3, Cin, Cout); b*: (1, C).

    With InstanceNorm2d(affine=False) immediately following each conv, the conv
    bias is exactly cancelled by the mean subtraction, so b1/b2 are accepted
    (module signature) but unused.  Revisit if the norm gains affine params or
    is removed.
    """
    del b1, b2
    B, C, H, W = x_nchw.shape
    assert H >= 2 and W >= 2, "reflect padding requires H, W >= 2"
    dtype = x_nchw.dtype
    if matmul_dtype is not None:
        mm_dtype = jnp.dtype(matmul_dtype)
    elif jnp.dtype(dtype) == jnp.dtype(jnp.float32):
        mm_dtype = jnp.dtype(jnp.bfloat16)     # MXU operands; accumulation stays f32
    else:
        mm_dtype = jnp.dtype(dtype)

    # NCHW -> NHWC boundary transpose (one HBM pass).
    # TODO(synk): keeping the surrounding model NHWC end-to-end (or adopting a
    # CHW-layout kernel with the transposed matmul) would remove this and its
    # inverse entirely.
    x = jnp.transpose(x_nchw, (0, 2, 3, 1))

    # (3, 3, Cin, Cout) -> (9*Cin, Cout), rows ordered (kh, kw, cin) = im2col order.
    w1m = w1.astype(mm_dtype).reshape(9 * C, C)
    w2m = w2.astype(mm_dtype).reshape(9 * C, C)

    strip_rows = _pick_strip_rows(H, W, C, mm_dtype.itemsize)

    out = pl.pallas_call(
        functools.partial(_resnet_block_kernel, strip_rows=strip_rows),
        out_shape=jax.ShapeDtypeStruct((B, H, W, C), dtype),
        grid_spec=pltpu.PrefetchScalarGridSpec(
            num_scalar_prefetch=0,
            grid=(B,),
            in_specs=[
                pl.BlockSpec((pl.Squeezed(), H, W, C), lambda b: (b, 0, 0, 0)),
                pl.BlockSpec((9 * C, C), lambda b: (0, 0)),
                pl.BlockSpec((9 * C, C), lambda b: (0, 0)),
            ],
            out_specs=pl.BlockSpec((pl.Squeezed(), H, W, C), lambda b: (b, 0, 0, 0)),
            scratch_shapes=[
                pltpu.VMEM((H, W, C), jnp.float32),   # resident conv accumulator
                pltpu.VMEM((H, W, C), mm_dtype),      # resident hidden activation
            ],
        ),
        compiler_params=pltpu.CompilerParams(
            # Batch axis is parallel: each of v7x's two TensorCores gets work for B>=2.
            dimension_semantics=("parallel",),
            vmem_limit_bytes=_vmem_limit_bytes(
                H, W, C, jnp.dtype(dtype).itemsize, mm_dtype.itemsize, strip_rows),
        ),
    )(x, w1m, w2m)

    return jnp.transpose(out, (0, 3, 1, 2))   # NHWC -> NCHW


def _reference(x_nchw, w1, b1, w2, b2):
    """Pure-JAX reference (NCHW, matches PyTorch semantics incl. conv bias)."""
    def conv_in(x, w, b, relu):
        xp = jnp.pad(x, ((0, 0), (0, 0), (1, 1), (1, 1)), mode="reflect")
        w_oihw = jnp.transpose(w, (3, 2, 0, 1))
        y = jax.lax.conv_general_dilated(
            xp.astype(jnp.float32), w_oihw.astype(jnp.float32),
            window_strides=(1, 1), padding="VALID",
            dimension_numbers=("NCHW", "OIHW", "NCHW"),
            precision=jax.lax.Precision.HIGHEST)
        y = y + b.reshape(1, -1, 1, 1).astype(jnp.float32)
        mean = jnp.mean(y, axis=(2, 3), keepdims=True)
        var = jnp.mean((y - mean) ** 2, axis=(2, 3), keepdims=True)
        y = (y - mean) * jax.lax.rsqrt(var + EPS)
        return jnp.maximum(y, 0.0) if relu else y

    h = conv_in(x_nchw, w1, b1, relu=True)
    return x_nchw.astype(jnp.float32) + conv_in(h, w2, b2, relu=False)


if __name__ == "__main__":
    B, C, H, W = 2, 4, 16, 16
    key = jax.random.PRNGKey(0)
    kx, k1, k2, k3, k4 = jax.random.split(key, 5)

    x = jax.random.normal(kx, (B, C, H, W), jnp.float32)
    # Conv2d(dim, dim, kernel_size=3) weights, deterministic synthetic init.
    w1 = jax.random.normal(k1, (3, 3, C, C), jnp.float32) * 0.1
    b1 = jax.random.normal(k2, (1, C), jnp.float32) * 0.1
    w2 = jax.random.normal(k3, (3, 3, C, C), jnp.float32) * 0.1
    b2 = jax.random.normal(k4, (1, C), jnp.float32) * 0.1

    ref = _reference(x, w1, b1, w2, b2)

    # Default (performance) path: bf16 MXU operands, f32 accumulation/norm/residual.
    out = resnet_block_forward(x, w1, b1, w2, b2)
    jax.block_until_ready(out)
    assert out.shape == (B, C, H, W)
    assert jnp.allclose(out, ref, atol=1e-1, rtol=1e-1), (
        "bf16-matmul path mismatch vs reference: max abs err = %g"
        % float(jnp.max(jnp.abs(out - ref))))

    # Exact-semantics path: f32 MXU operands, tight tolerance.
    out_f32 = resnet_block_forward(x, w1, b1, w2, b2, matmul_dtype=jnp.float32)
    jax.block_until_ready(out_f32)
    assert jnp.allclose(out_f32, ref, atol=1e-4, rtol=1e-4), (
        "f32-matmul path mismatch vs reference: max abs err = %g"
        % float(jnp.max(jnp.abs(out_f32 - ref))))

    print("KERNEL_OK")
</pallas_src>

<mosaic_0001>
module attributes {stable_mosaic.version = 11 : i64} {
  func.func @_resnet_block_kernel(%arg0: i32, %arg1: memref<1x16x16x4xf32, #tpu.memory_space<vmem>>, %arg2: memref<36x4xbf16, #tpu.memory_space<vmem>>, %arg3: memref<36x4xbf16, #tpu.memory_space<vmem>>, %arg4: memref<1x16x16x4xf32, #tpu.memory_space<vmem>>, %arg5: memref<16x16x4xf32, #tpu.memory_space<vmem>>, %arg6: memref<16x16x4xbf16, #tpu.memory_space<vmem>>) attributes {dimension_semantics = [#tpu.dimension_semantics<parallel>], iteration_bounds = array<i64: 2>, scalar_prefetch = 0 : i64, scratch_operands = 2 : i64, tpu.core_type = #tpu.core_type<tc>, window_params = [{transform_indices = @transform_0, window_bounds = array<i64: 1, 16, 16, 4>}, {pipeline_mode = #tpu.pipeline_mode<synchronous>, transform_indices = @transform_1, window_bounds = array<i64: 36, 4>}, {pipeline_mode = #tpu.pipeline_mode<synchronous>, transform_indices = @transform_2, window_bounds = array<i64: 36, 4>}, {transform_indices = @transform_3, window_bounds = array<i64: 1, 16, 16, 4>}]} {
    %c0 = arith.constant 0 : index
    %c0_0 = arith.constant 0 : index
    %0 = vector.load %arg2[%c0, %c0_0] : memref<36x4xbf16, #tpu.memory_space<vmem>>, vector<36x4xbf16>
    %cst = arith.constant 0.000000e+00 : f32
    %1 = vector.broadcast %cst : f32 to vector<1x4xf32>
    %c0_i32 = arith.constant 0 : i32
    %c8_i32 = arith.constant 8 : i32
    %2 = arith.muli %c0_i32, %c8_i32 : i32
    %3 = tpu.assume_multiple %2, 8 : i32
    %c0_i32_1 = arith.constant 0 : i32
    %4 = arith.cmpi eq, %3, %c0_i32_1 : i32
    %c1_i32 = arith.constant 1 : i32
    %5 = arith.subi %3, %c1_i32 : i32
    %c1_i32_2 = arith.constant 1 : i32
    %6 = arith.select %4, %c1_i32_2, %5 : i32
    %c8_i32_3 = arith.constant 8 : i32
    %7 = arith.addi %3, %c8_i32_3 : i32
    %c16_i32 = arith.constant 16 : i32
    %8 = arith.cmpi eq, %7, %c16_i32 : i32
    %c8_i32_4 = arith.constant 8 : i32
    %9 = arith.addi %3, %c8_i32_4 : i32
    %c14_i32 = arith.constant 14 : i32
    %10 = arith.select %8, %c14_i32, %9 : i32
    %c0_5 = arith.constant 0 : index
    %11 = arith.index_cast %6 : i32 to index
    %c0_6 = arith.constant 0 : index
    %c0_7 = arith.constant 0 : index
    %12 = vector.load %arg1[%c0_5, %11, %c0_6, %c0_7] : memref<1x16x16x4xf32, #tpu.memory_space<vmem>>, vector<1x1x16x4xf32>
    %13 = vector.shape_cast %12 : vector<1x1x16x4xf32> to vector<1x16x4xf32>
    %14 = arith.truncf %13 : vector<1x16x4xf32> to vector<1x16x4xbf16>
    %c0_8 = arith.constant 0 : index
    %15 = arith.index_cast %3 : i32 to index
    %c0_9 = arith.constant 0 : index
    %c0_10 = arith.constant 0 : index
    %16 = vector.load %arg1[%c0_8, %15, %c0_9, %c0_10] : memref<1x16x16x4xf32, #tpu.memory_space<vmem>>, vector<1x8x16x4xf32>
    %17 = vector.shape_cast %16 : vector<1x8x16x4xf32> to vector<8x16x4xf32>
    %18 = arith.truncf %17 : vector<8x16x4xf32> to vector<8x16x4xbf16>
    %c0_11 = arith.constant 0 : index
    %19 = arith.index_cast %10 : i32 to index
    %c0_12 = arith.constant 0 : index
    %c0_13 = arith.constant 0 : index
    %20 = vector.load %arg1[%c0_11, %19, %c0_12, %c0_13] : memref<1x16x16x4xf32, #tpu.memory_space<vmem>>, vector<1x1x16x4xf32>
    %21 = vector.shape_cast %20 : vector<1x1x16x4xf32> to vector<1x16x4xf32>
    %22 = arith.truncf %21 : vector<1x16x4xf32> to vector<1x16x4xbf16>
    %23 = tpu.concatenate %14, %18, %22 in 0 : vector<1x16x4xbf16>, vector<8x16x4xbf16>, vector<1x16x4xbf16> -> vector<10x16x4xbf16>
    %24 = vector.extract_strided_slice %23 {offsets = [0, 1, 0], sizes = [10, 1, 4], strides = [1, 1, 1]} : vector<10x16x4xbf16> to vector<10x1x4xbf16>
    %25 = vector.extract_strided_slice %23 {offsets = [0, 14, 0], sizes = [10, 1, 4], strides = [1, 1, 1]} : vector<10x16x4xbf16> to vector<10x1x4xbf16>
    %26 = tpu.concatenate %24, %23, %25 in 1 : vector<10x1x4xbf16>, vector<10x16x4xbf16>, vector<10x1x4xbf16> -> vector<10x18x4xbf16>
    %27 = vector.extract_strided_slice %26 {offsets = [0, 0, 0], sizes = [8, 16, 4], strides = [1, 1, 1]} : vector<10x18x4xbf16> to vector<8x16x4xbf16>
    %28 = vector.extract_strided_slice %26 {offsets = [0, 1, 0], sizes = [8, 16, 4], strides = [1, 1, 1]} : vector<10x18x4xbf16> to vector<8x16x4xbf16>
    %29 = vector.extract_strided_slice %26 {offsets = [0, 2, 0], sizes = [8, 16, 4], strides = [1, 1, 1]} : vector<10x18x4xbf16> to vector<8x16x4xbf16>
    %30 = vector.extract_strided_slice %26 {offsets = [1, 0, 0], sizes = [8, 16, 4], strides = [1, 1, 1]} : vector<10x18x4xbf16> to vector<8x16x4xbf16>
    %31 = vector.extract_strided_slice %26 {offsets = [1, 1, 0], sizes = [8, 16, 4], strides = [1, 1, 1]} : vector<10x18x4xbf16> to vector<8x16x4xbf16>
    %32 = vector.extract_strided_slice %26 {offsets = [1, 2, 0], sizes = [8, 16, 4], strides = [1, 1, 1]} : vector<10x18x4xbf16> to vector<8x16x4xbf16>
    %33 = vector.extract_strided_slice %26 {offsets = [2, 0, 0], sizes = [8, 16, 4], strides = [1, 1, 1]} : vector<10x18x4xbf16> to vector<8x16x4xbf16>
    %34 = vector.extract_strided_slice %26 {offsets = [2, 1, 0], sizes = [8, 16, 4], strides = [1, 1, 1]} : vector<10x18x4xbf16> to vector<8x16x4xbf16>
    %35 = vector.extract_strided_slice %26 {offsets = [2, 2, 0], sizes = [8, 16, 4], strides = [1, 1, 1]} : vector<10x18x4xbf16> to vector<8x16x4xbf16>
    %36 = tpu.concatenate %27, %28, %29, %30, %31, %32, %33, %34, %35 in 2 : vector<8x16x4xbf16>, vector<8x16x4xbf16>, vector<8x16x4xbf16>, vector<8x16x4xbf16>, vector<8x16x4xbf16>, vector<8x16x4xbf16>, vector<8x16x4xbf16>, vector<8x16x4xbf16>, vector<8x16x4xbf16> -> vector<8x16x36xbf16>
    %37 = vector.shape_cast %36 : vector<8x16x36xbf16> to vector<128x36xbf16>
    %cst_14 = arith.constant dense<0.000000e+00> : vector<128x4xf32>
    %38 = tpu.matmul %37, %0, %cst_14 {dimension_numbers = #tpu.dot_dimension_numbers<[1], [0], [0], [1], [0, 0, 1, 1], [], []>} : vector<128x36xbf16>, vector<36x4xbf16>, vector<128x4xf32> -> vector<128x4xf32>
    %39 = vector.shape_cast %38 : vector<128x4xf32> to vector<8x16x4xf32>
    %40 = arith.index_cast %3 : i32 to index
    %c0_15 = arith.constant 0 : index
    %c0_16 = arith.constant 0 : index
    %41 = vector.load %arg5[%40, %c0_15, %c0_16] : memref<16x16x4xf32, #tpu.memory_space<vmem>>, vector<8x16x4xf32>
    tpu.vector_store %arg5[%40, %c0_15, %c0_16], %39 {strides = array<i32>} : memref<16x16x4xf32, #tpu.memory_space<vmem>>, vector<8x16x4xf32>,
    %cst_17 = arith.constant dense<0.000000e+00> : vector<4xf32>
    %42 = vector.multi_reduction <add>, %38, %cst_17 [0] : vector<128x4xf32> to vector<4xf32>
    %43 = vector.shape_cast %42 : vector<4xf32> to vector<1x4xf32>
    %44 = arith.addf %1, %43 : vector<1x4xf32>
    %45 = arith.mulf %38, %38 : vector<128x4xf32>
    %cst_18 = arith.constant dense<0.000000e+00> : vector<4xf32>
    %46 = vector.multi_reduction <add>, %45, %cst_18 [0] : vector<128x4xf32> to vector<4xf32>
    %47 = vector.shape_cast %46 : vector<4xf32> to vector<1x4xf32>
    %48 = arith.addf %1, %47 : vector<1x4xf32>
    %c1_i32_19 = arith.constant 1 : i32
    %c8_i32_20 = arith.constant 8 : i32
    %49 = arith.muli %c1_i32_19, %c8_i32_20 : i32
    %50 = tpu.assume_multiple %49, 8 : i32
    %c0_i32_21 = arith.constant 0 : i32
    %51 = arith.cmpi eq, %50, %c0_i32_21 : i32
    %c1_i32_22 = arith.constant 1 : i32
    %52 = arith.subi %50, %c1_i32_22 : i32
    %c1_i32_23 = arith.constant 1 : i32
    %53 = arith.select %51, %c1_i32_23, %52 : i32
    %c8_i32_24 = arith.constant 8 : i32
    %54 = arith.addi %50, %c8_i32_24 : i32
    %c16_i32_25 = arith.constant 16 : i32
    %55 = arith.cmpi eq, %54, %c16_i32_25 : i32
    %c8_i32_26 = arith.constant 8 : i32
    %56 = arith.addi %50, %c8_i32_26 : i32
    %c14_i32_27 = arith.constant 14 : i32
    %57 = arith.select %55, %c14_i32_27, %56 : i32
    %c0_28 = arith.constant 0 : index
    %58 = arith.index_cast %53 : i32 to index
    %c0_29 = arith.constant 0 : index
    %c0_30 = arith.constant 0 : index
    %59 = vector.load %arg1[%c0_28, %58, %c0_29, %c0_30] : memref<1x16x16x4xf32, #tpu.memory_space<vmem>>, vector<1x1x16x4xf32>
    %60 = vector.shape_cast %59 : vector<1x1x16x4xf32> to vector<1x16x4xf32>
    %61 = arith.truncf %60 : vector<1x16x4xf32> to vector<1x16x4xbf16>
    %c0_31 = arith.constant 0 : index
    %62 = arith.index_cast %50 : i32 to index
    %c0_32 = arith.constant 0 : index
    %c0_33 = arith.constant 0 : index
    %63 = vector.load %arg1[%c0_31, %62, %c0_32, %c0_33] : memref<1x16x16x4xf32, #tpu.memory_space<vmem>>, vector<1x8x16x4xf32>
    %64 = vector.shape_cast %63 : vector<1x8x16x4xf32> to vector<8x16x4xf32>
    %65 = arith.truncf %64 : vector<8x16x4xf32> to vector<8x16x4xbf16>
    %c0_34 = arith.constant 0 : index
    %66 = arith.index_cast %57 : i32 to index
    %c0_35 = arith.constant 0 : index
    %c0_36 = arith.constant 0 : index
    %67 = vector.load %arg1[%c0_34, %66, %c0_35, %c0_36] : memref<1x16x16x4xf32, #tpu.memory_space<vmem>>, vector<1x1x16x4xf32>
    %68 = vector.shape_cast %67 : vector<1x1x16x4xf32> to vector<1x16x4xf32>
    %69 = arith.truncf %68 : vector<1x16x4xf32> to vector<1x16x4xbf16>
    %70 = tpu.concatenate %61, %65, %69 in 0 : vector<1x16x4xbf16>, vector<8x16x4xbf16>, vector<1x16x4xbf16> -> vector<10x16x4xbf16>
    %71 = vector.extract_strided_slice %70 {offsets = [0, 1, 0], sizes = [10, 1, 4], strides = [1, 1, 1]} : vector<10x16x4xbf16> to vector<10x1x4xbf16>
    %72 = vector.extract_strided_slice %70 {offsets = [0, 14, 0], sizes = [10, 1, 4], strides = [1, 1, 1]} : vector<10x16x4xbf16> to vector<10x1x4xbf16>
    %73 = tpu.concatenate %71, %70, %72 in 1 : vector<10x1x4xbf16>, vector<10x16x4xbf16>, vector<10x1x4xbf16> -> vector<10x18x4xbf16>
    %74 = vector.extract_strided_slice %73 {offsets = [0, 0, 0], sizes = [8, 16, 4], strides = [1, 1, 1]} : vector<10x18x4xbf16> to vector<8x16x4xbf16>
    %75 = vector.extract_strided_slice %73 {offsets = [0, 1, 0], sizes = [8, 16, 4], strides = [1, 1, 1]} : vector<10x18x4xbf16> to vector<8x16x4xbf16>
    %76 = vector.extract_strided_slice %73 {offsets = [0, 2, 0], sizes = [8, 16, 4], strides = [1, 1, 1]} : vector<10x18x4xbf16> to vector<8x16x4xbf16>
    %77 = vector.extract_strided_slice %73 {offsets = [1, 0, 0], sizes = [8, 16, 4], strides = [1, 1, 1]} : vector<10x18x4xbf16> to vector<8x16x4xbf16>
    %78 = vector.extract_strided_slice %73 {offsets = [1, 1, 0], sizes = [8, 16, 4], strides = [1, 1, 1]} : vector<10x18x4xbf16> to vector<8x16x4xbf16>
    %79 = vector.extract_strided_slice %73 {offsets = [1, 2, 0], sizes = [8, 16, 4], strides = [1, 1, 1]} : vector<10x18x4xbf16> to vector<8x16x4xbf16>
    %80 = vector.extract_strided_slice %73 {offsets = [2, 0, 0], sizes = [8, 16, 4], strides = [1, 1, 1]} : vector<10x18x4xbf16> to vector<8x16x4xbf16>
    %81 = vector.extract_strided_slice %73 {offsets = [2, 1, 0], sizes = [8, 16, 4], strides = [1, 1, 1]} : vector<10x18x4xbf16> to vector<8x16x4xbf16>
    %82 = vector.extract_strided_slice %73 {offsets = [2, 2, 0], sizes = [8, 16, 4], strides = [1, 1, 1]} : vector<10x18x4xbf16> to vector<8x16x4xbf16>
    %83 = tpu.concatenate %74, %75, %76, %77, %78, %79, %80, %81, %82 in 2 : vector<8x16x4xbf16>, vector<8x16x4xbf16>, vector<8x16x4xbf16>, vector<8x16x4xbf16>, vector<8x16x4xbf16>, vector<8x16x4xbf16>, vector<8x16x4xbf16>, vector<8x16x4xbf16>, vector<8x16x4xbf16> -> vector<8x16x36xbf16>
    %84 = vector.shape_cast %83 : vector<8x16x36xbf16> to vector<128x36xbf16>
    %cst_37 = arith.constant dense<0.000000e+00> : vector<128x4xf32>
    %85 = tpu.matmul %84, %0, %cst_37 {dimension_numbers = #tpu.dot_dimension_numbers<[1], [0], [0], [1], [0, 0, 1, 1], [], []>} : vector<128x36xbf16>, vector<36x4xbf16>, vector<128x4xf32> -> vector<128x4xf32>
    %86 = vector.shape_cast %85 : vector<128x4xf32> to vector<8x16x4xf32>
    %87 = arith.index_cast %50 : i32 to index
    %c0_38 = arith.constant 0 : index
    %c0_39 = arith.constant 0 : index
    %88 = vector.load %arg5[%87, %c0_38, %c0_39] : memref<16x16x4xf32, #tpu.memory_space<vmem>>, vector<8x16x4xf32>
    tpu.vector_store %arg5[%87, %c0_38, %c0_39], %86 {strides = array<i32>} : memref<16x16x4xf32, #tpu.memory_space<vmem>>, vector<8x16x4xf32>,
    %cst_40 = arith.constant dense<0.000000e+00> : vector<4xf32>
    %89 = vector.multi_reduction <add>, %85, %cst_40 [0] : vector<128x4xf32> to vector<4xf32>
    %90 = vector.shape_cast %89 : vector<4xf32> to vector<1x4xf32>
    %91 = arith.addf %44, %90 : vector<1x4xf32>
    %92 = arith.mulf %85, %85 : vector<128x4xf32>
    %cst_41 = arith.constant dense<0.000000e+00> : vector<4xf32>
    %93 = vector.multi_reduction <add>, %92, %cst_41 [0] : vector<128x4xf32> to vector<4xf32>
    %94 = vector.shape_cast %93 : vector<4xf32> to vector<1x4xf32>
    %95 = arith.addf %48, %94 : vector<1x4xf32>
    %c2_i32 = arith.constant 2 : i32
    %cst_42 = arith.constant 3.906250e-03 : f32
    %96 = vector.broadcast %cst_42 : f32 to vector<1x4xf32>
    %97 = arith.mulf %91, %96 : vector<1x4xf32>
    %cst_43 = arith.constant 3.906250e-03 : f32
    %98 = vector.broadcast %cst_43 : f32 to vector<1x4xf32>
    %99 = arith.mulf %95, %98 : vector<1x4xf32>
    %100 = arith.mulf %97, %97 : vector<1x4xf32>
    %101 = arith.subf %99, %100 : vector<1x4xf32>
    %cst_44 = arith.constant 0.000000e+00 : f32
    %102 = vector.broadcast %cst_44 : f32 to vector<1x4xf32>
    %103 = arith.maximumf %101, %102 : vector<1x4xf32>
    %cst_45 = arith.constant 9.99999974E-6 : f32
    %104 = vector.broadcast %cst_45 : f32 to vector<1x4xf32>
    %105 = arith.addf %103, %104 : vector<1x4xf32>
    %106 = math.rsqrt %105 : vector<1x4xf32>
    %c0_i32_46 = arith.constant 0 : i32
    %c2_i32_47 = arith.constant 2 : i32
    %107 = arith.addi %c0_i32_46, %c2_i32_47 : i32
    %c1_i32_48 = arith.constant 1 : i32
    scf.for %arg7 = %c0_i32_46 to %107 step %c1_i32_48  : i32 {
      %c1_i32_102 = arith.constant 1 : i32
      %204 = arith.muli %arg7, %c1_i32_102 : i32
      %c0_i32_103 = arith.constant 0 : i32
      %205 = arith.addi %c0_i32_103, %204 : i32
      %c8_i32_104 = arith.constant 8 : i32
      %206 = arith.muli %205, %c8_i32_104 : i32
      %207 = tpu.assume_multiple %206, 8 : i32
      %208 = arith.index_cast %207 : i32 to index
      %c0_105 = arith.constant 0 : index
      %c0_106 = arith.constant 0 : index
      %209 = vector.load %arg5[%208, %c0_105, %c0_106] : memref<16x16x4xf32, #tpu.memory_space<vmem>>, vector<8x16x4xf32>
      %210 = vector.shape_cast %97 : vector<1x4xf32> to vector<1x1x4xf32>
      %211 = vector.broadcast %210 : vector<1x1x4xf32> to vector<8x16x4xf32>
      %212 = arith.subf %209, %211 : vector<8x16x4xf32>
      %213 = vector.shape_cast %106 : vector<1x4xf32> to vector<1x1x4xf32>
      %214 = vector.broadcast %213 : vector<1x1x4xf32> to vector<8x16x4xf32>
      %215 = arith.mulf %212, %214 : vector<8x16x4xf32>
      %cst_107 = arith.constant 0.000000e+00 : f32
      %216 = vector.broadcast %cst_107 : f32 to vector<8x16x4xf32>
      %217 = arith.maximumf %215, %216 : vector<8x16x4xf32>
      %218 = arith.truncf %217 : vector<8x16x4xf32> to vector<8x16x4xbf16>
      %219 = arith.index_cast %207 : i32 to index
      %c0_108 = arith.constant 0 : index
      %c0_109 = arith.constant 0 : index
      %220 = vector.load %arg6[%219, %c0_108, %c0_109] : memref<16x16x4xbf16, #tpu.memory_space<vmem>>, vector<8x16x4xbf16>
      tpu.vector_store %arg6[%219, %c0_108, %c0_109], %218 {strides = array<i32>} : memref<16x16x4xbf16, #tpu.memory_space<vmem>>, vector<8x16x4xbf16>,
    }
    %c2_i32_49 = arith.constant 2 : i32
    %c0_50 = arith.constant 0 : index
    %c0_51 = arith.constant 0 : index
    %108 = vector.load %arg3[%c0_50, %c0_51] : memref<36x4xbf16, #tpu.memory_space<vmem>>, vector<36x4xbf16>
    %cst_52 = arith.constant 0.000000e+00 : f32
    %109 = vector.broadcast %cst_52 : f32 to vector<1x4xf32>
    %c0_i32_53 = arith.constant 0 : i32
    %c8_i32_54 = arith.constant 8 : i32
    %110 = arith.muli %c0_i32_53, %c8_i32_54 : i32
    %111 = tpu.assume_multiple %110, 8 : i32
    %c0_i32_55 = arith.constant 0 : i32
    %112 = arith.cmpi eq, %111, %c0_i32_55 : i32
    %c1_i32_56 = arith.constant 1 : i32
    %113 = arith.subi %111, %c1_i32_56 : i32
    %c1_i32_57 = arith.constant 1 : i32
    %114 = arith.select %112, %c1_i32_57, %113 : i32
    %c8_i32_58 = arith.constant 8 : i32
    %115 = arith.addi %111, %c8_i32_58 : i32
    %c16_i32_59 = arith.constant 16 : i32
    %116 = arith.cmpi eq, %115, %c16_i32_59 : i32
    %c8_i32_60 = arith.constant 8 : i32
    %117 = arith.addi %111, %c8_i32_60 : i32
    %c14_i32_61 = arith.constant 14 : i32
    %118 = arith.select %116, %c14_i32_61, %117 : i32
    %119 = arith.index_cast %114 : i32 to index
    %c0_62 = arith.constant 0 : index
    %c0_63 = arith.constant 0 : index
    %120 = vector.load %arg6[%119, %c0_62, %c0_63] : memref<16x16x4xbf16, #tpu.memory_space<vmem>>, vector<1x16x4xbf16>
    %121 = arith.index_cast %111 : i32 to index
    %c0_64 = arith.constant 0 : index
    %c0_65 = arith.constant 0 : index
    %122 = vector.load %arg6[%121, %c0_64, %c0_65] : memref<16x16x4xbf16, #tpu.memory_space<vmem>>, vector<8x16x4xbf16>
    %123 = arith.index_cast %118 : i32 to index
    %c0_66 = arith.constant 0 : index
    %c0_67 = arith.constant 0 : index
    %124 = vector.load %arg6[%123, %c0_66, %c0_67] : memref<16x16x4xbf16, #tpu.memory_space<vmem>>, vector<1x16x4xbf16>
    %125 = tpu.concatenate %120, %122, %124 in 0 : vector<1x16x4xbf16>, vector<8x16x4xbf16>, vector<1x16x4xbf16> -> vector<10x16x4xbf16>
    %126 = vector.extract_strided_slice %125 {offsets = [0, 1, 0], sizes = [10, 1, 4], strides = [1, 1, 1]} : vector<10x16x4xbf16> to vector<10x1x4xbf16>
    %127 = vector.extract_strided_slice %125 {offsets = [0, 14, 0], sizes = [10, 1, 4], strides = [1, 1, 1]} : vector<10x16x4xbf16> to vector<10x1x4xbf16>
    %128 = tpu.concatenate %126, %125, %127 in 1 : vector<10x1x4xbf16>, vector<10x16x4xbf16>, vector<10x1x4xbf16> -> vector<10x18x4xbf16>
    %129 = vector.extract_strided_slice %128 {offsets = [0, 0, 0], sizes = [8, 16, 4], strides = [1, 1, 1]} : vector<10x18x4xbf16> to vector<8x16x4xbf16>
    %130 = vector.extract_strided_slice %128 {offsets = [0, 1, 0], sizes = [8, 16, 4], strides = [1, 1, 1]} : vector<10x18x4xbf16> to vector<8x16x4xbf16>
    %131 = vector.extract_strided_slice %128 {offsets = [0, 2, 0], sizes = [8, 16, 4], strides = [1, 1, 1]} : vector<10x18x4xbf16> to vector<8x16x4xbf16>
    %132 = vector.extract_strided_slice %128 {offsets = [1, 0, 0], sizes = [8, 16, 4], strides = [1, 1, 1]} : vector<10x18x4xbf16> to vector<8x16x4xbf16>
    %133 = vector.extract_strided_slice %128 {offsets = [1, 1, 0], sizes = [8, 16, 4], strides = [1, 1, 1]} : vector<10x18x4xbf16> to vector<8x16x4xbf16>
    %134 = vector.extract_strided_slice %128 {offsets = [1, 2, 0], sizes = [8, 16, 4], strides = [1, 1, 1]} : vector<10x18x4xbf16> to vector<8x16x4xbf16>
    %135 = vector.extract_strided_slice %128 {offsets = [2, 0, 0], sizes = [8, 16, 4], strides = [1, 1, 1]} : vector<10x18x4xbf16> to vector<8x16x4xbf16>
    %136 = vector.extract_strided_slice %128 {offsets = [2, 1, 0], sizes = [8, 16, 4], strides = [1, 1, 1]} : vector<10x18x4xbf16> to vector<8x16x4xbf16>
    %137 = vector.extract_strided_slice %128 {offsets = [2, 2, 0], sizes = [8, 16, 4], strides = [1, 1, 1]} : vector<10x18x4xbf16> to vector<8x16x4xbf16>
    %138 = tpu.concatenate %129, %130, %131, %132, %133, %134, %135, %136, %137 in 2 : vector<8x16x4xbf16>, vector<8x16x4xbf16>, vector<8x16x4xbf16>, vector<8x16x4xbf16>, vector<8x16x4xbf16>, vector<8x16x4xbf16>, vector<8x16x4xbf16>, vector<8x16x4xbf16>, vector<8x16x4xbf16> -> vector<8x16x36xbf16>
    %139 = vector.shape_cast %138 : vector<8x16x36xbf16> to vector<128x36xbf16>
    %cst_68 = arith.constant dense<0.000000e+00> : vector<128x4xf32>
    %140 = tpu.matmul %139, %108, %cst_68 {dimension_numbers = #tpu.dot_dimension_numbers<[1], [0], [0], [1], [0, 0, 1, 1], [], []>} : vector<128x36xbf16>, vector<36x4xbf16>, vector<128x4xf32> -> vector<128x4xf32>
    %141 = vector.shape_cast %140 : vector<128x4xf32> to vector<8x16x4xf32>
    %142 = arith.index_cast %111 : i32 to index
    %c0_69 = arith.constant 0 : index
    %c0_70 = arith.constant 0 : index
    %143 = vector.load %arg5[%142, %c0_69, %c0_70] : memref<16x16x4xf32, #tpu.memory_space<vmem>>, vector<8x16x4xf32>
    tpu.vector_store %arg5[%142, %c0_69, %c0_70], %141 {strides = array<i32>} : memref<16x16x4xf32, #tpu.memory_space<vmem>>, vector<8x16x4xf32>,
    %cst_71 = arith.constant dense<0.000000e+00> : vector<4xf32>
    %144 = vector.multi_reduction <add>, %140, %cst_71 [0] : vector<128x4xf32> to vector<4xf32>
    %145 = vector.shape_cast %144 : vector<4xf32> to vector<1x4xf32>
    %146 = arith.addf %109, %145 : vector<1x4xf32>
    %147 = arith.mulf %140, %140 : vector<128x4xf32>
    %cst_72 = arith.constant dense<0.000000e+00> : vector<4xf32>
    %148 = vector.multi_reduction <add>, %147, %cst_72 [0] : vector<128x4xf32> to vector<4xf32>
    %149 = vector.shape_cast %148 : vector<4xf32> to vector<1x4xf32>
    %150 = arith.addf %109, %149 : vector<1x4xf32>
    %c1_i32_73 = arith.constant 1 : i32
    %c8_i32_74 = arith.constant 8 : i32
    %151 = arith.muli %c1_i32_73, %c8_i32_74 : i32
    %152 = tpu.assume_multiple %151, 8 : i32
    %c0_i32_75 = arith.constant 0 : i32
    %153 = arith.cmpi eq, %152, %c0_i32_75 : i32
    %c1_i32_76 = arith.constant 1 : i32
    %154 = arith.subi %152, %c1_i32_76 : i32
    %c1_i32_77 = arith.constant 1 : i32
    %155 = arith.select %153, %c1_i32_77, %154 : i32
    %c8_i32_78 = arith.constant 8 : i32
    %156 = arith.addi %152, %c8_i32_78 : i32
    %c16_i32_79 = arith.constant 16 : i32
    %157 = arith.cmpi eq, %156, %c16_i32_79 : i32
    %c8_i32_80 = arith.constant 8 : i32
    %158 = arith.addi %152, %c8_i32_80 : i32
    %c14_i32_81 = arith.constant 14 : i32
    %159 = arith.select %157, %c14_i32_81, %158 : i32
    %160 = arith.index_cast %155 : i32 to index
    %c0_82 = arith.constant 0 : index
    %c0_83 = arith.constant 0 : index
    %161 = vector.load %arg6[%160, %c0_82, %c0_83] : memref<16x16x4xbf16, #tpu.memory_space<vmem>>, vector<1x16x4xbf16>
    %162 = arith.index_cast %152 : i32 to index
    %c0_84 = arith.constant 0 : index
    %c0_85 = arith.constant 0 : index
    %163 = vector.load %arg6[%162, %c0_84, %c0_85] : memref<16x16x4xbf16, #tpu.memory_space<vmem>>, vector<8x16x4xbf16>
    %164 = arith.index_cast %159 : i32 to index
    %c0_86 = arith.constant 0 : index
    %c0_87 = arith.constant 0 : index
    %165 = vector.load %arg6[%164, %c0_86, %c0_87] : memref<16x16x4xbf16, #tpu.memory_space<vmem>>, vector<1x16x4xbf16>
    %166 = tpu.concatenate %161, %163, %165 in 0 : vector<1x16x4xbf16>, vector<8x16x4xbf16>, vector<1x16x4xbf16> -> vector<10x16x4xbf16>
    %167 = vector.extract_strided_slice %166 {offsets = [0, 1, 0], sizes = [10, 1, 4], strides = [1, 1, 1]} : vector<10x16x4xbf16> to vector<10x1x4xbf16>
    %168 = vector.extract_strided_slice %166 {offsets = [0, 14, 0], sizes = [10, 1, 4], strides = [1, 1, 1]} : vector<10x16x4xbf16> to vector<10x1x4xbf16>
    %169 = tpu.concatenate %167, %166, %168 in 1 : vector<10x1x4xbf16>, vector<10x16x4xbf16>, vector<10x1x4xbf16> -> vector<10x18x4xbf16>
    %170 = vector.extract_strided_slice %169 {offsets = [0, 0, 0], sizes = [8, 16, 4], strides = [1, 1, 1]} : vector<10x18x4xbf16> to vector<8x16x4xbf16>
    %171 = vector.extract_strided_slice %169 {offsets = [0, 1, 0], sizes = [8, 16, 4], strides = [1, 1, 1]} : vector<10x18x4xbf16> to vector<8x16x4xbf16>
    %172 = vector.extract_strided_slice %169 {offsets = [0, 2, 0], sizes = [8, 16, 4], strides = [1, 1, 1]} : vector<10x18x4xbf16> to vector<8x16x4xbf16>
    %173 = vector.extract_strided_slice %169 {offsets = [1, 0, 0], sizes = [8, 16, 4], strides = [1, 1, 1]} : vector<10x18x4xbf16> to vector<8x16x4xbf16>
    %174 = vector.extract_strided_slice %169 {offsets = [1, 1, 0], sizes = [8, 16, 4], strides = [1, 1, 1]} : vector<10x18x4xbf16> to vector<8x16x4xbf16>
    %175 = vector.extract_strided_slice %169 {offsets = [1, 2, 0], sizes = [8, 16, 4], strides = [1, 1, 1]} : vector<10x18x4xbf16> to vector<8x16x4xbf16>
    %176 = vector.extract_strided_slice %169 {offsets = [2, 0, 0], sizes = [8, 16, 4], strides = [1, 1, 1]} : vector<10x18x4xbf16> to vector<8x16x4xbf16>
    %177 = vector.extract_strided_slice %169 {offsets = [2, 1, 0], sizes = [8, 16, 4], strides = [1, 1, 1]} : vector<10x18x4xbf16> to vector<8x16x4xbf16>
    %178 = vector.extract_strided_slice %169 {offsets = [2, 2, 0], sizes = [8, 16, 4], strides = [1, 1, 1]} : vector<10x18x4xbf16> to vector<8x16x4xbf16>
    %179 = tpu.concatenate %170, %171, %172, %173, %174, %175, %176, %177, %178 in 2 : vector<8x16x4xbf16>, vector<8x16x4xbf16>, vector<8x16x4xbf16>, vector<8x16x4xbf16>, vector<8x16x4xbf16>, vector<8x16x4xbf16>, vector<8x16x4xbf16>, vector<8x16x4xbf16>, vector<8x16x4xbf16> -> vector<8x16x36xbf16>
    %180 = vector.shape_cast %179 : vector<8x16x36xbf16> to vector<128x36xbf16>
    %cst_88 = arith.constant dense<0.000000e+00> : vector<128x4xf32>
    %181 = tpu.matmul %180, %108, %cst_88 {dimension_numbers = #tpu.dot_dimension_numbers<[1], [0], [0], [1], [0, 0, 1, 1], [], []>} : vector<128x36xbf16>, vector<36x4xbf16>, vector<128x4xf32> -> vector<128x4xf32>
    %182 = vector.shape_cast %181 : vector<128x4xf32> to vector<8x16x4xf32>
    %183 = arith.index_cast %152 : i32 to index
    %c0_89 = arith.constant 0 : index
    %c0_90 = arith.constant 0 : index
    %184 = vector.load %arg5[%183, %c0_89, %c0_90] : memref<16x16x4xf32, #tpu.memory_space<vmem>>, vector<8x16x4xf32>
    tpu.vector_store %arg5[%183, %c0_89, %c0_90], %182 {strides = array<i32>} : memref<16x16x4xf32, #tpu.memory_space<vmem>>, vector<8x16x4xf32>,
    %cst_91 = arith.constant dense<0.000000e+00> : vector<4xf32>
    %185 = vector.multi_reduction <add>, %181, %cst_91 [0] : vector<128x4xf32> to vector<4xf32>
    %186 = vector.shape_cast %185 : vector<4xf32> to vector<1x4xf32>
    %187 = arith.addf %146, %186 : vector<1x4xf32>
    %188 = arith.mulf %181, %181 : vector<128x4xf32>
    %cst_92 = arith.constant dense<0.000000e+00> : vector<4xf32>
    %189 = vector.multi_reduction <add>, %188, %cst_92 [0] : vector<128x4xf32> to vector<4xf32>
    %190 = vector.shape_cast %189 : vector<4xf32> to vector<1x4xf32>
    %191 = arith.addf %150, %190 : vector<1x4xf32>
    %c2_i32_93 = arith.constant 2 : i32
    %cst_94 = arith.constant 3.906250e-03 : f32
    %192 = vector.broadcast %cst_94 : f32 to vector<1x4xf32>
    %193 = arith.mulf %187, %192 : vector<1x4xf32>
    %cst_95 = arith.constant 3.906250e-03 : f32
    %194 = vector.broadcast %cst_95 : f32 to vector<1x4xf32>
    %195 = arith.mulf %191, %194 : vector<1x4xf32>
    %196 = arith.mulf %193, %193 : vector<1x4xf32>
    %197 = arith.subf %195, %196 : vector<1x4xf32>
    %cst_96 = arith.constant 0.000000e+00 : f32
    %198 = vector.broadcast %cst_96 : f32 to vector<1x4xf32>
    %199 = arith.maximumf %197, %198 : vector<1x4xf32>
    %cst_97 = arith.constant 9.99999974E-6 : f32
    %200 = vector.broadcast %cst_97 : f32 to vector<1x4xf32>
    %201 = arith.addf %199, %200 : vector<1x4xf32>
    %202 = math.rsqrt %201 : vector<1x4xf32>
    %c0_i32_98 = arith.constant 0 : i32
    %c2_i32_99 = arith.constant 2 : i32
    %203 = arith.addi %c0_i32_98, %c2_i32_99 : i32
    %c1_i32_100 = arith.constant 1 : i32
    scf.for %arg7 = %c0_i32_98 to %203 step %c1_i32_100  : i32 {
      %c1_i32_102 = arith.constant 1 : i32
      %204 = arith.muli %arg7, %c1_i32_102 : i32
      %c0_i32_103 = arith.constant 0 : i32
      %205 = arith.addi %c0_i32_103, %204 : i32
      %c8_i32_104 = arith.constant 8 : i32
      %206 = arith.muli %205, %c8_i32_104 : i32
      %207 = tpu.assume_multiple %206, 8 : i32
      %208 = arith.index_cast %207 : i32 to index
      %c0_105 = arith.constant 0 : index
      %c0_106 = arith.constant 0 : index
      %209 = vector.load %arg5[%208, %c0_105, %c0_106] : memref<16x16x4xf32, #tpu.memory_space<vmem>>, vector<8x16x4xf32>
      %c0_107 = arith.constant 0 : index
      %210 = arith.index_cast %207 : i32 to index
      %c0_108 = arith.constant 0 : index
      %c0_109 = arith.constant 0 : index
      %211 = vector.load %arg1[%c0_107, %210, %c0_108, %c0_109] : memref<1x16x16x4xf32, #tpu.memory_space<vmem>>, vector<1x8x16x4xf32>
      %212 = vector.shape_cast %211 : vector<1x8x16x4xf32> to vector<8x16x4xf32>
      %213 = vector.shape_cast %193 : vector<1x4xf32> to vector<1x1x4xf32>
      %214 = vector.broadcast %213 : vector<1x1x4xf32> to vector<8x16x4xf32>
      %215 = arith.subf %209, %214 : vector<8x16x4xf32>
      %216 = vector.shape_cast %202 : vector<1x4xf32> to vector<1x1x4xf32>
      %217 = vector.broadcast %216 : vector<1x1x4xf32> to vector<8x16x4xf32>
      %218 = arith.mulf %215, %217 : vector<8x16x4xf32>
      %219 = arith.addf %218, %212 : vector<8x16x4xf32>
      %c0_110 = arith.constant 0 : index
      %220 = arith.index_cast %207 : i32 to index
      %c0_111 = arith.constant 0 : index
      %c0_112 = arith.constant 0 : index
      %221 = vector.load %arg4[%c0_110, %220, %c0_111, %c0_112] : memref<1x16x16x4xf32, #tpu.memory_space<vmem>>, vector<1x8x16x4xf32>
      %222 = vector.shape_cast %221 : vector<1x8x16x4xf32> to vector<8x16x4xf32>
      %223 = vector.shape_cast %219 : vector<8x16x4xf32> to vector<1x8x16x4xf32>
      tpu.vector_store %arg4[%c0_110, %220, %c0_111, %c0_112], %223 {strides = array<i32>} : memref<1x16x16x4xf32, #tpu.memory_space<vmem>>, vector<1x8x16x4xf32>,
    }
    %c2_i32_101 = arith.constant 2 : i32
    return
  }
  func.func @transform_0(%arg0: i32) -> (i32, i32, i32, i32) {
    %c0_i32 = arith.constant 0 : i32
    %c0_i32_0 = arith.constant 0 : i32
    %c0_i32_1 = arith.constant 0 : i32
    %c0_i32_2 = arith.constant 0 : i32
    return %arg0, %c0_i32, %c0_i32_0, %c0_i32_1 : i32, i32, i32, i32
  }
  func.func @transform_1(%arg0: i32) -> (i32, i32) {
    %c0_i32 = arith.constant 0 : i32
    %c0_i32_0 = arith.constant 0 : i32
    %c0_i32_1 = arith.constant 0 : i32
    return %c0_i32, %c0_i32_0 : i32, i32
  }
  func.func @transform_2(%arg0: i32) -> (i32, i32) {
    %c0_i32 = arith.constant 0 : i32
    %c0_i32_0 = arith.constant 0 : i32
    %c0_i32_1 = arith.constant 0 : i32
    return %c0_i32, %c0_i32_0 : i32, i32
  }
  func.func @transform_3(%arg0: i32) -> (i32, i32, i32, i32) {
    %c0_i32 = arith.constant 0 : i32
    %c0_i32_0 = arith.constant 0 : i32
    %c0_i32_1 = arith.constant 0 : i32
    %c0_i32_2 = arith.constant 0 : i32
    return %arg0, %c0_i32, %c0_i32_0, %c0_i32_1 : i32, i32, i32, i32
  }
}

</mosaic_0001>

<bundles_post_ra>
// kernel: resnet_block_forward.1
= control target key start
LH: loop header
LB: loop body
LE: loop exit
PB: predicated region body
PF: predicated region fallthrough
CT: control target
= control target key end

     0   :  { %s4114_s12 = smov 0   ;;  %s6082_s0 = inlined_call_operand.vmem [shape: f32[2,16,16,4], index: 0, kind: input, shape index: {}]   ;;  %s6083_s1 = inlined_call_operand.vmem [shape: bf16[36,4], index: 1, kind: input, shape index: {}]   ;;  %s6084_s2 = inlined_call_operand.vmem [shape: bf16[36,4], index: 2, kind: input, shape index: {}]   ;;  %s6085_s3 = inlined_call_operand.vmem [shape: f32[2,16,16,4], index: 3, kind: output, shape index: {}]  }
   0x1 LB: > { %s3801_s13 = sadd.s32 4294967295, %s4076_s12   ;;  %p3805_p0 = scmp.ge.s32.totalorder %s4076_s12, 1  ;;  %s4076_s12 = sphi %s4114_s12, %s13_s12  }
   0x2   : > { %p137_p1 = scmp.lt.s32.totalorder %s4076_s12, 3 }
   0x4   : > { %p138_p2 = pnand %p3805_p0, %p137_p1 }
   0x5   : > { %p161_p3 = scmp.lt.s32.totalorder (!%p138_p2), %s3801_s13, 1  ;;  %vm339_vm0 = vcmask (!%p138_p2), 1040384   ;;  %vm340_vm1 = vsmask.f32 (!%p138_p2), 256  ;;  %vm491_vm2 = vcmask (!%p138_p2), 1046528   ;;  %s4086_s21 = smov (!%p138_p2), 12  }
   0x6   : > { %141 = sbr.rel (%p138_p2) target bundleno = 1341 (0x53d), region = 32  ;;  %vm4141_vm3 = vmand (!%p138_p2), %vm339_vm0, %vm340_vm1  ;;  %vm362_vm4 = vsmask.f32 (!%p138_p2), 7424  ;;  %s4087_s22 = smov (!%p138_p2), 8   ;;  %vm830_vm5 = vcmask (!%p138_p2), 1041408   ;;  %vm662_vm6 = vcmask (!%p138_p2), 31744  }
   0x7   : > { %s4088_s23 = smov (!%p138_p2), 4   ;;  %s4089_s24 = smov (!%p138_p2), 16   ;;  %vm679_vm7 = vcmask (!%p138_p2), 64512   ;;  %vm696_vm8 = vcmask (!%p138_p2), 97280   ;;  %vm713_vm9 = vcmask (!%p138_p2), 130048   ;;  %vm730_vm10 = vcmask (!%p138_p2), 162816  }
   0x8   : > { %s4090_s25 = smov (!%p138_p2), 20   ;;  %s4091_s28 = smov (!%p138_p2), 24   ;;  %vm747_vm11 = vcmask (!%p138_p2), 195584   ;;  %vm764_vm12 = vcmask (!%p138_p2), 228352   ;;  %vm781_vm13 = vcmask (!%p138_p2), 261120   ;;  %vm813_vm14 = vcmask (!%p138_p2), 293888  }
   0x9   : > { %s4092_s4 = smov (!%p138_p2), 28   ;;  %s4093_s7 = smov (!%p138_p2), 32  }
   0xa   : > { %s5066_s8 = smov (!%p138_p2), 0  }
   0xd   : > { %s6089_s13 = smov (!%p161_p3, %s3801_s13), 1 }
   0xe   : > { %s3879_s14 = sshll.u32 %s6089_s13, 8 }
   0xf   : > { %s4125_s17 = scalar_lea.vmem %s6082_s0, %s3879_s14  ;;  %s4130_s20 = scalar_lea.vmem %s6085_s3, %s3879_s14 }
  0x10   : > { %v192_v0 = vld [vmem:[%s4125_s17 + $0x10] sm:$0xff]  ;;  %v193_v1 = vld [vmem:[%s4125_s17 + $0x18] sm:$0xff]  ;;  %v190_v2 = vld [vmem:[%s4125_s17] sm:$0xff] }
  0x11   : > { %v207_v3 = vpack.c.bf16 %v193_v1, %v192_v0  ;;  %v191_v4 = vld [vmem:[%s4125_s17 + $0x8] sm:$0xff]  ;;  %v3827_v5 = vld [vmem:[%s4125_s17 + $0x80] sm:$0xff]  ;;  %v3825_v9 = vld [vmem:[%s4125_s17 + $0x70] sm:$0xff] }
  0x12   : > { %v3828_v6 = vld [vmem:[%s4125_s17 + $0x88] sm:$0xff]  ;;  %v206_v7 = vpack.c.bf16 %v191_v4, %v190_v2  ;;  %v3826_v10 = vld [vmem:[%s4125_s17 + $0x78] sm:$0xff]  ;;  %v3829_v61 = vld [vmem:[%s4125_s17 + $0x90] sm:$0xff] }
  0x13   : > { %v1069_v8 = vpack.c.bf16 %v3828_v6, %v3827_v5  ;;  %v226_v11 = vshrl.u32 %v207_v3, 16  ;;  %v268_v12 = vshll.u32 %v207_v3, 16  ;;  %v1050_v13 = vpack.c.bf16 %v3826_v10, %v3825_v9  ;;  %v3830_v62 = vld [vmem:[%s4125_s17 + $0x98] sm:$0xff] }
  0x14   : > { %v223_v14 = vshrl.u32 %v206_v7, 16  ;;  %v264_v15 = vshll.u32 %v206_v7, 16  ;;  %v1070_v9 = vpack.c.bf16 %v3830_v62, %v3829_v61 }
  0x15   : > { %v1086_v16 = vshrl.u32 %v1069_v8, 16  ;;  %v1127_v17 = vshll.u32 %v1069_v8, 16  ;;  %v267_v18 = vrot.slane %v226_v11, 7  ;;  %v319_v20 = vrot.slane %v268_v12, 7 }
  0x16   : > { %v1083_v21 = vshrl.u32 %v1050_v13, 16  ;;  %v1123_v22 = vshll.u32 %v1050_v13, 16  ;;  %v263_v23 = vrot.slane %v223_v14, 7  ;;  %v320_v25 = vrot.slane %v264_v15, 7 }
  0x17   : > { %v1126_v24 = vrot.slane %v1086_v16, 7  ;;  %v1183_v26 = vrot.slane %v1127_v17, 7  ;;  %v270_v27 = vor.u32 %v268_v12, %v267_v18  ;;  %v352_v28 = vsel %vm4141_vm3, %v267_v18, %v319_v20 }
  0x18   : > { %v1122_v29 = vrot.slane %v1083_v21, 7  ;;  %v1182_v30 = vrot.slane %v1123_v22, 7  ;;  %v266_v31 = vor.u32 %v264_v15, %v263_v23  ;;  %v353_v33 = vsel %vm4141_vm3, %v263_v23, %v320_v25  ;;  %v194_v25 = vld [vmem:[%s4125_s17 + $0x20] sm:$0xff] }
  0x19   : > { %v1129_v32 = vor.u32 %v1127_v17, %v1126_v24  ;;  %v1213_v34 = vsel %vm4141_vm3, %v1126_v24, %v1183_v26  ;;  %v4153_v35 = vsel %vm4141_vm3, %v226_v11, %v270_v27  ;;  %v496_v36 = vrot.slane %v353_v33, 1  ;;  %v195_v26 = vld [vmem:[%s4125_s17 + $0x28] sm:$0xff] }
  0x1a   : > { %v1354_v37 = vrot.slane %v1213_v34, 1  ;;  %v493_v38 = vrot.slane %v352_v28, 1  ;;  %535 = vrot.lane.b32.xlu0 %v4153_v35, %s4086_s21  ;;  %v4159_v39 = vsel %vm4141_vm3, %v223_v14, %v266_v31  ;;  %v492_v41 = vrot.slane %v4153_v35, 1 }
  0x1b   : > { %v4163_v40 = vsel %vm4141_vm3, %v1086_v16, %v1129_v32  ;;  %v1125_v42 = vor.u32 %v1123_v22, %v1122_v29  ;;  %533 = vrot.lane.b32.xlu1 %v4159_v39, %s4086_s21  ;;  %v495_v43 = vrot.slane %v4159_v39, 1  ;;  %v1212_v45 = vsel %vm4141_vm3, %v1122_v29, %v1182_v30  ;;  %v3831_v32 = vld [vmem:[%s4125_s17 + $0xa0] sm:$0xff] }
  0x1c   : > { %v1353_v44 = vrot.slane %v4163_v40, 1  ;;  %v364_v47 = vshrl.u32 %v4153_v35, 16  ;;  %v366_v48 = vshll.u32 %v4153_v35, 16  ;;  %v1351_v51 = vrot.slane %v1212_v45, 1 }
  0x1d   : > { %v4174_v46 = vsel %vm4141_vm3, %v1083_v21, %v1125_v42  ;;  %v4179_v49 = vsel %vm491_vm2, %v495_v43, %v496_v36  ;;  %v371_v52 = vshll.u32 %v352_v28, 16  ;;  %v4188_v54 = vsel %vm491_vm2, %v492_v41, %v493_v38 }
  0x1e   : > { %v1350_v50 = vrot.slane %v4174_v46, 1  ;;  %518 = vrot.lane.b32.xlu0 %v4179_v49, %s4087_s22  ;;  %v4185_v53 = vsel %vm491_vm2, %v1353_v44, %v1354_v37  ;;  %v368_v55 = vrot.slane %v366_v48, 1  ;;  %v378_v56 = vshll.u32 %v4159_v39, 16 }
  0x1f   : > { %1391 = vrot.lane.b32.xlu1 %v4163_v40, %s4086_s21  ;;  %v373_v57 = vrot.slane %v371_v52, 1  ;;  %v376_v58 = vshrl.u32 %v4159_v39, 16  ;;  %v1223_v59 = vshrl.u32 %v4174_v46, 16  ;;  %v1225_v60 = vshll.u32 %v4174_v46, 16 }
  0x20   : > { %v369_v63 = vor.u32 %v368_v55, %v364_v47  ;;  %v380_v0 = vrot.slane %v378_v56, 1  ;;  %v383_v1 = vshll.u32 %v353_v33, 16  ;;  %v1230_v2 = vshll.u32 %v1212_v45, 16  ;;  %v3832_v33 = vld [vmem:[%s4125_s17 + $0xa8] sm:$0xff] }
  0x21   : > { %v1352_v3 = vsel %vm491_vm2, %v1350_v50, %v1351_v51  ;;  %v1227_v4 = vrot.slane %v1225_v60, 1  ;;  %v1237_v5 = vshll.u32 %v4163_v40, 16  ;;  %v1235_v7 = vshrl.u32 %v4163_v40, 16 }
  0x22   : > { %1376 = vrot.lane.b32.xlu0 %v4185_v53, %s4087_s22  ;;  %v4203_v6 = vsel %vm362_vm4, %v369_v63, %v373_v57  ;;  %v1242_v8 = vshll.u32 %v1213_v34, 16  ;;  %v1232_v11 = vrot.slane %v1230_v2, 1  ;;  %v381_v13 = vor.u32 %v380_v0, %v376_v58  ;;  %v4053_v0 = vld [vmem:[%s6083_s1 + $0x8] sm:$0xff]  }
  0x23   : > { %516 = vrot.lane.b32.xlu1 %v4188_v54, %s4087_s22  ;;  %v1228_v10 = vor.u32 %v1227_v4, %v1223_v59  ;;  %v1239_v12 = vrot.slane %v1237_v5, 1  ;;  %v385_v14 = vrot.slane %v383_v1, 1  ;;  %v1089_v15 = vshrl.u32 %v1070_v9, 16  ;;  %v4052_v59 = vld [vmem:[%s6083_s1] sm:$0xff]  }
  0x24   : > { %v1131_v16 = vshll.u32 %v1070_v9, 16  ;;  %v1244_v17 = vrot.slane %v1242_v8, 1  ;;  %v208_v31 = vpack.c.bf16 %v195_v26, %v194_v25  ;;  %v1071_v41 = vpack.c.bf16 %v3832_v33, %v3831_v32  ;;  %3928 = vmatprep.subr.bf16.mxu0 %v4052_v59  ;;  %3950 = vmatprep.subr.bf16.mxu1 %v4052_v59 }
  0x25   : > { %v1130_v18 = vrot.slane %v1089_v15, 7  ;;  %v1233_v20 = vsel %vm362_vm4, %v1228_v10, %v1232_v11  ;;  %v1240_v21 = vor.u32 %v1239_v12, %v1235_v7  ;;  %v386_v22 = vsel %vm362_vm4, %v381_v13, %v385_v14  ;;  %3929 = vmatpush3.bf16.msra.mxu0 %v4052_v59  ;;  %3951 = vmatpush3.bf16.msra.mxu1 %v4052_v59  ;;  %v4054_v12 = vld [vmem:[%s6083_s1 + $0x10] ss:$0 sps:$4 sm:$0x33]   ;;  %v3835_v59 = vld [vmem:[%s4125_s17 + $0xc0] sm:$0xff] }
  0x26   : > { %459 = vrot.lane.b32.xlu0 %v4203_v6, %s4088_s23  ;;  %v1184_v24 = vrot.slane %v1131_v16, 7  ;;  %v229_v38 = vshrl.u32 %v208_v31, 16  ;;  %v272_v45 = vshll.u32 %v208_v31, 16  ;;  %v1092_v47 = vshrl.u32 %v1071_v41, 16  ;;  %3930 = vmatprep.subr.bf16.mxu0 %v4053_v0 }
  0x27   : > { %1374 = vrot.lane.b32.xlu1 %v1352_v3, %s4087_s22  ;;  %v1133_v23 = vor.u32 %v1131_v16, %v1130_v18  ;;  %v1245_v28 = vsel %vm362_vm4, %v1240_v21, %v1244_v17  ;;  %v1135_v52 = vshll.u32 %v1071_v41, 16  ;;  %3952 = vmatprep.subr.bf16.mxu1 %v4053_v0  ;;  %v832_v16 = vsel %vm830_vm5, %v4054_v12, 0  ;;  %v196_v21 = vld [vmem:[%s4125_s17 + $0x30] sm:$0xff] }
  0x28   : > { %v1214_v30 = vsel %vm4141_vm3, %v1130_v18, %v1184_v24  ;;  %v271_v44 = vrot.slane %v229_v38, 7  ;;  %v1134_v51 = vrot.slane %v1092_v47, 7  ;;  %v322_v58 = vrot.slane %v272_v45, 7 }
  0x29   : > { %v4218_v27 = vsel %vm4141_vm3, %v1089_v15, %v1133_v23  ;;  %v1254_v37 = vshll.u32 %v1214_v30, 16  ;;  %v1357_v56 = vrot.slane %v1214_v30, 1  ;;  %v1185_v63 = vrot.slane %v1135_v52, 7  ;;  %3931 = vmatpush3.bf16.msra.mxu0 %v4053_v0  ;;  %3953 = vmatpush3.bf16.msra.mxu1 %v4053_v0 }
  0x2a   : > { %1318 = vrot.lane.b32.xlu0 %v1233_v20, %s4088_s23  ;;  %v1249_v29 = vshll.u32 %v4218_v27, 16  ;;  %v1247_v34 = vshrl.u32 %v4218_v27, 16  ;;  %v274_v50 = vor.u32 %v272_v45, %v271_v44  ;;  %v1356_v55 = vrot.slane %v4218_v27, 1  ;;  %4016 = vmatprep.subr.msk.bf16.mxu0 %vm830_vm5, %v4054_v12 }
  0x2b   : > { %461 = vrot.lane.b32.xlu1 %v386_v22, %s4088_s23  ;;  %v1256_v43 = vrot.slane %v1254_v37, 1  ;;  %v355_v62 = vsel %vm4141_vm3, %v271_v44, %v322_v58  ;;  %v1215_v5 = vsel %vm4141_vm3, %v1134_v51, %v1185_v63  ;;  %4017 = vmatprep.subr.msk.bf16.mxu1 %vm830_vm5, %v4054_v12 }
  0x2c   : > { %v1251_v36 = vrot.slane %v1249_v29, 1  ;;  %v4247_v57 = vsel %vm4141_vm3, %v229_v38, %v274_v50  ;;  %v407_v3 = vshll.u32 %v355_v62, 16  ;;  %v1266_v11 = vshll.u32 %v1215_v5, 16  ;;  %v3834_v29 = vld [vmem:[%s4125_s17 + $0xb8] sm:$0xff]  ;;  %v199_v50 = vld [vmem:[%s4125_s17 + $0x48] sm:$0xff] }
  0x2d   : > { %v402_v60 = vshll.u32 %v4247_v57, 16  ;;  %v400_v1 = vshrl.u32 %v4247_v57, 16  ;;  %3933 = vmatpush3.bf16.msra.mxu0 %v832_v16  ;;  %3955 = vmatpush3.bf16.msra.mxu1 %v832_v16  ;;  %v501_v18 = vrot.slane %v4247_v57, 1  ;;  %v502_v20 = vrot.slane %v355_v62, 1 }
  0x2e   : > { %1320 = vrot.lane.b32.xlu0 %v1245_v28, %s4088_s23  ;;  %v1252_v42 = vor.u32 %v1251_v36, %v1247_v34  ;;  %v409_v9 = vrot.slane %v407_v3, 1  ;;  %v1268_v15 = vrot.slane %v1266_v11, 1  ;;  %v1360_v25 = vrot.slane %v1215_v5, 1 }
  0x2f   : > { %561 = vrot.lane.b32.xlu1 %v386_v22, %s4089_s24  ;;  %v404_v2 = vrot.slane %v402_v60, 1  ;;  %v197_v22 = vld [vmem:[%s4125_s17 + $0x38] sm:$0xff]  ;;  %v503_v23 = vsel %vm491_vm2, %v501_v18, %v502_v20 }
  0x30   : > { %v4238_v48 = vsel %vm362_vm4, %v1252_v42, %v1256_v43  ;;  %v209_v26 = vpack.c.bf16 %v197_v22, %v196_v21 }
  0x31   : > { %v405_v8 = vor.u32 %v404_v2, %v400_v1 }
  0x32   : > { %1393 = vrot.lane.b32.xlu0 %v4218_v27, %s4086_s21  ;;  %v232_v31 = vshrl.u32 %v209_v26, 16  ;;  %v276_v34 = vshll.u32 %v209_v26, 16 }
  0x33   : > { %1419 = vrot.lane.b32.xlu1 %v1245_v28, %s4089_s24  ;;  %v4290_v13 = vsel %vm362_vm4, %v405_v8, %v409_v9  ;;  %v3833_v28 = vld [vmem:[%s4125_s17 + $0xb0] sm:$0xff] }
  0x34   : > { %v1072_v32 = vpack.c.bf16 %v3834_v29, %v3833_v28  ;;  %v275_v33 = vrot.slane %v232_v31, 7  ;;  %v323_v43 = vrot.slane %v276_v34, 7 }
  0x36   : > { %563 = vrot.lane.b32.xlu0 %v4203_v6, %s4089_s24  ;;  %v1095_v36 = vshrl.u32 %v1072_v32, 16  ;;  %v1139_v38 = vshll.u32 %v1072_v32, 16 }
  0x37   : > { %581 = vrot.lane.b32.xlu1 %v4179_v49, %s4090_s25  ;;  %v1137_v49 = vor.u32 %v1135_v52, %v1134_v51 }
  0x38   : > { %v1138_v37 = vrot.slane %v1095_v36, 7  ;;  %v1186_v44 = vrot.slane %v1139_v38, 7 }
  0x39   : > { %v4262_v61 = vsel %vm4141_vm3, %v1092_v47, %v1137_v49  ;;  %v356_v47 = vsel %vm4141_vm3, %v275_v33, %v323_v43 }
  0x3a   : > { %1421 = vrot.lane.b32.xlu0 %v4238_v48, %s4089_s24  ;;  %v1261_v4 = vshll.u32 %v4262_v61, 16  ;;  %v1259_v7 = vshrl.u32 %v4262_v61, 16  ;;  %v1359_v24 = vrot.slane %v4262_v61, 1  ;;  %v1141_v42 = vor.u32 %v1139_v38, %v1138_v37 }
  0x3b   : > { %1439 = vrot.lane.b32.xlu1 %v4185_v53, %s4090_s25  ;;  %v4257_v53 = vsel %vm491_vm2, %v1356_v55, %v1357_v56  ;;  %v419_v55 = vshll.u32 %v356_v47, 16  ;;  %v1216_v56 = vsel %vm4141_vm3, %v1138_v37, %v1186_v44 }
  0x3c   : > { %v1263_v10 = vrot.slane %v1261_v4, 1  ;;  %v1361_v30 = vsel %vm491_vm2, %v1359_v24, %v1360_v25  ;;  %v4334_v45 = vsel %vm4141_vm3, %v1095_v36, %v1141_v42  ;;  %v1278_v60 = vshll.u32 %v1216_v56, 16 }
  0x3d   : > { %v1273_v49 = vshll.u32 %v4334_v45, 16  ;;  %v421_v63 = vrot.slane %v419_v55, 1  ;;  %v1271_v0 = vshrl.u32 %v4334_v45, 16  ;;  %v1362_v18 = vrot.slane %v4334_v45, 1 }
  0x3e   : > { %583 = vrot.lane.b32.xlu0 %v4188_v54, %s4090_s25  ;;  %v1264_v14 = vor.u32 %v1263_v10, %v1259_v7  ;;  %v1280_v7 = vrot.slane %v1278_v60, 1  ;;  %v1363_v20 = vrot.slane %v1216_v56, 1 }
  0x3f   : > { %598 = vrot.lane.b32.xlu1 %v4153_v35, %s4091_s28  ;;  %v1275_v1 = vrot.slane %v1273_v49, 1  ;;  %v200_v49 = vld [vmem:[%s4125_s17 + $0x50] sm:$0xff] }
  0x40   : > { %v1269_v17 = vsel %vm362_vm4, %v1264_v14, %v1268_v15  ;;  %v4383_v24 = vsel %vm491_vm2, %v1362_v18, %v1363_v20 }
  0x41   : > { %v1276_v5 = vor.u32 %v1275_v1, %v1271_v0  ;;  %v3837_v1 = vld [vmem:[%s4125_s17 + $0xd0] sm:$0xff] }
  0x42   : > { %1441 = vrot.lane.b32.xlu0 %v4257_v53, %s4090_s25 }
  0x43   : > { %1456 = vrot.lane.b32.xlu1 %v4218_v27, %s4091_s28  ;;  %v4364_v11 = vsel %vm362_vm4, %v1276_v5, %v1280_v7 }
  0x46   : > { %600 = vrot.lane.b32.xlu0 %v4247_v57, %s4091_s28 }
  0x47   : > { %626 = vrot.lane.b32.xlu1 %v4203_v6, %s4092_s4 }
  0x4a   : > { %1458 = vrot.lane.b32.xlu0 %v4262_v61, %s4091_s28 }
  0x4b   : > { %1484 = vrot.lane.b32.xlu1 %v4238_v48, %s4092_s4 }
  0x4e   : > { %628 = vrot.lane.b32.xlu0 %v4290_v13, %s4092_s4 }
  0x4f   : > { %646 = vrot.lane.b32.xlu1 %v4188_v54, %s4093_s7 }
  0x52   : > { %1486 = vrot.lane.b32.xlu0 %v1269_v17, %s4092_s4 }
  0x53   : > { %1504 = vrot.lane.b32.xlu1 %v4257_v53, %s4093_s7 }
  0x56   : > { %463 = vrot.lane.b32.xlu0 %v4203_v6, %s4088_s23  ;;  %v278_v6 = vor.u32 %v276_v34, %v275_v33 }
  0x57   : > { %648 = vrot.lane.b32.xlu1 %v503_v23, %s4093_s7 }
  0x58   : > { %v4326_v41 = vsel %vm4141_vm3, %v232_v31, %v278_v6 }
  0x59   : > { %v412_v51 = vshrl.u32 %v4326_v41, 16  ;;  %v504_v12 = vrot.slane %v4326_v41, 1 }
  0x5a   : > { %1322 = vrot.lane.b32.xlu0 %v4238_v48, %s4088_s23  ;;  %v198_v48 = vld [vmem:[%s4125_s17 + $0x40] sm:$0xff] }
  0x5b   : > { %1506 = vrot.lane.b32.xlu1 %v1361_v30, %s4093_s7  ;;  %v210_v58 = vpack.c.bf16 %v199_v50, %v198_v48 }
  0x5d   : > { %v235_v2 = vshrl.u32 %v210_v58, 16  ;;  %v280_v9 = vshll.u32 %v210_v58, 16  ;;  %v201_v58 = vld [vmem:[%s4125_s17 + $0x58] sm:$0xff] }
  0x5e   : > { %465 = vrot.lane.b32.xlu0 %v4290_v13, %s4088_s23 }
  0x5f   : > { %520 = vrot.lane.b32.xlu1 %v4188_v54, %s4087_s22  ;;  %v414_v54 = vshll.u32 %v4326_v41, 16  ;;  %v279_v8 = vrot.slane %v235_v2, 7  ;;  %v324_v21 = vrot.slane %v280_v9, 7 }
  0x61   : > { %v416_v52 = vrot.slane %v414_v54, 1  ;;  %v282_v14 = vor.u32 %v280_v9, %v279_v8  ;;  %v357_v25 = vsel %vm4141_vm3, %v279_v8, %v324_v21 }
  0x62   : > { %1324 = vrot.lane.b32.xlu0 %v1269_v17, %s4088_s23  ;;  %v508_v55 = vrot.slane %v357_v25, 1 }
  0x63   : > { %1378 = vrot.lane.b32.xlu1 %v4257_v53, %s4087_s22  ;;  %v3836_v53 = vld [vmem:[%s4125_s17 + $0xc8] sm:$0xff]  ;;  %v417_v62 = vor.u32 %v416_v52, %v412_v51  ;;  %v4376_v22 = vsel %vm4141_vm3, %v235_v2, %v282_v14  ;;  %v3838_v2 = vld [vmem:[%s4125_s17 + $0xd8] sm:$0xff] }
  0x64   : > { %v1073_v3 = vpack.c.bf16 %v3836_v53, %v3835_v59  ;;  %v426_v26 = vshll.u32 %v4376_v22, 16  ;;  %v424_v31 = vshrl.u32 %v4376_v22, 16  ;;  %v507_v52 = vrot.slane %v4376_v22, 1 }
  0x65   : > { %v4358_v4 = vsel %vm362_vm4, %v417_v62, %v421_v63  ;;  %v211_v63 = vpack.c.bf16 %v201_v58, %v200_v49  ;;  %v1074_v8 = vpack.c.bf16 %v3838_v2, %v3837_v1  ;;  %v3839_v49 = vld [vmem:[%s4125_s17 + $0xe0] sm:$0xff]  ;;  %v3840_v58 = vld [vmem:[%s4125_s17 + $0xe8] sm:$0xff] }
  0x66   : > { %522 = vrot.lane.b32.xlu0 %v503_v23, %s4087_s22  ;;  %v1098_v10 = vshrl.u32 %v1073_v3, 16  ;;  %v1143_v16 = vshll.u32 %v1073_v3, 16  ;;  %v428_v32 = vrot.slane %v426_v26, 1  ;;  %v4437_v53 = vsel %vm491_vm2, %v507_v52, %v508_v55 }
  0x67   : > { %537 = vrot.lane.b32.xlu1 %v4247_v57, %s4086_s21  ;;  %v238_v7 = vshrl.u32 %v211_v63, 16  ;;  %v1147_v18 = vshll.u32 %v1074_v8, 16 }
  0x68   : > { %v1142_v15 = vrot.slane %v1098_v10, 7  ;;  %v1187_v28 = vrot.slane %v1143_v16, 7  ;;  %v429_v6 = vor.u32 %v428_v32, %v424_v31  ;;  %v202_v31 = vld [vmem:[%s4125_s17 + $0x60] sm:$0xff]  ;;  %v203_v32 = vld [vmem:[%s4125_s17 + $0x68] sm:$0xff] }
  0x6a   : > { %1380 = vrot.lane.b32.xlu0 %v1361_v30, %s4087_s22  ;;  %v1217_v33 = vsel %vm4141_vm3, %v1142_v15, %v1187_v28 }
  0x6b   : > { %1395 = vrot.lane.b32.xlu1 %v4262_v61, %s4086_s21  ;;  %v1290_v36 = vshll.u32 %v1217_v33, 16  ;;  %v1366_v62 = vrot.slane %v1217_v33, 1 }
  0x6d   : > { %v1292_v44 = vrot.slane %v1290_v36, 1 }
  0x6e   : > { %539 = vrot.lane.b32.xlu0 %v4326_v41, %s4086_s21 }
  0x6f   : > { %565 = vrot.lane.b32.xlu1 %v4290_v13, %s4089_s24  ;;  %v505_v13 = vrot.slane %v356_v47, 1 }
  0x72   : > { %1397 = vrot.lane.b32.xlu0 %v4334_v45, %s4086_s21 }
  0x73   : > { %1423 = vrot.lane.b32.xlu1 %v1269_v17, %s4089_s24  ;;  %v4371_v17 = vsel %vm491_vm2, %v504_v12, %v505_v13  ;;  %v284_v12 = vshll.u32 %v211_v63, 16  ;;  %v1101_v13 = vshrl.u32 %v1074_v8, 16 }
  0x75   : > { %v325_v21 = vrot.slane %v284_v12, 7 }
  0x76   : > { %567 = vrot.lane.b32.xlu0 %v4358_v4, %s4089_s24 }
  0x77   : > { %585 = vrot.lane.b32.xlu1 %v503_v23, %s4090_s25  ;;  %v1145_v23 = vor.u32 %v1143_v16, %v1142_v15 }
  0x79   : > { %v4390_v29 = vsel %vm4141_vm3, %v1098_v10, %v1145_v23 }
  0x7a   : > { %1425 = vrot.lane.b32.xlu0 %v4364_v11, %s4089_s24  ;;  %v1285_v34 = vshll.u32 %v4390_v29, 16  ;;  %v1283_v38 = vshrl.u32 %v4390_v29, 16  ;;  %v1365_v60 = vrot.slane %v4390_v29, 1 }
  0x7b   : > { %1443 = vrot.lane.b32.xlu1 %v1361_v30, %s4090_s25  ;;  %v431_v30 = vshll.u32 %v357_v25, 16 }
  0x7c   : > { %v1287_v42 = vrot.slane %v1285_v34, 1  ;;  %v4451_v5 = vsel %vm491_vm2, %v1365_v60, %v1366_v62 }
  0x7d   : > { %v433_v37 = vrot.slane %v431_v30, 1  ;;  %v1188_v30 = vrot.slane %v1147_v18, 7 }
  0x7e   : > { %587 = vrot.lane.b32.xlu0 %v4371_v17, %s4090_s25  ;;  %v1288_v54 = vor.u32 %v1287_v42, %v1283_v38 }
  0x7f   : > { %602 = vrot.lane.b32.xlu1 %v4326_v41, %s4091_s28  ;;  %v4410_v43 = vsel %vm362_vm4, %v429_v6, %v433_v37  ;;  %v212_v37 = vpack.c.bf16 %v203_v32, %v202_v31 }
  0x80   : > { %v4421_v50 = vsel %vm362_vm4, %v1288_v54, %v1292_v44 }
  0x81   : > { %v241_v62 = vshrl.u32 %v212_v37, 16 }
  0x82   : > { %1445 = vrot.lane.b32.xlu0 %v4383_v24, %s4090_s25 }
  0x83   : > { %1460 = vrot.lane.b32.xlu1 %v4334_v45, %s4091_s28 }
  0x86   : > { %604 = vrot.lane.b32.xlu0 %v4376_v22, %s4091_s28 }
  0x87   : > { %630 = vrot.lane.b32.xlu1 %v4358_v4, %s4092_s4 }
  0x8a   : > { %1462 = vrot.lane.b32.xlu0 %v4390_v29, %s4091_s28 }
  0x8b   : > { %1488 = vrot.lane.b32.xlu1 %v4364_v11, %s4092_s4 }
  0x8c   : > { %v4412_v47 = vpop.permute.xlu0 %535 }
  0x8d   : > { %v4414_v48 = vpop.permute.xlu1 %533 }
  0x8e   : > { %632 = vrot.lane.b32.xlu0 %v4410_v43, %s4092_s4 }
  0x8f   : > { %650 = vrot.lane.b32.xlu1 %v4371_v17, %s4093_s7 }
  0x90   : > { %v4423_v51 = vpop.permute.xlu0 %518 }
  0x91   : > { %v4426_v56 = vpop.permute.xlu1 %1391 }
  0x92   : > { %1490 = vrot.lane.b32.xlu0 %v4421_v50, %s4092_s4 }
  0x93   : > { %1508 = vrot.lane.b32.xlu1 %v4383_v24, %s4093_s7 }
  0x94   : > { %v4434_v59 = vpop.permute.xlu0 %1376 }
  0x95   : > { %v4440_v0 = vpop.permute.xlu1 %516 }
  0x96   : > { %467 = vrot.lane.b32.xlu0 %v4358_v4, %s4088_s23  ;;  %v283_v4 = vrot.slane %v238_v7, 7 }
  0x97   : > { %652 = vrot.lane.b32.xlu1 %v4437_v53, %s4093_s7 }
  0x98   : > { %v4448_v3 = vpop.permute.xlu0 %459  ;;  %v286_v16 = vor.u32 %v284_v12, %v283_v4  ;;  %v4489_v28 = vsel %vm4141_vm3, %v283_v4, %v325_v21  ;;  %v1075_v4 = vpack.c.bf16 %v3840_v58, %v3839_v49 }
  0x99   : > { %v4453_v9 = vpop.permute.xlu1 %1374  ;;  %v443_v6 = vshll.u32 %v4489_v28, 16 }
  0x9a   : > { %1326 = vrot.lane.b32.xlu0 %v4364_v11, %s4088_s23  ;;  %v1146_v11 = vrot.slane %v1101_v13, 7 }
  0x9b   : > { %1510 = vrot.lane.b32.xlu1 %v4451_v5, %s4093_s7  ;;  %v445_v1 = vrot.slane %v443_v6, 1 }
  0x9c   : > { %v4459_v10 = vpop.permute.xlu0 %1318  ;;  %v1149_v25 = vor.u32 %v1147_v18, %v1146_v11  ;;  %v4510_v54 = vsel %vm4141_vm3, %v1146_v11, %v1188_v30  ;;  %v287_v11 = vrot.slane %v241_v62, 7  ;;  %v288_v18 = vshll.u32 %v212_v37, 16 }
  0x9d   : > { %v4461_v14 = vpop.permute.xlu1 %461  ;;  %v1302_v60 = vshll.u32 %v4510_v54, 16  ;;  %v511_v30 = vrot.slane %v4489_v28, 1  ;;  %v1521_v49 = vsel %vm662_vm6, %v4174_v46, %v4459_v10 }
  0x9e   : > { %469 = vrot.lane.b32.xlu0 %v4410_v43, %s4088_s23  ;;  %v4498_v34 = vsel %vm4141_vm3, %v1101_v13, %v1149_v25  ;;  %v1104_v25 = vshrl.u32 %v1075_v4, 16  ;;  %v290_v6 = vor.u32 %v288_v18, %v287_v11 }
  0x9f   : > { %524 = vrot.lane.b32.xlu1 %v4371_v17, %s4087_s22  ;;  %v4479_v17 = vsel %vm4141_vm3, %v238_v7, %v286_v16  ;;  %v1297_v44 = vshll.u32 %v4498_v34, 16  ;;  %v1295_v2 = vshrl.u32 %v4498_v34, 16  ;;  %v1304_v13 = vrot.slane %v1302_v60, 1 }
  0xa0   : > { %v4467_v15 = vpop.permute.xlu0 %1320  ;;  %v436_v38 = vshrl.u32 %v4479_v17, 16  ;;  %v510_v32 = vrot.slane %v4479_v17, 1  ;;  %v1368_v60 = vrot.slane %v4498_v34, 1 }
  0xa1   : > { %v4469_v20 = vpop.permute.xlu1 %561  ;;  %v1299_v7 = vrot.slane %v1297_v44, 1 }
  0xa2   : > { %1328 = vrot.lane.b32.xlu0 %v4421_v50, %s4088_s23  ;;  %v4561_v58 = vsel %vm491_vm2, %v510_v32, %v511_v30 }
  0xa3   : > { %1382 = vrot.lane.b32.xlu1 %v4383_v24, %s4087_s22  ;;  %v438_v24 = vshll.u32 %v4479_v17, 16 }
  0xa4   : > { %v4475_v23 = vpop.permute.xlu0 %1393 }
  0xa5   : > { %v4481_v26 = vpop.permute.xlu1 %1419  ;;  %v440_v42 = vrot.slane %v438_v24, 1 }
  0xa6   : > { %526 = vrot.lane.b32.xlu0 %v4437_v53, %s4087_s22 }
  0xa7   : > { %541 = vrot.lane.b32.xlu1 %v4376_v22, %s4086_s21  ;;  %v441_v63 = vor.u32 %v440_v42, %v436_v38  ;;  %v1150_v38 = vrot.slane %v1104_v25, 7  ;;  %v1151_v42 = vshll.u32 %v1075_v4, 16 }
  0xa8   : > { %v4494_v33 = vpop.permute.xlu0 %563 }
  0xa9   : > { %v4500_v36 = vpop.permute.xlu1 %581  ;;  %v4532_v16 = vsel %vm362_vm4, %v441_v63, %v445_v1 }
  0xaa   : > { %1384 = vrot.lane.b32.xlu0 %v4451_v5, %s4087_s22 }
  0xab   : > { %1399 = vrot.lane.b32.xlu1 %v4390_v29, %s4086_s21 }
  0xac   : > { %v4513_v52 = vpop.permute.xlu0 %1421 }
  0xad   : > { %v4515_v55 = vpop.permute.xlu1 %1439 }
  0xae   : > { %543 = vrot.lane.b32.xlu0 %v4479_v17, %s4086_s21 }
  0xaf   : > { %569 = vrot.lane.b32.xlu1 %v4410_v43, %s4089_s24  ;;  %v1300_v43 = vor.u32 %v1299_v7, %v1295_v2 }
  0xb0   : > { %v4525_v8 = vpop.permute.xlu0 %583 }
  0xb1   : > { %v599_v12 = vpop.permute.xlu1 %598  ;;  %v4545_v31 = vsel %vm362_vm4, %v1300_v43, %v1304_v13  ;;  %v1189_v43 = vrot.slane %v1151_v42, 7 }
  0xb2   : > { %1401 = vrot.lane.b32.xlu0 %v4498_v34, %s4086_s21 }
  0xb3   : > { %1427 = vrot.lane.b32.xlu1 %v4421_v50, %s4089_s24  ;;  %v664_v50 = vsel %vm662_vm6, %v4153_v35, %v4448_v3  ;;  %v326_v3 = vrot.slane %v288_v18, 7 }
  0xb4   : > { %v4534_v21 = vpop.permute.xlu0 %1441  ;;  %v681_v28 = vsel %vm679_vm7, %v664_v50, %v4440_v0  ;;  %v4566_v0 = vsel %vm4141_vm3, %v241_v62, %v290_v6 }
  0xb5   : > { %v1457_v24 = vpop.permute.xlu1 %1456  ;;  %v698_v1 = vsel %vm696_vm8, %v681_v28, %v4414_v48  ;;  %v4580_v62 = vsel %vm4141_vm3, %v287_v11, %v326_v3  ;;  %v450_v2 = vshll.u32 %v4566_v0, 16  ;;  %v666_v48 = vsel %vm662_vm6, %v4159_v39, %v4461_v14 }
  0xb6   : > { %571 = vrot.lane.b32.xlu0 %v4532_v16, %s4089_s24  ;;  %v715_v10 = vsel %vm713_vm9, %v698_v1, %v4469_v20  ;;  %v448_v11 = vshrl.u32 %v4566_v0, 16  ;;  %v455_v18 = vshll.u32 %v4580_v62, 16 }
  0xb7   : > { %589 = vrot.lane.b32.xlu1 %v4437_v53, %s4090_s25  ;;  %v1369_v53 = vrot.slane %v4510_v54, 1  ;;  %v1153_v54 = vor.u32 %v1151_v42, %v1150_v38  ;;  %v732_v7 = vsel %vm730_vm10, %v715_v10, %v4500_v36  ;;  %v452_v50 = vrot.slane %v450_v2, 1 }
  0xb8   : > { %v4548_v37 = vpop.permute.xlu0 %600  ;;  %v749_v20 = vsel %vm747_vm11, %v732_v7, %v599_v12  ;;  %v683_v12 = vsel %vm679_vm7, %v666_v48, %v4423_v51  ;;  %v1523_v42 = vsel %vm662_vm6, %v4163_v40, %v4467_v15 }
  0xb9   : > { %v627_v44 = vpop.permute.xlu1 %626  ;;  %v4596_v13 = vsel %vm4141_vm3, %v1104_v25, %v1153_v54  ;;  %v453_v3 = vor.u32 %v452_v50, %v448_v11 }
  0xba   : > { %1429 = vrot.lane.b32.xlu0 %v4545_v31, %s4089_s24  ;;  %v766_v14 = vsel %vm764_vm12, %v749_v20, %v627_v44  ;;  %v1309_v32 = vshll.u32 %v4596_v13, 16  ;;  %v1307_v40 = vshrl.u32 %v4596_v13, 16 }
  0xbb   : > { %1447 = vrot.lane.b32.xlu1 %v4451_v5, %s4090_s25  ;;  %v1537_v5 = vsel %vm679_vm7, %v1521_v49, %v4453_v9  ;;  %v4591_v9 = vsel %vm491_vm2, %v1368_v60, %v1369_v53 }
  0xbc   : > { %v4568_v63 = vpop.permute.xlu0 %1458  ;;  %v1553_v39 = vsel %vm696_vm8, %v1537_v5, %v4426_v56 }
  0xbd   : > { %v1485_v46 = vpop.permute.xlu1 %1484  ;;  %v1569_v30 = vsel %vm713_vm9, %v1553_v39, %v4481_v26  ;;  %v1219_v26 = vsel %vm4141_vm3, %v1150_v38, %v1189_v43  ;;  %v457_v38 = vrot.slane %v455_v18, 1  ;;  %v513_v43 = vrot.slane %v4566_v0, 1 }
  0xbe   : > { %591 = vrot.lane.b32.xlu0 %v4561_v58, %s4090_s25  ;;  %v1585_v56 = vsel %vm730_vm10, %v1569_v30, %v4515_v55  ;;  %v700_v55 = vsel %vm696_vm8, %v683_v12, %v4412_v47  ;;  %v1311_v47 = vrot.slane %v1309_v32, 1  ;;  %v1314_v15 = vshll.u32 %v1219_v26, 16  ;;  %v3842_v32 = vld [vmem:[%s4125_s17 + $0xf8] sm:$0xff] }
  0xbf   : > { %606 = vrot.lane.b32.xlu1 %v4479_v17, %s4091_s28  ;;  %v1601_v51 = vsel %vm747_vm11, %v1585_v56, %v1457_v24  ;;  %v717_v53 = vsel %vm713_vm9, %v700_v55, %v4494_v33  ;;  %v1539_v33 = vsel %vm679_vm7, %v1523_v42, %v4434_v59  ;;  %v514_v39 = vrot.slane %v4580_v62, 1  ;;  %v3841_v56 = vld [vmem:[%s4125_s17 + $0xf0] sm:$0xff] }
  0xc0   : > { %v629_v4 = vpop.permute.xlu0 %628  ;;  %v1617_v44 = vsel %vm764_vm12, %v1601_v51, %v1485_v46  ;;  %v734_v49 = vsel %vm730_vm10, %v717_v53, %v4525_v8  ;;  %v1555_v8 = vsel %vm696_vm8, %v1539_v33, %v4475_v23  ;;  %v4656_v23 = vsel %vm362_vm4, %v453_v3, %v457_v38 }
  0xc1   : > { %v647_v36 = vpop.permute.xlu1 %646  ;;  %v751_v60 = vsel %vm747_vm11, %v734_v49, %v4548_v37  ;;  %v1571_v5 = vsel %vm713_vm9, %v1555_v8, %v4513_v52  ;;  %v1312_v37 = vor.u32 %v1311_v47, %v1307_v40  ;;  %v1316_v52 = vrot.slane %v1314_v15, 1 }
  0xc2   : > { %1449 = vrot.lane.b32.xlu0 %v4591_v9, %s4090_s25  ;;  %v783_v25 = vsel %vm781_vm13, %v766_v14, %v647_v36  ;;  %v768_v1 = vsel %vm764_vm12, %v751_v60, %v629_v4  ;;  %v1587_v59 = vsel %vm730_vm10, %v1571_v5, %v4534_v21  ;;  %v204_v14 = vld [vmem:[%s4125_s17 + $0x70] sm:$0xff]  ;;  %v205_v36 = vld [vmem:[%s4125_s17 + $0x78] sm:$0xff]  ;;  %v4687_v30 = vsel %vm491_vm2, %v513_v43, %v514_v39 }
  0xc3   : > { %1464 = vrot.lane.b32.xlu1 %v4498_v34, %s4091_s28  ;;  %3934 = vmatprep.mubr.msk.bf16.mxu0 %vm813_vm14, %v783_v25  ;;  %v1603_v2 = vsel %vm747_vm11, %v1587_v59, %v4568_v63  ;;  %v4670_v4 = vsel %vm362_vm4, %v1312_v37, %v1316_v52  ;;  %v213_v18 = vpack.c.bf16 %v205_v36, %v204_v14  ;;  %v1371_v25 = vrot.slane %v4596_v13, 1  ;;  %v3812_v59 = vld [vmem:[%s4125_s17 + $0x80] sm:$0xff]  ;;  %v3813_v37 = vld [vmem:[%s4125_s17 + $0x88] sm:$0xff] }
  0xc4   : > { %v1487_v6 = vpop.permute.xlu0 %1486  ;;  %v1372_v50 = vrot.slane %v1219_v26, 1  ;;  %v1076_v55 = vpack.c.bf16 %v3842_v32, %v3841_v56  ;;  %v218_v39 = vpack.c.bf16 %v3813_v37, %v3812_v59 }
  0xc5   : > { %v1505_v28 = vpop.permute.xlu1 %1504  ;;  %v1619_v7 = vsel %vm764_vm12, %v1603_v2, %v1487_v6  ;;  %v244_v51 = vshrl.u32 %v213_v18, 16 }
  0xc6   : > { %608 = vrot.lane.b32.xlu0 %v4566_v0, %s4091_s28  ;;  %v1633_v24 = vsel %vm781_vm13, %v1617_v44, %v1505_v28  ;;  %v4701_v42 = vsel %vm491_vm2, %v1371_v25, %v1372_v50  ;;  %v1107_v53 = vshrl.u32 %v1076_v55, 16  ;;  %v1155_v49 = vshll.u32 %v1076_v55, 16 }
  0xc7   : > { %634 = vrot.lane.b32.xlu1 %v4532_v16, %s4092_s4  ;;  %3956 = vmatprep.mubr.msk.bf16.mxu1 %vm813_vm14, %v1633_v24  ;;  %v291_v26 = vrot.slane %v244_v51, 7 }
  0xc8   : > { %v4640_v54 = vpop.permute.xlu0 %463  ;;  %v1190_v5 = vrot.slane %v1155_v49, 7 }
  0xc9   : > { %v649_v46 = vpop.permute.xlu1 %648 }
  0xca   : > { %v785_v10 = vsel %vm781_vm13, %v768_v1, %v649_v46  ;;  %1466 = vrot.lane.b32.xlu0 %v4596_v13, %s4091_s28 }
  0xcb   : > { %1492 = vrot.lane.b32.xlu1 %v4545_v31, %s4092_s4  ;;  %3935 = vmatmul.mubr.msk.bf16.vlgmr.msra.gmra.mrb[0].mxu0 %vm813_vm14, %v785_v10 }
  0xcc   : > { %v4660_v48 = vpop.permute.xlu0 %1322 }
  0xcd   : > { %v1507_v21 = vpop.permute.xlu1 %1506 }
  0xce   : > { %v1635_v20 = vsel %vm781_vm13, %v1619_v7, %v1507_v21  ;;  %636 = vrot.lane.b32.xlu0 %v4656_v23, %s4092_s4 }
  0xcf   : > { %654 = vrot.lane.b32.xlu1 %v4561_v58, %s4093_s7  ;;  %3957 = vmatmul.mubr.msk.bf16.vlgmr.msra.gmra.mrb[0].mxu1 %vm813_vm14, %v1635_v20 }
  0xd0   : > { %v4672_v63 = vpop.permute.xlu0 %465 }
  0xd1   : > { %v4678_v11 = vpop.permute.xlu1 %520 }
  0xd2   : > { %1494 = vrot.lane.b32.xlu0 %v4670_v4, %s4092_s4 }
  0xd3   : > { %1512 = vrot.lane.b32.xlu1 %v4591_v9, %s4093_s7 }
  0xd4   : > { %v4684_v12 = vpop.permute.xlu0 %1324 }
  0xd5   : > { %v4690_v62 = vpop.permute.xlu1 %1378 }
  0xd6   : > { %471 = vrot.lane.b32.xlu0 %v4532_v16, %s4088_s23  ;;  %v292_v16 = vshll.u32 %v213_v18, 16 }
  0xd7   : > { %656 = vrot.lane.b32.xlu1 %v4687_v30, %s4093_s7 }
  0xd8   : > { %v4698_v6 = vpop.permute.xlu0 %522  ;;  %v294_v3 = vor.u32 %v292_v16, %v291_v26  ;;  %v327_v33 = vrot.slane %v292_v16, 7 }
  0xd9   : > { %v4703_v44 = vpop.permute.xlu1 %537 }
  0xda   : > { %1330 = vrot.lane.b32.xlu0 %v4545_v31, %s4088_s23  ;;  %v1154_v31 = vrot.slane %v1107_v53, 7  ;;  %v4727_v47 = vsel %vm4141_vm3, %v244_v51, %v294_v3  ;;  %v360_v46 = vsel %vm4141_vm3, %v291_v26, %v327_v33  ;;  %v247_v51 = vshrl.u32 %v218_v39, 16 }
  0xdb   : > { %1514 = vrot.lane.b32.xlu1 %v4701_v42, %s4093_s7  ;;  %v552_v8 = vshll.u32 %v4727_v47, 16  ;;  %v550_v52 = vshrl.u32 %v4727_v47, 16  ;;  %v557_v7 = vshll.u32 %v360_v46, 16  ;;  %v578_v33 = vrot.slane %v4727_v47, 1 }
  0xdc   : > { %v4709_v28 = vpop.permute.xlu0 %1380  ;;  %v1157_v15 = vor.u32 %v1155_v49, %v1154_v31  ;;  %v1220_v43 = vsel %vm4141_vm3, %v1154_v31, %v1190_v5  ;;  %v295_v3 = vrot.slane %v247_v51, 7  ;;  %v296_v31 = vshll.u32 %v218_v39, 16 }
  0xdd   : > { %v4711_v24 = vpop.permute.xlu1 %1395  ;;  %v554_v2 = vrot.slane %v552_v8, 1  ;;  %v559_v18 = vrot.slane %v557_v7, 1  ;;  %v1415_v56 = vshll.u32 %v1220_v43, 16  ;;  %v579_v8 = vrot.slane %v360_v46, 1 }
  0xde   : > { %473 = vrot.lane.b32.xlu0 %v4656_v23, %s4088_s23  ;;  %v298_v59 = vor.u32 %v296_v31, %v295_v3  ;;  %v1437_v7 = vrot.slane %v1220_v43, 1  ;;  %v328_v39 = vrot.slane %v296_v31, 7 }
  0xdf   : > { %528 = vrot.lane.b32.xlu1 %v4561_v58, %s4087_s22  ;;  %v555_v36 = vor.u32 %v554_v2, %v550_v52  ;;  %v668_v52 = vsel %vm662_vm6, %v4153_v35, %v4640_v54 }
  0xe0   : > { %v4717_v38 = vpop.permute.xlu0 %539  ;;  %v685_v46 = vsel %vm679_vm7, %v668_v52, %v4678_v11  ;;  %v1525_v11 = vsel %vm662_vm6, %v4218_v27, %v4660_v48 }
  0xe1   : > { %v4719_v40 = vpop.permute.xlu1 %565  ;;  %v4770_v26 = vsel %vm362_vm4, %v555_v36, %v559_v18  ;;  %v4797_v36 = vsel %vm4141_vm3, %v247_v51, %v298_v59  ;;  %v702_v35 = vsel %vm696_vm8, %v685_v46, %v4703_v44  ;;  %v361_v51 = vsel %vm4141_vm3, %v295_v3, %v328_v39 }
  0xe2   : > { %1332 = vrot.lane.b32.xlu0 %v4670_v4, %s4088_s23  ;;  %v719_v18 = vsel %vm713_vm9, %v702_v35, %v4719_v40  ;;  %v617_v44 = vshll.u32 %v4797_v36, 16  ;;  %v622_v3 = vshll.u32 %v361_v51, 16  ;;  %v643_v35 = vrot.slane %v4797_v36, 1 }
  0xe3   : > { %1386 = vrot.lane.b32.xlu1 %v4591_v9, %s4087_s22  ;;  %v4742_v9 = vsel %vm4141_vm3, %v1107_v53, %v1157_v15 }
  0xe4   : > { %v4729_v58 = vpop.permute.xlu0 %1397  ;;  %v1410_v21 = vshll.u32 %v4742_v9, 16  ;;  %v1408_v25 = vshrl.u32 %v4742_v9, 16  ;;  %v1436_v2 = vrot.slane %v4742_v9, 1  ;;  %v624_v59 = vrot.slane %v622_v3, 1 }
  0xe5   : > { %v4731_v60 = vpop.permute.xlu1 %1423 }
  0xe6   : > { %530 = vrot.lane.b32.xlu0 %v4687_v30, %s4087_s22  ;;  %v1412_v50 = vrot.slane %v1410_v21, 1 }
  0xe7   : > { %545 = vrot.lane.b32.xlu1 %v4566_v0, %s4086_s21 }
  0xe8   : > { %v4738_v1 = vpop.permute.xlu0 %567  ;;  %v1413_v16 = vor.u32 %v1412_v50, %v1408_v25  ;;  %v1438_v25 = vsel %vm491_vm2, %v1436_v2, %v1437_v7  ;;  %v1541_v50 = vsel %vm679_vm7, %v1525_v11, %v4690_v62  ;;  %v615_v62 = vshrl.u32 %v4797_v36, 16 }
  0xe9   : > { %v586_v10 = vpop.permute.xlu1 %585  ;;  %v1557_v27 = vsel %vm696_vm8, %v1541_v50, %v4711_v24  ;;  %v619_v24 = vrot.slane %v617_v44, 1 }
  0xea   : > { %1388 = vrot.lane.b32.xlu0 %v4701_v42, %s4087_s22  ;;  %v736_v43 = vsel %vm730_vm10, %v719_v18, %v586_v10 }
  0xeb   : > { %1403 = vrot.lane.b32.xlu1 %v4596_v13, %s4086_s21 }
  0xec   : > { %v4754_v20 = vpop.permute.xlu0 %1425 }
  0xed   : > { %v1444_v14 = vpop.permute.xlu1 %1443 }
  0xee   : > { %547 = vrot.lane.b32.xlu0 %v4727_v47, %s4086_s21 }
  0xef   : > { %573 = vrot.lane.b32.xlu1 %v4656_v23, %s4089_s24  ;;  %v1417_v23 = vrot.slane %v1415_v56, 1 }
  0xf0   : > { %v4763_v32 = vpop.permute.xlu0 %587 }
  0xf1   : > { %v603_v55 = vpop.permute.xlu1 %602  ;;  %v4779_v15 = vsel %vm362_vm4, %v1413_v16, %v1417_v23 }
  0xf2   : > { %1405 = vrot.lane.b32.xlu0 %v4742_v9, %s4086_s21  ;;  %v753_v40 = vsel %vm747_vm11, %v736_v43, %v603_v55  ;;  %v670_v55 = vsel %vm662_vm6, %v4247_v57, %v4672_v63 }
  0xf3   : > { %1431 = vrot.lane.b32.xlu1 %v4670_v4, %s4089_s24 }
  0xf4   : > { %v4772_v53 = vpop.permute.xlu0 %1445 }
  0xf5   : > { %v1461_v49 = vpop.permute.xlu1 %1460 }
  0xf6   : > { %575 = vrot.lane.b32.xlu0 %v4770_v26, %s4089_s24 }
  0xf7   : > { %593 = vrot.lane.b32.xlu1 %v4687_v30, %s4090_s25  ;;  %v4790_v30 = vsel %vm491_vm2, %v578_v33, %v579_v8 }
  0xf8   : > { %v605_v5 = vpop.permute.xlu0 %604 }
  0xf9   : > { %v631_v37 = vpop.permute.xlu1 %630 }
  0xfa   : > { %1433 = vrot.lane.b32.xlu0 %v4779_v15, %s4089_s24  ;;  %v770_v48 = vsel %vm764_vm12, %v753_v40, %v631_v37 }
  0xfb   : > { %1451 = vrot.lane.b32.xlu1 %v4701_v42, %s4090_s25 }
  0xfc   : > { %v1463_v21 = vpop.permute.xlu0 %1462 }
  0xfd   : > { %v1489_v54 = vpop.permute.xlu1 %1488 }
  0xfe   : > { %595 = vrot.lane.b32.xlu0 %v4790_v30, %s4090_s25 }
  0xff   : > { %610 = vrot.lane.b32.xlu1 %v4727_v47, %s4091_s28  ;;  %v1573_v47 = vsel %vm713_vm9, %v1557_v27, %v4731_v60  ;;  %v687_v60 = vsel %vm679_vm7, %v670_v55, %v4698_v6  ;;  %v1527_v6 = vsel %vm662_vm6, %v4262_v61, %v4684_v12 }
 0x100   : > { %v633_v56 = vpop.permute.xlu0 %632  ;;  %v1589_v23 = vsel %vm730_vm10, %v1573_v47, %v1444_v14  ;;  %v704_v8 = vsel %vm696_vm8, %v687_v60, %v4717_v38  ;;  %v620_v38 = vor.u32 %v619_v24, %v615_v62 }
 0x101   : > { %v651_v10 = vpop.permute.xlu1 %650  ;;  %v1605_v31 = vsel %vm747_vm11, %v1589_v23, %v1461_v49  ;;  %v721_v14 = vsel %vm713_vm9, %v704_v8, %v4738_v1  ;;  %v1543_v1 = vsel %vm679_vm7, %v1527_v6, %v4709_v28 }
 0x102   : > { %v787_v16 = vsel %vm781_vm13, %v770_v48, %v651_v10  ;;  %1453 = vrot.lane.b32.xlu0 %v1438_v25, %s4090_s25  ;;  %v1621_v57 = vsel %vm764_vm12, %v1605_v31, %v1489_v54  ;;  %v738_v49 = vsel %vm730_vm10, %v721_v14, %v4763_v32  ;;  %v1559_v2 = vsel %vm696_vm8, %v1543_v1, %v4729_v58 }
 0x103   : > { %1468 = vrot.lane.b32.xlu1 %v4742_v9, %s4091_s28  ;;  %3938 = vmatprep.mubr.msk.bf16.mxu0 %vm813_vm14, %v787_v16  ;;  %v755_v37 = vsel %vm747_vm11, %v738_v49, %v605_v5  ;;  %v1575_v32 = vsel %vm713_vm9, %v1559_v2, %v4754_v20  ;;  %v625_v58 = vsel %vm362_vm4, %v620_v38, %v624_v59 }
 0x104   : > { %v1491_v33 = vpop.permute.xlu0 %1490  ;;  %v772_v61 = vsel %vm764_vm12, %v755_v37, %v633_v56  ;;  %v1591_v28 = vsel %vm730_vm10, %v1575_v32, %v4772_v53  ;;  %v644_v53 = vrot.slane %v361_v51, 1 }
 0x105   : > { %v1509_v63 = vpop.permute.xlu1 %1508  ;;  %v1607_v5 = vsel %vm747_vm11, %v1591_v28, %v1463_v21 }
 0x106   : > { %v1637_v9 = vsel %vm781_vm13, %v1621_v57, %v1509_v63  ;;  %612 = vrot.lane.b32.xlu0 %v4797_v36, %s4091_s28  ;;  %v1623_v20 = vsel %vm764_vm12, %v1607_v5, %v1491_v33  ;;  %v645_v21 = vsel %vm491_vm2, %v643_v35, %v644_v53 }
 0x107   : > { %638 = vrot.lane.b32.xlu1 %v4770_v26, %s4092_s4  ;;  %3960 = vmatprep.mubr.msk.bf16.mxu1 %vm813_vm14, %v1637_v9 }
 0x108   : > { %v468_v52 = vpop.permute.xlu0 %467 }
 0x109   : > { %v653_v12 = vpop.permute.xlu1 %652 }
 0x10a   : > { %v789_v26 = vsel %vm781_vm13, %v772_v61, %v653_v12  ;;  %1470 = vrot.lane.b32.xlu0 %v4596_v13, %s4091_s28 }
 0x10b   : > { %1496 = vrot.lane.b32.xlu1 %v4779_v15, %s4092_s4  ;;  %3939 = vmatmul.mubr.msk.bf16.gmra.mrb[4].mxu0 %vm813_vm14, %v789_v26 }
 0x10c   : > { %v1327_v7 = vpop.permute.xlu0 %1326 }
 0x10d   : > { %v1511_v46 = vpop.permute.xlu1 %1510  ;;  %v1529_v8 = vsel %vm662_vm6, %v4334_v45, %v1327_v7 }
 0x10e   : > { %v1639_v39 = vsel %vm781_vm13, %v1623_v20, %v1511_v46  ;;  %640 = vrot.lane.b32.xlu0 %v625_v58, %s4092_s4 }
 0x10f   : > { %658 = vrot.lane.b32.xlu1 %v4790_v30, %s4093_s7  ;;  %3961 = vmatmul.mubr.msk.bf16.gmra.mrb[4].mxu1 %vm813_vm14, %v1639_v39 }
 0x110   : > { %v470_v15 = vpop.permute.xlu0 %469 }
 0x111   : > { %v525_v54 = vpop.permute.xlu1 %524  ;;  %v674_v1 = vsel %vm662_vm6, %v4376_v22, %v470_v15 }
 0x112   : > { %1498 = vrot.lane.b32.xlu0 %v4670_v4, %s4092_s4 }
 0x113   : > { %1516 = vrot.lane.b32.xlu1 %v1438_v25, %s4093_s7 }
 0x114   : > { %v1329_v18 = vpop.permute.xlu0 %1328 }
 0x115   : > { %v1383_v11 = vpop.permute.xlu1 %1382  ;;  %v1531_v22 = vsel %vm662_vm6, %v4390_v29, %v1329_v18 }
 0x116   : > { %660 = vrot.lane.b32.xlu0 %v645_v21, %s4093_s7  ;;  %v1545_v63 = vsel %vm679_vm7, %v1529_v8, %v1383_v11 }
 0x117   : > { %1518 = vrot.lane.b32.xlu1 %v4701_v42, %s4093_s7  ;;  %v672_v42 = vsel %vm662_vm6, %v4326_v41, %v468_v52 }
 0x118   : > { %v527_v30 = vpop.permute.xlu0 %526  ;;  %v689_v24 = vsel %vm679_vm7, %v672_v42, %v525_v54 }
 0x119   : > { %v542_v36 = vpop.permute.xlu1 %541  ;;  %v691_v37 = vsel %vm679_vm7, %v674_v1, %v527_v30 }
 0x11a   : > { %v706_v60 = vsel %vm696_vm8, %v689_v24, %v542_v36 }
 0x11c   : > { %v1385_v43 = vpop.permute.xlu0 %1384 }
 0x11d   : > { %v1400_v44 = vpop.permute.xlu1 %1399  ;;  %v1547_v5 = vsel %vm679_vm7, %v1531_v22, %v1385_v43 }
 0x11e   : > { %v1561_v41 = vsel %vm696_vm8, %v1545_v63, %v1400_v44 }
 0x120   : > { %v544_v50 = vpop.permute.xlu0 %543 }
 0x121   : > { %v570_v40 = vpop.permute.xlu1 %569  ;;  %v708_v61 = vsel %vm696_vm8, %v691_v37, %v544_v50 }
 0x122   : > { %v723_v33 = vsel %vm713_vm9, %v706_v60, %v570_v40 }
 0x124   : > { %v1402_v56 = vpop.permute.xlu0 %1401 }
 0x125   : > { %v1428_v51 = vpop.permute.xlu1 %1427  ;;  %v1563_v46 = vsel %vm696_vm8, %v1547_v5, %v1402_v56 }
 0x126   : > { %v1577_v38 = vsel %vm713_vm9, %v1561_v41, %v1428_v51 }
 0x128   : > { %v572_v4 = vpop.permute.xlu0 %571 }
 0x129   : > { %v590_v27 = vpop.permute.xlu1 %589  ;;  %v725_v26 = vsel %vm713_vm9, %v708_v61, %v572_v4 }
 0x12a   : > { %v740_v57 = vsel %vm730_vm10, %v723_v33, %v590_v27 }
 0x12c   : > { %v1430_v25 = vpop.permute.xlu0 %1429 }
 0x12d   : > { %v1448_v48 = vpop.permute.xlu1 %1447  ;;  %v1579_v53 = vsel %vm713_vm9, %v1563_v46, %v1430_v25 }
 0x12e   : > { %v1593_v45 = vsel %vm730_vm10, %v1577_v38, %v1448_v48 }
 0x130   : > { %v592_v10 = vpop.permute.xlu0 %591 }
 0x131   : > { %v607_v47 = vpop.permute.xlu1 %606  ;;  %v742_v58 = vsel %vm730_vm10, %v725_v26, %v592_v10 }
 0x132   : > { %v757_v14 = vsel %vm747_vm11, %v740_v57, %v607_v47 }
 0x134   : > { %v1450_v16 = vpop.permute.xlu0 %1449 }
 0x135   : > { %v1465_v62 = vpop.permute.xlu1 %1464  ;;  %v1595_v29 = vsel %vm730_vm10, %v1579_v53, %v1450_v16 }
 0x136   : > { %v1609_v52 = vsel %vm747_vm11, %v1593_v45, %v1465_v62 }
 0x138   : > { %v609_v55 = vpop.permute.xlu0 %608 }
 0x139   : > { %v635_v23 = vpop.permute.xlu1 %634  ;;  %v759_v7 = vsel %vm747_vm11, %v742_v58, %v609_v55 }
 0x13a   : > { %v774_v6 = vsel %vm764_vm12, %v757_v14, %v635_v23 }
 0x13c   : > { %v1467_v3 = vpop.permute.xlu0 %1466 }
 0x13d   : > { %v1493_v31 = vpop.permute.xlu1 %1492  ;;  %v1611_v54 = vsel %vm747_vm11, %v1595_v29, %v1467_v3 }
 0x13e   : > { %v1625_v12 = vsel %vm764_vm12, %v1609_v52, %v1493_v31 }
 0x140   : > { %v637_v9 = vpop.permute.xlu0 %636 }
 0x141   : > { %v655_v49 = vpop.permute.xlu1 %654  ;;  %v776_v39 = vsel %vm764_vm12, %v759_v7, %v637_v9 }
 0x142   : > { %v791_v59 = vsel %vm781_vm13, %v774_v6, %v655_v49 }
 0x143   : > { %3942 = vmatprep.mubr.msk.bf16.mxu0 %vm813_vm14, %v791_v59 }
 0x144   : > { %v1495_v2 = vpop.permute.xlu0 %1494 }
 0x145   : > { %v1513_v32 = vpop.permute.xlu1 %1512  ;;  %v1627_v18 = vsel %vm764_vm12, %v1611_v54, %v1495_v2 }
 0x146   : > { %v1641_v28 = vsel %vm781_vm13, %v1625_v12, %v1513_v32 }
 0x147   : > { %3964 = vmatprep.mubr.msk.bf16.mxu1 %vm813_vm14, %v1641_v28 }
 0x148   : > { %v472_v20 = vpop.permute.xlu0 %471 }
 0x149   : > { %v657_v35 = vpop.permute.xlu1 %656  ;;  %v676_v33 = vsel %vm662_vm6, %v4479_v17, %v472_v20 }
 0x14a   : > { %v793_v15 = vsel %vm781_vm13, %v776_v39, %v657_v35 }
 0x14b   : > { %3943 = vmatmul.mubr.msk.bf16.gmra.mrb[8].mxu0 %vm813_vm14, %v793_v15 }
 0x14c   : > { %v1331_v21 = vpop.permute.xlu0 %1330 }
 0x14d   : > { %v1515_v11 = vpop.permute.xlu1 %1514  ;;  %v1533_v41 = vsel %vm662_vm6, %v4498_v34, %v1331_v21 }
 0x14e   : > { %v1643_v30 = vsel %vm781_vm13, %v1627_v18, %v1515_v11 }
 0x14f   : > { %3965 = vmatmul.mubr.msk.bf16.gmra.mrb[8].mxu1 %vm813_vm14, %v1643_v30 }
 0x150   : > { %v474_v36 = vpop.permute.xlu0 %473 }
 0x151   : > { %v529_v43 = vpop.permute.xlu1 %528  ;;  %v678_v37 = vsel %vm662_vm6, %v4566_v0, %v474_v36 }
 0x152   : > { %v693_v8 = vsel %vm679_vm7, %v676_v33, %v529_v43 }
 0x154   : > { %v1333_v44 = vpop.permute.xlu0 %1332 }
 0x155   : > { %v1387_v50 = vpop.permute.xlu1 %1386  ;;  %v1535_v34 = vsel %vm662_vm6, %v4596_v13, %v1333_v44 }
 0x156   : > { %v1549_v49 = vsel %vm679_vm7, %v1533_v41, %v1387_v50 }
 0x158   : > { %v531_v40 = vpop.permute.xlu0 %530 }
 0x159   : > { %v546_v56 = vpop.permute.xlu1 %545  ;;  %v695_v61 = vsel %vm679_vm7, %v678_v37, %v531_v40 }
 0x15a   : > { %v710_v63 = vsel %vm696_vm8, %v693_v8, %v546_v56 }
 0x15c   : > { %v1389_v51 = vpop.permute.xlu0 %1388 }
 0x15d   : > { %v1404_v4 = vpop.permute.xlu1 %1403  ;;  %v1551_v32 = vsel %vm679_vm7, %v1535_v34, %v1389_v51 }
 0x15e   : > { %v1565_v17 = vsel %vm696_vm8, %v1549_v49, %v1404_v4 }
 0x160   : > { %v548_v27 = vpop.permute.xlu0 %547 }
 0x161   : > { %v574_v25 = vpop.permute.xlu1 %573  ;;  %v712_v26 = vsel %vm696_vm8, %v695_v61, %v548_v27 }
 0x162   : > { %v727_v9 = vsel %vm713_vm9, %v710_v63, %v574_v25 }
 0x164   : > { %v1406_v48 = vpop.permute.xlu0 %1405 }
 0x165   : > { %v1432_v10 = vpop.permute.xlu1 %1431  ;;  %v1567_v22 = vsel %vm696_vm8, %v1551_v32, %v1406_v48 }
 0x166   : > { %v1581_v52 = vsel %vm713_vm9, %v1565_v17, %v1432_v10 }
 0x168   : > { %v576_v47 = vpop.permute.xlu0 %575 }
 0x169   : > { %v594_v16 = vpop.permute.xlu1 %593  ;;  %v729_v58 = vsel %vm713_vm9, %v712_v26, %v576_v47 }
 0x16a   : > { %v744_v6 = vsel %vm730_vm10, %v727_v9, %v594_v16 }
 0x16c   : > { %v1434_v62 = vpop.permute.xlu0 %1433 }
 0x16d   : > { %v1452_v55 = vpop.permute.xlu1 %1451  ;;  %v1583_v7 = vsel %vm713_vm9, %v1567_v22, %v1434_v62 }
 0x16e   : > { %v1597_v12 = vsel %vm730_vm10, %v1581_v52, %v1452_v55 }
 0x170   : > { %v596_v23 = vpop.permute.xlu0 %595 }
 0x171   : > { %v611_v42 = vpop.permute.xlu1 %610  ;;  %v746_v20 = vsel %vm730_vm10, %v729_v58, %v596_v23 }
 0x172   : > { %v761_v38 = vsel %vm747_vm11, %v744_v6, %v611_v42 }
 0x174   : > { %v1454_v24 = vpop.permute.xlu0 %1453 }
 0x175   : > { %v1469_v3 = vpop.permute.xlu1 %1468  ;;  %v1599_v39 = vsel %vm730_vm10, %v1583_v7, %v1454_v24 }
 0x176   : > { %v1613_v28 = vsel %vm747_vm11, %v1597_v12, %v1469_v3 }
 0x178   : > { %v613_v60 = vpop.permute.xlu0 %612 }
 0x179   : > { %v639_v31 = vpop.permute.xlu1 %638  ;;  %v763_v35 = vsel %vm747_vm11, %v746_v20, %v613_v60 }
 0x17a   : > { %v778_v1 = vsel %vm764_vm12, %v761_v38, %v639_v31 }
 0x17c   : > { %v1471_v57 = vpop.permute.xlu0 %1470 }
 0x17d   : > { %v1497_v14 = vpop.permute.xlu1 %1496  ;;  %v1615_v53 = vsel %vm747_vm11, %v1599_v39, %v1471_v57 }
 0x17e   : > { %v1629_v5 = vsel %vm764_vm12, %v1613_v28, %v1497_v14 }
 0x180   : > { %v641_v59 = vpop.permute.xlu0 %640 }
 0x181   : > { %v659_v45 = vpop.permute.xlu1 %658  ;;  %v780_v15 = vsel %vm764_vm12, %v763_v35, %v641_v59 }
 0x182   : > { %v795_v2 = vsel %vm781_vm13, %v778_v1, %v659_v45 }
 0x183   : > { %3946 = vmatprep.mubr.msk.bf16.mxu0 %vm813_vm14, %v795_v2 }
 0x184   : > { %v1499_v0 = vpop.permute.xlu0 %1498 }
 0x185   : > { %v1517_v13 = vpop.permute.xlu1 %1516  ;;  %v1631_v54 = vsel %vm764_vm12, %v1615_v53, %v1499_v0 }
 0x186   : > { %v1645_v46 = vsel %vm781_vm13, %v1629_v5, %v1517_v13 }
 0x187   : > { %3968 = vmatprep.mubr.msk.bf16.mxu1 %vm813_vm14, %v1645_v46 }
 0x188   : > { %v661_v29 = vpop.permute.xlu0 %660 }
 0x189   : > { %v1519_v21 = vpop.permute.xlu1 %1518  ;;  %v797_v18 = vsel %vm781_vm13, %v780_v15, %v661_v29 }
 0x18a   : > { %v1647_v11 = vsel %vm781_vm13, %v1631_v54, %v1519_v21  ;;  %3947 = vmatmul.mubr.msk.bf16.gmra.mrb[12].mxu0 %vm813_vm14, %v797_v18 }
 0x18b   : > { %3969 = vmatmul.mubr.msk.bf16.gmra.mrb[12].mxu1 %vm813_vm14, %v1647_v11 }
 0x19e   : > { %v3936_v30 = vpop.f32.mrb[0].mxu0 }
 0x19f   : > { %934 = vst.msk [vmem:[#allocation2 + $0x10] sm:$0xff] %vm662_vm6, %v3936_v30  ;;  %v868_v36 = vpop.f32.mrb[1].mxu0  ;;  %v988_v50 = vmul.f32 %v3936_v30, %v3936_v30  ;;  %v951_v47 = vsel %vm662_vm6, %v3936_v30, 0.0 }
 0x1a0   : > { %932 = vst.msk [vmem:[#allocation2] sm:$0xff] %vm662_vm6, %v868_v36  ;;  %v986_v43 = vmul.f32 %v868_v36, %v868_v36  ;;  %v3937_v44 = vpop.f32.mrb[2].mxu0  ;;  %v948_v56 = vsel %vm662_vm6, %v868_v36, 0.0 }
 0x1a1   : > { %935 = vst.msk [vmem:[#allocation2 + $0x18] sm:$0xff] %vm662_vm6, %v3937_v44  ;;  %v871_v40 = vpop.f32.mrb[3].mxu0  ;;  %v989_v25 = vmul.f32 %v3937_v44, %v3937_v44  ;;  %v1005_v42 = vsel %vm662_vm6, %v988_v50, 0.0  ;;  %v953_v24 = vsel %vm662_vm6, %v3937_v44, 0.0 }
 0x1a2   : > { %933 = vst.msk [vmem:[#allocation2 + $0x8] sm:$0xff] %vm662_vm6, %v871_v40  ;;  %v949_v51 = vsel %vm662_vm6, %v871_v40, 0.0  ;;  %v987_v4 = vmul.f32 %v871_v40, %v871_v40  ;;  %v3958_v27 = vpop.f32.mrb[0].mxu1  ;;  %v1002_v16 = vsel %vm662_vm6, %v986_v43, 0.0 }
 0x1a3   : > { %v950_v48 = vadd.f32 %v949_v51, %v948_v56  ;;  %1764 = vst.msk [vmem:[#allocation2 + $0x90] sm:$0xff] %vm662_vm6, %v3958_v27  ;;  %v1698_v10 = vpop.f32.mrb[1].mxu1  ;;  %v1818_v33 = vmul.f32 %v3958_v27, %v3958_v27  ;;  %v1007_v14 = vsel %vm662_vm6, %v989_v25, 0.0  ;;  %v1781_v49 = vsel %vm662_vm6, %v3958_v27, 0.0 }
 0x1a4   : > { %v1003_v62 = vsel %vm662_vm6, %v987_v4, 0.0  ;;  %1762 = vst.msk [vmem:[#allocation2 + $0x80] sm:$0xff] %vm662_vm6, %v1698_v10  ;;  %v1816_v55 = vmul.f32 %v1698_v10, %v1698_v10  ;;  %v3959_v23 = vpop.f32.mrb[2].mxu1  ;;  %v1778_v8 = vsel %vm662_vm6, %v1698_v10, 0.0 }
 0x1a5   : > { %v952_v3 = vadd.f32 %v951_v47, %v950_v48  ;;  %v1004_v60 = vadd.f32 %v1003_v62, %v1002_v16  ;;  %1765 = vst.msk [vmem:[#allocation2 + $0x98] sm:$0xff] %vm662_vm6, %v3959_v23  ;;  %v1701_v31 = vpop.f32.mrb[3].mxu1  ;;  %v1819_v59 = vmul.f32 %v3959_v23, %v3959_v23  ;;  %v1835_v52 = vsel %vm662_vm6, %v1818_v33, 0.0 }
 0x1a6   : > { %1763 = vst.msk [vmem:[#allocation2 + $0x88] sm:$0xff] %vm662_vm6, %v1701_v31  ;;  %v1779_v57 = vsel %vm662_vm6, %v1701_v31, 0.0  ;;  %v1817_v63 = vmul.f32 %v1701_v31, %v1701_v31  ;;  %v1832_v38 = vsel %vm662_vm6, %v1816_v55, 0.0  ;;  %v1783_v2 = vsel %vm662_vm6, %v3959_v23, 0.0 }
 0x1a7   : > { %v1006_v9 = vadd.f32 %v1005_v42, %v1004_v60  ;;  %v1780_v41 = vadd.f32 %v1779_v57, %v1778_v8  ;;  %v954_v6 = vadd.f32 %v953_v24, %v952_v3  ;;  %v1837_v12 = vsel %vm662_vm6, %v1819_v59, 0.0 }
 0x1a8   : > { %v1833_v17 = vsel %vm662_vm6, %v1817_v63, 0.0 }
 0x1a9   : > { %v1782_v1 = vadd.f32 %v1781_v49, %v1780_v41  ;;  %v1834_v45 = vadd.f32 %v1833_v17, %v1832_v38  ;;  %v1008_v37 = vadd.f32 %v1007_v14, %v1006_v9 }
 0x1ab   : > { %v1836_v34 = vadd.f32 %v1835_v52, %v1834_v45  ;;  %v1784_v61 = vadd.f32 %v1783_v2, %v1782_v1 }
 0x1ad   : > { %v1838_v32 = vadd.f32 %v1837_v12, %v1836_v34 }
 0x1de   : > { %v3940_v26 = vpop.f32.mrb[4].mxu0 }
 0x1df   : > { %938 = vst.msk [vmem:[#allocation2 + $0x30] sm:$0xff] %vm662_vm6, %v3940_v26  ;;  %v884_v28 = vpop.f32.mrb[5].mxu0  ;;  %v992_v5 = vmul.f32 %v3940_v26, %v3940_v26  ;;  %v959_v53 = vsel %vm662_vm6, %v3940_v26, 0.0 }
 0x1e0   : > { %936 = vst.msk [vmem:[#allocation2 + $0x20] sm:$0xff] %vm662_vm6, %v884_v28  ;;  %v955_v0 = vsel %vm662_vm6, %v884_v28, 0.0  ;;  %v990_v22 = vmul.f32 %v884_v28, %v884_v28  ;;  %v3941_v58 = vpop.f32.mrb[6].mxu0 }
 0x1e1   : > { %v956_v13 = vadd.f32 %v955_v0, %v954_v6  ;;  %939 = vst.msk [vmem:[#allocation2 + $0x38] sm:$0xff] %vm662_vm6, %v3941_v58  ;;  %v887_v7 = vpop.f32.mrb[7].mxu0  ;;  %v993_v21 = vmul.f32 %v3941_v58, %v3941_v58  ;;  %v1013_v43 = vsel %vm662_vm6, %v992_v5, 0.0  ;;  %v961_v51 = vsel %vm662_vm6, %v3941_v58, 0.0 }
 0x1e2   : > { %v1009_v20 = vsel %vm662_vm6, %v990_v22, 0.0  ;;  %937 = vst.msk [vmem:[#allocation2 + $0x28] sm:$0xff] %vm662_vm6, %v887_v7  ;;  %v957_v46 = vsel %vm662_vm6, %v887_v7, 0.0  ;;  %v991_v39 = vmul.f32 %v887_v7, %v887_v7  ;;  %v3962_v35 = vpop.f32.mrb[4].mxu1 }
 0x1e3   : > { %v1010_v15 = vadd.f32 %v1009_v20, %v1008_v37  ;;  %v958_v29 = vadd.f32 %v957_v46, %v956_v13  ;;  %1768 = vst.msk [vmem:[#allocation2 + $0xb0] sm:$0xff] %vm662_vm6, %v3962_v35  ;;  %v1714_v54 = vpop.f32.mrb[5].mxu1  ;;  %v1822_v4 = vmul.f32 %v3962_v35, %v3962_v35  ;;  %v1015_v62 = vsel %vm662_vm6, %v993_v21, 0.0 }
 0x1e4   : > { %v1011_v18 = vsel %vm662_vm6, %v991_v39, 0.0  ;;  %1766 = vst.msk [vmem:[#allocation2 + $0xa0] sm:$0xff] %vm662_vm6, %v1714_v54  ;;  %v1785_v11 = vsel %vm662_vm6, %v1714_v54, 0.0  ;;  %v1820_v30 = vmul.f32 %v1714_v54, %v1714_v54  ;;  %v3963_v36 = vpop.f32.mrb[6].mxu1  ;;  %v1789_v55 = vsel %vm662_vm6, %v3962_v35, 0.0 }
 0x1e5   : > { %v960_v44 = vadd.f32 %v959_v53, %v958_v29  ;;  %v1012_v50 = vadd.f32 %v1011_v18, %v1010_v15  ;;  %v1786_v40 = vadd.f32 %v1785_v11, %v1784_v61  ;;  %1769 = vst.msk [vmem:[#allocation2 + $0xb8] sm:$0xff] %vm662_vm6, %v3963_v36  ;;  %v1717_v56 = vpop.f32.mrb[7].mxu1  ;;  %v1823_v42 = vmul.f32 %v3963_v36, %v3963_v36 }
 0x1e6   : > { %v1839_v27 = vsel %vm662_vm6, %v1820_v30, 0.0  ;;  %1767 = vst.msk [vmem:[#allocation2 + $0xa8] sm:$0xff] %vm662_vm6, %v1717_v56  ;;  %v1787_v25 = vsel %vm662_vm6, %v1717_v56, 0.0  ;;  %v1821_v16 = vmul.f32 %v1717_v56, %v1717_v56  ;;  %v1791_v31 = vsel %vm662_vm6, %v3963_v36, 0.0 }
 0x1e7   : > { %v1014_v48 = vadd.f32 %v1013_v43, %v1012_v50  ;;  %v1840_v10 = vadd.f32 %v1839_v27, %v1838_v32  ;;  %v1788_v47 = vadd.f32 %v1787_v25, %v1786_v40  ;;  %v962_v23 = vadd.f32 %v961_v51, %v960_v44 }
 0x1e8   : > { %v1841_v3 = vsel %vm662_vm6, %v1821_v16, 0.0  ;;  %v1843_v8 = vsel %vm662_vm6, %v1822_v4, 0.0  ;;  %v1845_v14 = vsel %vm662_vm6, %v1823_v42, 0.0 }
 0x1e9   : > { %v1790_v24 = vadd.f32 %v1789_v55, %v1788_v47  ;;  %v1016_v60 = vadd.f32 %v1015_v62, %v1014_v48  ;;  %v1842_v33 = vadd.f32 %v1841_v3, %v1840_v10 }
 0x1eb   : > { %v1792_v57 = vadd.f32 %v1791_v31, %v1790_v24  ;;  %v1844_v63 = vadd.f32 %v1843_v8, %v1842_v33 }
 0x1ed   : > { %v1846_v9 = vadd.f32 %v1845_v14, %v1844_v63 }
 0x21e   : > { %v3944_v41 = vpop.f32.mrb[8].mxu0 }
 0x21f   : > { %942 = vst.msk [vmem:[#allocation2 + $0x50] sm:$0xff] %vm662_vm6, %v3944_v41  ;;  %v900_v6 = vpop.f32.mrb[9].mxu0  ;;  %v996_v17 = vmul.f32 %v3944_v41, %v3944_v41  ;;  %v967_v61 = vsel %vm662_vm6, %v3944_v41, 0.0 }
 0x220   : > { %940 = vst.msk [vmem:[#allocation2 + $0x40] sm:$0xff] %vm662_vm6, %v900_v6  ;;  %v963_v49 = vsel %vm662_vm6, %v900_v6, 0.0  ;;  %v994_v38 = vmul.f32 %v900_v6, %v900_v6  ;;  %v3945_v59 = vpop.f32.mrb[10].mxu0 }
 0x221   : > { %v964_v1 = vadd.f32 %v963_v49, %v962_v23  ;;  %943 = vst.msk [vmem:[#allocation2 + $0x58] sm:$0xff] %vm662_vm6, %v3945_v59  ;;  %v903_v45 = vpop.f32.mrb[11].mxu0  ;;  %v997_v28 = vmul.f32 %v3945_v59, %v3945_v59  ;;  %v1021_v13 = vsel %vm662_vm6, %v996_v17, 0.0  ;;  %v969_v35 = vsel %vm662_vm6, %v3945_v59, 0.0 }
 0x222   : > { %v1017_v37 = vsel %vm662_vm6, %v994_v38, 0.0  ;;  %941 = vst.msk [vmem:[#allocation2 + $0x48] sm:$0xff] %vm662_vm6, %v903_v45  ;;  %v965_v52 = vsel %vm662_vm6, %v903_v45, 0.0  ;;  %v995_v2 = vmul.f32 %v903_v45, %v903_v45  ;;  %v3966_v34 = vpop.f32.mrb[8].mxu1 }
 0x223   : > { %v1018_v12 = vadd.f32 %v1017_v37, %v1016_v60  ;;  %v966_v32 = vadd.f32 %v965_v52, %v964_v1  ;;  %1772 = vst.msk [vmem:[#allocation2 + $0xd0] sm:$0xff] %vm662_vm6, %v3966_v34  ;;  %v1730_v26 = vpop.f32.mrb[9].mxu1  ;;  %v1826_v53 = vmul.f32 %v3966_v34, %v3966_v34  ;;  %v1023_v30 = vsel %vm662_vm6, %v997_v28, 0.0 }
 0x224   : > { %v1019_v0 = vsel %vm662_vm6, %v995_v2, 0.0  ;;  %1770 = vst.msk [vmem:[#allocation2 + $0xc0] sm:$0xff] %vm662_vm6, %v1730_v26  ;;  %v1793_v22 = vsel %vm662_vm6, %v1730_v26, 0.0  ;;  %v1824_v58 = vmul.f32 %v1730_v26, %v1730_v26  ;;  %v3967_v5 = vpop.f32.mrb[10].mxu1  ;;  %v1797_v36 = vsel %vm662_vm6, %v3966_v34, 0.0 }
 0x225   : > { %v968_v7 = vadd.f32 %v967_v61, %v966_v32  ;;  %v1020_v20 = vadd.f32 %v1019_v0, %v1018_v12  ;;  %v1794_v46 = vadd.f32 %v1793_v22, %v1792_v57  ;;  %1773 = vst.msk [vmem:[#allocation2 + $0xd8] sm:$0xff] %vm662_vm6, %v3967_v5  ;;  %v1733_v39 = vpop.f32.mrb[11].mxu1  ;;  %v1827_v44 = vmul.f32 %v3967_v5, %v3967_v5 }
 0x226   : > { %v1847_v15 = vsel %vm662_vm6, %v1824_v58, 0.0  ;;  %1771 = vst.msk [vmem:[#allocation2 + $0xc8] sm:$0xff] %vm662_vm6, %v1733_v39  ;;  %v1795_v29 = vsel %vm662_vm6, %v1733_v39, 0.0  ;;  %v1825_v11 = vmul.f32 %v1733_v39, %v1733_v39  ;;  %v1799_v51 = vsel %vm662_vm6, %v3967_v5, 0.0 }
 0x227   : > { %v1022_v54 = vadd.f32 %v1021_v13, %v1020_v20  ;;  %v1848_v21 = vadd.f32 %v1847_v15, %v1846_v9  ;;  %v1796_v18 = vadd.f32 %v1795_v29, %v1794_v46  ;;  %v970_v43 = vadd.f32 %v969_v35, %v968_v7 }
 0x228   : > { %v1849_v40 = vsel %vm662_vm6, %v1825_v11, 0.0  ;;  %v1851_v27 = vsel %vm662_vm6, %v1826_v53, 0.0  ;;  %v1853_v10 = vsel %vm662_vm6, %v1827_v44, 0.0 }
 0x229   : > { %v1798_v50 = vadd.f32 %v1797_v36, %v1796_v18  ;;  %v1024_v56 = vadd.f32 %v1023_v30, %v1022_v54  ;;  %v1850_v4 = vadd.f32 %v1849_v40, %v1848_v21 }
 0x22b   : > { %v1800_v25 = vadd.f32 %v1799_v51, %v1798_v50  ;;  %v1852_v48 = vadd.f32 %v1851_v27, %v1850_v4 }
 0x22d   : > { %v1854_v47 = vadd.f32 %v1853_v10, %v1852_v48 }
 0x25d   : > { %v3948_v16 = vpop.f32.mrb[12].mxu0 }
 0x25e   : > { %946 = vst.msk [vmem:[#allocation2 + $0x70] sm:$0xff] %vm662_vm6, %v3948_v16  ;;  %v3970_v62 = vpop.f32.mrb[12].mxu1  ;;  %v916_v55 = vpop.f32.mrb[13].mxu0  ;;  %v975_v41 = vsel %vm662_vm6, %v3948_v16, 0.0  ;;  %v1000_v38 = vmul.f32 %v3948_v16, %v3948_v16 }
 0x25f   : > { %1776 = vst.msk [vmem:[#allocation2 + $0xf0] sm:$0xff] %vm662_vm6, %v3970_v62  ;;  %944 = vst.msk [vmem:[#allocation2 + $0x60] sm:$0xff] %vm662_vm6, %v916_v55  ;;  %v971_v23 = vsel %vm662_vm6, %v916_v55, 0.0  ;;  %v998_v42 = vmul.f32 %v916_v55, %v916_v55  ;;  %v1746_v24 = vpop.f32.mrb[13].mxu1  ;;  %v3949_v3 = vpop.f32.mrb[14].mxu0  ;;  %v1830_v45 = vmul.f32 %v3970_v62, %v3970_v62  ;;  %v1805_v34 = vsel %vm662_vm6, %v3970_v62, 0.0 }
 0x260   : > { %v972_v60 = vadd.f32 %v971_v23, %v970_v43  ;;  %1774 = vst.msk [vmem:[#allocation2 + $0xe0] sm:$0xff] %vm662_vm6, %v1746_v24  ;;  %v1801_v31 = vsel %vm662_vm6, %v1746_v24, 0.0  ;;  %v1828_v33 = vmul.f32 %v1746_v24, %v1746_v24  ;;  %947 = vst.msk [vmem:[#allocation2 + $0x78] sm:$0xff] %vm662_vm6, %v3949_v3  ;;  %v3971_v8 = vpop.f32.mrb[14].mxu1  ;;  %v919_v57 = vpop.f32.mrb[15].mxu0  ;;  %v1001_v61 = vmul.f32 %v3949_v3, %v3949_v3 }
 0x261   : > { %v1025_v63 = vsel %vm662_vm6, %v998_v42, 0.0  ;;  %v1802_v14 = vadd.f32 %v1801_v31, %v1800_v25  ;;  %1777 = vst.msk [vmem:[#allocation2 + $0xf8] sm:$0xff] %vm662_vm6, %v3971_v8  ;;  %945 = vst.msk [vmem:[#allocation2 + $0x68] sm:$0xff] %vm662_vm6, %v919_v57  ;;  %v1749_v9 = vpop.f32.mrb[15].mxu1  ;;  %v973_v17 = vsel %vm662_vm6, %v919_v57, 0.0  ;;  %v999_v1 = vmul.f32 %v919_v57, %v919_v57 }
 0x262   : > { %v1026_v6 = vadd.f32 %v1025_v63, %v1024_v56  ;;  %v1855_v49 = vsel %vm662_vm6, %v1828_v33, 0.0  ;;  %1775 = vst.msk [vmem:[#allocation2 + $0xe8] sm:$0xff] %vm662_vm6, %v1749_v9  ;;  %v974_v37 = vadd.f32 %v973_v17, %v972_v60  ;;  %v1803_v52 = vsel %vm662_vm6, %v1749_v9, 0.0 }
 0x263   : > { %v1856_v59 = vadd.f32 %v1855_v49, %v1854_v47  ;;  %v1829_v2 = vmul.f32 %v1749_v9, %v1749_v9  ;;  %v1027_v12 = vsel %vm662_vm6, %v999_v1, 0.0  ;;  %v1804_v32 = vadd.f32 %v1803_v52, %v1802_v14 }
 0x264   : > { %v1831_v26 = vmul.f32 %v3971_v8, %v3971_v8  ;;  %v976_v28 = vadd.f32 %v975_v41, %v974_v37  ;;  %v1028_v0 = vadd.f32 %v1027_v12, %v1026_v6  ;;  %v1029_v58 = vsel %vm662_vm6, %v1000_v38, 0.0 }
 0x265   : > { %v1857_v22 = vsel %vm662_vm6, %v1829_v2, 0.0  ;;  %v977_v5 = vsel %vm662_vm6, %v3949_v3, 0.0  ;;  %v1806_v13 = vadd.f32 %v1805_v34, %v1804_v32  ;;  %v1859_v20 = vsel %vm662_vm6, %v1830_v45, 0.0 }
 0x266   : > { %v1858_v7 = vadd.f32 %v1857_v22, %v1856_v59  ;;  %v1807_v46 = vsel %vm662_vm6, %v3971_v8, 0.0  ;;  %v978_v39 = vadd.f32 %v977_v5, %v976_v28  ;;  %v1030_v35 = vadd.f32 %v1029_v58, %v1028_v0 }
 0x267   : > { %v1031_v53 = vsel %vm662_vm6, %v1001_v61, 0.0  ;;  %v1808_v15 = vadd.f32 %v1807_v46, %v1806_v13  ;;  %v1861_v54 = vsel %vm662_vm6, %v1831_v26, 0.0 }
 0x268   : > { %v1860_v29 = vadd.f32 %v1859_v20, %v1858_v7  ;;  %v979_v21 = vrot.slane %v978_v39, 4  ;;  %v1032_v18 = vadd.f32 %v1031_v53, %v1030_v35 }
 0x269   : > { %v1809_v11 = vrot.slane %v1808_v15, 4 }
 0x26a   : > { %v1862_v30 = vadd.f32 %v1861_v54, %v1860_v29  ;;  %v980_v36 = vadd.f32 %v979_v21, %v978_v39  ;;  %v1033_v43 = vrot.slane %v1032_v18, 4 }
 0x26b   : > { %v1810_v44 = vadd.f32 %v1809_v11, %v1808_v15 }
 0x26c   : > { %v1863_v50 = vrot.slane %v1862_v30, 4  ;;  %v981_v40 = vrot.slane %v980_v36, 2  ;;  %v1034_v56 = vadd.f32 %v1033_v43, %v1032_v18 }
 0x26d   : > { %v1811_v51 = vrot.slane %v1810_v44, 2 }
 0x26e   : > { %v1864_v4 = vadd.f32 %v1863_v50, %v1862_v30  ;;  %v982_v27 = vadd.f32 %v981_v40, %v980_v36  ;;  %v1035_v25 = vrot.slane %v1034_v56, 2 }
 0x26f   : > { %v1812_v48 = vadd.f32 %v1811_v51, %v1810_v44 }
 0x270   : > { %v1865_v10 = vrot.slane %v1864_v4, 2  ;;  %v983_v47 = vrot.slane %v982_v27, 1  ;;  %v1036_v16 = vadd.f32 %v1035_v25, %v1034_v56 }
 0x271   : > { %v1813_v62 = vrot.slane %v1812_v48, 1 }
 0x272   : > { %v1866_v55 = vadd.f32 %v1865_v10, %v1864_v4  ;;  %v984_v23 = vadd.f32 %v983_v47, %v982_v27  ;;  %v1037_v42 = vrot.slane %v1036_v16, 1 }
 0x273   : > { %v1814_v24 = vadd.f32 %v1813_v62, %v1812_v48 }
 0x274   : > { %v1867_v3 = vrot.slane %v1866_v55, 1  ;;  %v1038_v60 = vadd.f32 %v1037_v42, %v1036_v16 }
 0x275   : > { %v1815_v31 = vadd.f32 %v1814_v24, %v984_v23 }
 0x276   : > { %v1868_v33 = vadd.f32 %v1867_v3, %v1866_v55 }
 0x277   : > { %v5060_v57 = vmul.f32 0.00390625, %v1815_v31 }
 0x278   : > { %v1869_v8 = vadd.f32 %v1868_v33, %v1038_v60 }
 0x279   : > { %v1872_v14 = vmul.f32 %v5060_v57, %v5060_v57 }
 0x27a   : > { %v1871_v63 = vmul.f32 0.00390625, %v1869_v8 }
 0x27c   : > { %v1873_v9 = vsub.f32 %v1871_v63, %v1872_v14 }
 0x27e   : > { %v1874_v41 = vmax.f32 %v1873_v9, 0.0 }
 0x280   : > { %v1875_v6 = vadd.f32 1e-05, %v1874_v41 }
 0x282   : > { %4055 = vrsqrt.f32 %v1875_v6 }
 0x28c   : > { %v5064_v49 = vpop.eup %4055 }
 0x28d LB: >> { %s3881_s9 = sshll.u32 %s4080_s8, 7  ;;  %s3882_s11 = sshll.u32 %s4080_s8, 6  ;;  %s4080_s8 = sphi %s5066_s8, %s1882_s8  }
 0x28e   : >> { %s5072_s10 = scalar_lea.vmem [#allocation2], %s3881_s9  ;;  %s5109_s13 = scalar_lea.vmem [#allocation3], %s3882_s11 }
 0x28f   : >> { %v1886_v38 = vld [vmem:[%s5072_s10] sm:$0xff]  ;;  %v1887_v59 = vld [vmem:[%s5072_s10 + $0x8] sm:$0xff]  ;;  %v1888_v17 = vld [vmem:[%s5072_s10 + $0x10] sm:$0xff]  ;;  %s1882_s8 = sadd.s32 1, %s4080_s8  }
 0x290   : >> { %v1902_v1 = vsub.f32 %v1886_v38, %v5060_v57  ;;  %v1903_v45 = vsub.f32 %v1887_v59, %v5060_v57  ;;  %v1889_v37 = vld [vmem:[%s5072_s10 + $0x18] sm:$0xff]  ;;  %v1904_v52 = vsub.f32 %v1888_v17, %v5060_v57  ;;  %v1890_v2 = vld [vmem:[%s5072_s10 + $0x20] sm:$0xff]  ;;  %v1891_v34 = vld [vmem:[%s5072_s10 + $0x28] sm:$0xff]  ;;  %p1879_p4 = scmp.ge.s32.totalorder %s1882_s8, 2  }
 0x291   : >> { %v1905_v61 = vsub.f32 %v1889_v37, %v5060_v57  ;;  %v1906_v12 = vsub.f32 %v1890_v2, %v5060_v57  ;;  %v1907_v32 = vsub.f32 %v1891_v34, %v5060_v57  ;;  %v1892_v26 = vld [vmem:[%s5072_s10 + $0x30] sm:$0xff]  ;;  %v1893_v28 = vld [vmem:[%s5072_s10 + $0x38] sm:$0xff]  ;;  %v1894_v39 = vld [vmem:[%s5072_s10 + $0x40] sm:$0xff] }
 0x292   : >> { %v1918_v0 = vmul.f32 %v5064_v49, %v1902_v1  ;;  %v1919_v22 = vmul.f32 %v5064_v49, %v1903_v45  ;;  %v1920_v58 = vmul.f32 %v5064_v49, %v1904_v52  ;;  %v1908_v5 = vsub.f32 %v1892_v26, %v5060_v57  ;;  %v1895_v35 = vld [vmem:[%s5072_s10 + $0x48] sm:$0xff]  ;;  %v1896_v21 = vld [vmem:[%s5072_s10 + $0x50] sm:$0xff]  ;;  %v1897_v43 = vld [vmem:[%s5072_s10 + $0x58] sm:$0xff] }
 0x293   : >> { %v1921_v13 = vmul.f32 %v5064_v49, %v1905_v61  ;;  %v1922_v7 = vmul.f32 %v5064_v49, %v1906_v12  ;;  %v1923_v20 = vmul.f32 %v5064_v49, %v1907_v32  ;;  %v1909_v46 = vsub.f32 %v1893_v28, %v5060_v57  ;;  %v1898_v44 = vld [vmem:[%s5072_s10 + $0x60] sm:$0xff]  ;;  %v1899_v4 = vld [vmem:[%s5072_s10 + $0x68] sm:$0xff]  ;;  %v1900_v27 = vld [vmem:[%s5072_s10 + $0x70] sm:$0xff] }
 0x294   : >> { %v1934_v53 = vmax.f32 %v1918_v0, 0.0  ;;  %v1935_v15 = vmax.f32 %v1919_v22, 0.0  ;;  %v1936_v29 = vmax.f32 %v1920_v58, 0.0  ;;  %v1924_v54 = vmul.f32 %v5064_v49, %v1908_v5  ;;  %v1901_v42 = vld [vmem:[%s5072_s10 + $0x78] sm:$0xff] }
 0x295   : >> { %v1937_v18 = vmax.f32 %v1921_v13, 0.0  ;;  %v1938_v11 = vmax.f32 %v1922_v7, 0.0  ;;  %v1939_v30 = vmax.f32 %v1923_v20, 0.0  ;;  %v1925_v36 = vmul.f32 %v5064_v49, %v1909_v46 }
 0x296   : >> { %v1950_v50 = vpack.c.bf16 %v1935_v15, %v1934_v53  ;;  %v1940_v40 = vmax.f32 %v1924_v54, 0.0  ;;  %v1910_v56 = vsub.f32 %v1894_v39, %v5060_v57  ;;  %v1911_v51 = vsub.f32 %v1895_v35, %v5060_v57 }
 0x297   : >> { %v1951_v25 = vpack.c.bf16 %v1937_v18, %v1936_v29  ;;  %v1952_v48 = vpack.c.bf16 %v1939_v30, %v1938_v11  ;;  %v1941_v10 = vmax.f32 %v1925_v36, 0.0  ;;  %v1912_v47 = vsub.f32 %v1896_v21, %v5060_v57 }
 0x298   : >> { %1960 = vst.msk [vmem:[%s5109_s13] sm:$0xff] %vm662_vm6, %v1950_v50  ;;  %v1926_v16 = vmul.f32 %v5064_v49, %v1910_v56  ;;  %v1927_v62 = vmul.f32 %v5064_v49, %v1911_v51  ;;  %v1913_v55 = vsub.f32 %v1897_v43, %v5060_v57  ;;  %v1914_v23 = vsub.f32 %v1898_v44, %v5060_v57 }
 0x299   : >> { %1961 = vst.msk [vmem:[%s5109_s13 + $0x8] sm:$0xff] %vm662_vm6, %v1951_v25  ;;  %1962 = vst.msk [vmem:[%s5109_s13 + $0x10] sm:$0xff] %vm662_vm6, %v1952_v48  ;;  %v1953_v24 = vpack.c.bf16 %v1941_v10, %v1940_v40  ;;  %v1928_v3 = vmul.f32 %v5064_v49, %v1912_v47  ;;  %v1915_v60 = vsub.f32 %v1899_v4, %v5060_v57 }
 0x29a   : >> { %v1916_v31 = vsub.f32 %v1900_v27, %v5060_v57  ;;  %v1942_v33 = vmax.f32 %v1926_v16, 0.0  ;;  %v1943_v8 = vmax.f32 %v1927_v62, 0.0  ;;  %v1929_v63 = vmul.f32 %v5064_v49, %v1913_v55 }
 0x29b   : >> { %v1930_v14 = vmul.f32 %v5064_v49, %v1914_v23  ;;  %1963 = vst.msk [vmem:[%s5109_s13 + $0x18] sm:$0xff] %vm662_vm6, %v1953_v24  ;;  %v1944_v9 = vmax.f32 %v1928_v3, 0.0  ;;  %v1931_v41 = vmul.f32 %v5064_v49, %v1915_v60  ;;  %v1917_v6 = vsub.f32 %v1901_v42, %v5060_v57 }
 0x29c   : >> { %v1932_v38 = vmul.f32 %v5064_v49, %v1916_v31  ;;  %v1954_v59 = vpack.c.bf16 %v1943_v8, %v1942_v33  ;;  %v1945_v17 = vmax.f32 %v1929_v63, 0.0 }
 0x29d   : >> { %v1946_v1 = vmax.f32 %v1930_v14, 0.0  ;;  %v1947_v45 = vmax.f32 %v1931_v41, 0.0  ;;  %v1933_v37 = vmul.f32 %v5064_v49, %v1917_v6  ;;  %1881 = sbr.rel (!%p1879_p4) target bundleno = 653 (0x28d), region = 94 }
 0x29e   : >> { %v1948_v52 = vmax.f32 %v1932_v38, 0.0  ;;  %1964 = vst.msk [vmem:[%s5109_s13 + $0x20] sm:$0xff] %vm662_vm6, %v1954_v59  ;;  %v1955_v2 = vpack.c.bf16 %v1945_v17, %v1944_v9 }
 0x29f   : >> { %v1956_v34 = vpack.c.bf16 %v1947_v45, %v1946_v1  ;;  %v1949_v61 = vmax.f32 %v1933_v37, 0.0 }
 0x2a0   : >> { %1965 = vst.msk [vmem:[%s5109_s13 + $0x28] sm:$0xff] %vm662_vm6, %v1955_v2 }
 0x2a1   : >> { %1966 = vst.msk [vmem:[%s5109_s13 + $0x30] sm:$0xff] %vm662_vm6, %v1956_v34  ;;  %v1957_v12 = vpack.c.bf16 %v1949_v61, %v1948_v52 }
 0x2a3   : >> { %1967 = vst.msk [vmem:[%s5109_s13 + $0x38] sm:$0xff] %vm662_vm6, %v1957_v12 }
 0x2aa   : > { %v1976_v32 = vld [vmem:[#allocation3] sm:$0xff]  ;;  %v1975_v26 = vld [vmem:[#allocation3 + $0x8] sm:$0xff]  ;;  %v2794_v28 = vld [vmem:[#allocation3 + $0x38] sm:$0xff] }
 0x2ab   : > { %v1991_v0 = vshrl.u32 %v1976_v32, 16  ;;  %v2032_v22 = vshll.u32 %v1976_v32, 16  ;;  %v1988_v58 = vshrl.u32 %v1975_v26, 16  ;;  %v2028_v5 = vshll.u32 %v1975_v26, 16  ;;  %v2796_v13 = vld [vmem:[#allocation3 + $0x40] sm:$0xff]  ;;  %v2797_v63 = vld [vmem:[#allocation3 + $0x48] sm:$0xff] }
 0x2ac   : > { %v2808_v7 = vshrl.u32 %v2794_v28, 16  ;;  %v2848_v20 = vshll.u32 %v2794_v28, 16  ;;  %v2811_v46 = vshrl.u32 %v2796_v13, 16  ;;  %v2852_v18 = vshll.u32 %v2796_v13, 16 }
 0x2ad   : > { %v2031_v39 = vrot.slane %v1991_v0, 7  ;;  %v2088_v35 = vrot.slane %v2032_v22, 7  ;;  %v2027_v53 = vrot.slane %v1988_v58, 7  ;;  %v2087_v15 = vrot.slane %v2028_v5, 7 }
 0x2ae   : > { %v2847_v29 = vrot.slane %v2808_v7, 7  ;;  %v2907_v54 = vrot.slane %v2848_v20, 7  ;;  %v2851_v21 = vrot.slane %v2811_v46, 7  ;;  %v2908_v10 = vrot.slane %v2852_v18, 7 }
 0x2af   : > { %v2034_v11 = vor.u32 %v2032_v22, %v2031_v39  ;;  %v2118_v57 = vsel %vm4141_vm3, %v2031_v39, %v2088_v35  ;;  %v2030_v49 = vor.u32 %v2028_v5, %v2027_v53  ;;  %v2117_v30 = vsel %vm4141_vm3, %v2027_v53, %v2087_v15 }
 0x2b0   : > { %v2259_v36 = vrot.slane %v2118_v57, 1  ;;  %v2256_v43 = vrot.slane %v2117_v30, 1  ;;  %v2850_v44 = vor.u32 %v2848_v20, %v2847_v29  ;;  %v2937_v50 = vsel %vm4141_vm3, %v2847_v29, %v2907_v54 }
 0x2b1   : > { %v5152_v40 = vsel %vm4141_vm3, %v1991_v0, %v2034_v11  ;;  %v5156_v56 = vsel %vm4141_vm3, %v1988_v58, %v2030_v49  ;;  %v3076_v51 = vrot.slane %v2937_v50, 1  ;;  %v2135_v4 = vshll.u32 %v2117_v30, 16 }
 0x2b2   : > { %v2258_v27 = vrot.slane %v5152_v40, 1  ;;  %v2255_v25 = vrot.slane %v5156_v56, 1  ;;  %v5162_v48 = vsel %vm4141_vm3, %v2808_v7, %v2850_v44  ;;  %v2128_v16 = vshrl.u32 %v5156_v56, 16 }
 0x2b3   : > { %v3075_v47 = vrot.slane %v5162_v48, 1  ;;  %v2130_v62 = vshll.u32 %v5156_v56, 16  ;;  %v2948_v55 = vshrl.u32 %v5162_v48, 16  ;;  %v2950_v24 = vshll.u32 %v5162_v48, 16 }
 0x2b4   : > { %v5169_v23 = vsel %vm491_vm2, %v2258_v27, %v2259_v36  ;;  %v5172_v42 = vsel %vm491_vm2, %v2255_v25, %v2256_v43  ;;  %v2955_v3 = vshll.u32 %v2937_v50, 16  ;;  %v2137_v33 = vrot.slane %v2135_v4, 1  ;;  %v2798_v36 = vld [vmem:[#allocation3 + $0x50] sm:$0xff] }
 0x2b5   : > { %2281 = vrot.lane.b32.xlu0 %v5169_v23, %s4087_s22  ;;  %2279 = vrot.lane.b32.xlu1 %v5172_v42, %s4087_s22  ;;  %v5180_v60 = vsel %vm491_vm2, %v3075_v47, %v3076_v51  ;;  %v2132_v31 = vrot.slane %v2130_v62, 1  ;;  %v2142_v8 = vshll.u32 %v5152_v40, 16  ;;  %v2952_v14 = vrot.slane %v2950_v24, 1 }
 0x2b6   : > { %v2140_v9 = vshrl.u32 %v5152_v40, 16  ;;  %v2147_v41 = vshll.u32 %v2118_v57, 16  ;;  %v2854_v6 = vor.u32 %v2852_v18, %v2851_v21  ;;  %v2957_v59 = vrot.slane %v2955_v3, 1  ;;  %v1978_v18 = vld [vmem:[#allocation3 + $0x10] sm:$0xff]  ;;  %v4057_v3 = vld [vmem:[%s6084_s2] sm:$0xff]  }
 0x2b7   : > { %v2133_v38 = vor.u32 %v2132_v31, %v2128_v16  ;;  %v2144_v17 = vrot.slane %v2142_v8, 1  ;;  %v2938_v1 = vsel %vm4141_vm3, %v2851_v21, %v2908_v10  ;;  %v2953_v45 = vor.u32 %v2952_v14, %v2948_v55  ;;  %3972 = vmatprep.subr.bf16.mxu0 %v4057_v3  ;;  %3994 = vmatprep.subr.bf16.mxu1 %v4057_v3 }
 0x2b8   : > { %v5188_v37 = vsel %vm4141_vm3, %v2811_v46, %v2854_v6  ;;  %v2967_v52 = vshll.u32 %v2938_v1, 16  ;;  %v2814_v2 = vshrl.u32 %v2797_v63, 16  ;;  %v2149_v26 = vrot.slane %v2147_v41, 1  ;;  %3973 = vmatpush3.bf16.msra.mxu0 %v4057_v3  ;;  %3995 = vmatpush3.bf16.msra.mxu1 %v4057_v3 }
 0x2b9   : > { %3099 = vrot.lane.b32.xlu1 %v5180_v60, %s4087_s22  ;;  %v5193_v34 = vsel %vm362_vm4, %v2133_v38, %v2137_v33  ;;  %v2960_v61 = vshrl.u32 %v5188_v37, 16  ;;  %v2962_v12 = vshll.u32 %v5188_v37, 16  ;;  %v2145_v32 = vor.u32 %v2144_v17, %v2140_v9  ;;  %v4058_v9 = vld [vmem:[%s6084_s2 + $0x8] sm:$0xff]  }
 0x2ba   : > { %2223 = vrot.lane.b32.xlu0 %v5193_v34, %s4088_s23  ;;  %v5200_v28 = vsel %vm362_vm4, %v2953_v45, %v2957_v59  ;;  %v2969_v22 = vrot.slane %v2967_v52, 1  ;;  %v2855_v58 = vrot.slane %v2814_v2, 7  ;;  %v2856_v5 = vshll.u32 %v2797_v63, 16  ;;  %3974 = vmatprep.subr.bf16.mxu0 %v4058_v9 }
 0x2bb   : > { %v2964_v0 = vrot.slane %v2962_v12, 1  ;;  %v2150_v7 = vsel %vm362_vm4, %v2145_v32, %v2149_v26  ;;  %v3078_v46 = vrot.slane %v5188_v37, 1  ;;  %v3079_v39 = vrot.slane %v2938_v1, 1  ;;  %3996 = vmatprep.subr.bf16.mxu1 %v4058_v9  ;;  %v4059_v1 = vld [vmem:[%s6084_s2 + $0x10] ss:$0 sps:$4 sm:$0x33]  }
 0x2bc   : > { %v2858_v35 = vor.u32 %v2856_v5, %v2855_v58  ;;  %v2909_v29 = vrot.slane %v2856_v5, 7  ;;  %v1997_v30 = vshrl.u32 %v1978_v18, 16  ;;  %v2040_v51 = vshll.u32 %v1978_v18, 16  ;;  %3975 = vmatpush3.bf16.msra.mxu0 %v4058_v9  ;;  %3997 = vmatpush3.bf16.msra.mxu1 %v4058_v9 }
 0x2bd   : > { %2296 = vrot.lane.b32.xlu1 %v5152_v40, %s4086_s21  ;;  %v2965_v13 = vor.u32 %v2964_v0, %v2960_v61  ;;  %v3080_v53 = vsel %vm491_vm2, %v3078_v46, %v3079_v39  ;;  %v2817_v4 = vshrl.u32 %v2798_v36, 16  ;;  %v2860_v47 = vshll.u32 %v2798_v36, 16  ;;  %4018 = vmatprep.subr.msk.bf16.mxu0 %vm830_vm5, %v4059_v1  ;;  %v1979_v39 = vld [vmem:[#allocation3 + $0x18] sm:$0xff] }
 0x2be   : > { %3043 = vrot.lane.b32.xlu0 %v5200_v28, %s4088_s23  ;;  %v5214_v15 = vsel %vm4141_vm3, %v2814_v2, %v2858_v35  ;;  %v2939_v21 = vsel %vm4141_vm3, %v2855_v58, %v2909_v29  ;;  %v2039_v50 = vrot.slane %v1997_v30, 7  ;;  %v2090_v55 = vrot.slane %v2040_v51, 7  ;;  %4019 = vmatprep.subr.msk.bf16.mxu1 %vm830_vm5, %v4059_v1  ;;  %v2799_v29 = vld [vmem:[#allocation3 + $0x58] sm:$0xff] }
 0x2bf   : > { %v2970_v20 = vsel %vm362_vm4, %v2965_v13, %v2969_v22  ;;  %v2974_v54 = vshll.u32 %v5214_v15, 16  ;;  %v2972_v11 = vshrl.u32 %v5214_v15, 16  ;;  %v2979_v49 = vshll.u32 %v2939_v21, 16 }
 0x2c0   : > { %v2042_v25 = vor.u32 %v2040_v51, %v2039_v50  ;;  %v2859_v10 = vrot.slane %v2817_v4, 7  ;;  %v3081_v16 = vrot.slane %v5214_v15, 1  ;;  %v3082_v62 = vrot.slane %v2939_v21, 1 }
 0x2c1   : > { %2225 = vrot.lane.b32.xlu1 %v2150_v7, %s4088_s23  ;;  %v2976_v57 = vrot.slane %v2974_v54, 1  ;;  %v2981_v44 = vrot.slane %v2979_v49, 1  ;;  %v2120_v33 = vsel %vm4141_vm3, %v2039_v50, %v2090_v55  ;;  %v2910_v63 = vrot.slane %v2860_v47, 7 }
 0x2c2   : > { %3045 = vrot.lane.b32.xlu0 %v2970_v20, %s4088_s23  ;;  %v2862_v24 = vor.u32 %v2860_v47, %v2859_v10  ;;  %v5252_v31 = vsel %vm491_vm2, %v3081_v16, %v3082_v62  ;;  %v2171_v41 = vshll.u32 %v2120_v33, 16  ;;  %v2585_v52 = vsel %vm830_vm5, %v4059_v1, 0  ;;  %v1980_v47 = vld [vmem:[#allocation3 + $0x20] sm:$0xff] }
 0x2c3   : > { %v2977_v43 = vor.u32 %v2976_v57, %v2972_v11  ;;  %v2940_v59 = vsel %vm4141_vm3, %v2859_v10, %v2910_v63  ;;  %3977 = vmatpush3.bf16.msra.mxu0 %v2585_v52  ;;  %3999 = vmatpush3.bf16.msra.mxu1 %v2585_v52  ;;  %v2265_v5 = vrot.slane %v2120_v33, 1  ;;  %v2044_v21 = vshll.u32 %v1979_v39, 16  ;;  %v2800_v33 = vld [vmem:[#allocation3 + $0x60] sm:$0xff] }
 0x2c4   : > { %v5259_v14 = vsel %vm4141_vm3, %v2817_v4, %v2862_v24  ;;  %v2991_v45 = vshll.u32 %v2940_v59, 16  ;;  %v2173_v61 = vrot.slane %v2171_v41, 1  ;;  %v3085_v46 = vrot.slane %v2940_v59, 1 }
 0x2c5   : > { %3116 = vrot.lane.b32.xlu1 %v5188_v37, %s4086_s21  ;;  %v5234_v27 = vsel %vm362_vm4, %v2977_v43, %v2981_v44  ;;  %v2986_v17 = vshll.u32 %v5259_v14, 16  ;;  %v2984_v12 = vshrl.u32 %v5259_v14, 16  ;;  %v2820_v18 = vshrl.u32 %v2799_v29, 16 }
 0x2c6   : > { %3101 = vrot.lane.b32.xlu0 %v3080_v53, %s4087_s22  ;;  %v2993_v22 = vrot.slane %v2991_v45, 1  ;;  %v2091_v49 = vrot.slane %v2044_v21, 7 }
 0x2c7   : > { %v2988_v32 = vrot.slane %v2986_v17, 1  ;;  %v2863_v57 = vrot.slane %v2820_v18, 7 }
 0x2c9   : > { %2324 = vrot.lane.b32.xlu1 %v2150_v7, %s4089_s24  ;;  %v2989_v0 = vor.u32 %v2988_v32, %v2984_v12 }
 0x2ca   : > { %2298 = vrot.lane.b32.xlu0 %v5156_v56, %s4086_s21 }
 0x2cb   : > { %v2994_v13 = vsel %vm362_vm4, %v2989_v0, %v2993_v22 }
 0x2cd   : > { %3144 = vrot.lane.b32.xlu1 %v2970_v20, %s4089_s24  ;;  %v3084_v20 = vrot.slane %v5259_v14, 1 }
 0x2ce   : > { %3118 = vrot.lane.b32.xlu0 %v5214_v15, %s4086_s21 }
 0x2cf   : > { %v3086_v35 = vsel %vm491_vm2, %v3084_v20, %v3085_v46 }
 0x2d1   : > { %2344 = vrot.lane.b32.xlu1 %v5169_v23, %s4090_s25  ;;  %v5242_v23 = vsel %vm4141_vm3, %v1997_v30, %v2042_v25 }
 0x2d2   : > { %2326 = vrot.lane.b32.xlu0 %v5193_v34, %s4089_s24  ;;  %v2166_v8 = vshll.u32 %v5242_v23, 16  ;;  %v2164_v6 = vshrl.u32 %v5242_v23, 16  ;;  %v2264_v58 = vrot.slane %v5242_v23, 1 }
 0x2d4   : > { %v2168_v38 = vrot.slane %v2166_v8, 1  ;;  %v2266_v7 = vsel %vm491_vm2, %v2264_v58, %v2265_v5 }
 0x2d5   : > { %3164 = vrot.lane.b32.xlu1 %v3080_v53, %s4090_s25  ;;  %v2000_v53 = vshrl.u32 %v1979_v39, 16 }
 0x2d6   : > { %3146 = vrot.lane.b32.xlu0 %v5234_v27, %s4089_s24  ;;  %v2169_v2 = vor.u32 %v2168_v38, %v2164_v6  ;;  %v2048_v6 = vshll.u32 %v1980_v47, 16  ;;  %v2823_v38 = vshrl.u32 %v2800_v33, 16 }
 0x2d7   : > { %v2043_v54 = vrot.slane %v2000_v53, 7 }
 0x2d8   : > { %v2174_v26 = vsel %vm362_vm4, %v2169_v2, %v2173_v61  ;;  %v2867_v52 = vrot.slane %v2823_v38, 7  ;;  %v2868_v2 = vshll.u32 %v2800_v33, 16 }
 0x2d9   : > { %2361 = vrot.lane.b32.xlu1 %v5156_v56, %s4091_s28  ;;  %v2046_v11 = vor.u32 %v2044_v21, %v2043_v54 }
 0x2da   : > { %2346 = vrot.lane.b32.xlu0 %v5172_v42, %s4090_s25  ;;  %v2870_v22 = vor.u32 %v2868_v2, %v2867_v52  ;;  %v2912_v20 = vrot.slane %v2868_v2, 7 }
 0x2db   : > { %v5313_v30 = vsel %vm4141_vm3, %v2000_v53, %v2046_v11 }
 0x2dc   : > { %v2178_v43 = vshll.u32 %v5313_v30, 16  ;;  %v2176_v4 = vshrl.u32 %v5313_v30, 16  ;;  %v2267_v17 = vrot.slane %v5313_v30, 1 }
 0x2dd   : > { %3181 = vrot.lane.b32.xlu1 %v5214_v15, %s4091_s28 }
 0x2de   : > { %3166 = vrot.lane.b32.xlu0 %v5252_v31, %s4090_s25 }
 0x2e1   : > { %2389 = vrot.lane.b32.xlu1 %v5193_v34, %s4092_s4 }
 0x2e2   : > { %2363 = vrot.lane.b32.xlu0 %v5242_v23, %s4091_s28 }
 0x2e5   : > { %3209 = vrot.lane.b32.xlu1 %v5234_v27, %s4092_s4 }
 0x2e6   : > { %3183 = vrot.lane.b32.xlu0 %v5259_v14, %s4091_s28 }
 0x2e9   : > { %2409 = vrot.lane.b32.xlu1 %v5172_v42, %s4093_s7 }
 0x2ea   : > { %2391 = vrot.lane.b32.xlu0 %v2174_v26, %s4092_s4 }
 0x2ed   : > { %3229 = vrot.lane.b32.xlu1 %v5252_v31, %s4093_s7 }
 0x2ee   : > { %3211 = vrot.lane.b32.xlu0 %v2994_v13, %s4092_s4 }
 0x2f1   : > { %2411 = vrot.lane.b32.xlu1 %v2266_v7, %s4093_s7 }
 0x2f2   : > { %2227 = vrot.lane.b32.xlu0 %v5193_v34, %s4088_s23  ;;  %v2864_v34 = vshll.u32 %v2799_v29, 16  ;;  %v2942_v29 = vsel %vm4141_vm3, %v2867_v52, %v2912_v20 }
 0x2f4   : > { %v2866_v36 = vor.u32 %v2864_v34, %v2863_v57  ;;  %v2911_v50 = vrot.slane %v2864_v34, 7 }
 0x2f5   : > { %3231 = vrot.lane.b32.xlu1 %v3086_v35, %s4093_s7 }
 0x2f6   : > { %3047 = vrot.lane.b32.xlu0 %v5234_v27, %s4088_s23  ;;  %v5323_v44 = vsel %vm4141_vm3, %v2820_v18, %v2866_v36  ;;  %v2180_v27 = vrot.slane %v2178_v43, 1  ;;  %v2941_v10 = vsel %vm4141_vm3, %v2863_v57, %v2911_v50  ;;  %v3015_v57 = vshll.u32 %v2942_v29, 16 }
 0x2f7   : > { %v2998_v25 = vshll.u32 %v5323_v44, 16  ;;  %v2996_v55 = vshrl.u32 %v5323_v44, 16  ;;  %v3003_v3 = vshll.u32 %v2941_v10, 16  ;;  %v3087_v12 = vrot.slane %v5323_v44, 1 }
 0x2f8   : > { %v2181_v62 = vor.u32 %v2180_v27, %v2176_v4  ;;  %v3088_v32 = vrot.slane %v2941_v10, 1  ;;  %v3017_v43 = vrot.slane %v3015_v57, 1 }
 0x2f9   : > { %2283 = vrot.lane.b32.xlu1 %v5172_v42, %s4087_s22  ;;  %v2121_v42 = vsel %vm4141_vm3, %v2043_v54, %v2091_v49  ;;  %v3000_v24 = vrot.slane %v2998_v25, 1  ;;  %v3005_v9 = vrot.slane %v3003_v3, 1 }
 0x2fa   : > { %2229 = vrot.lane.b32.xlu0 %v2174_v26, %s4088_s23  ;;  %v2183_v51 = vshll.u32 %v2121_v42, 16  ;;  %v2268_v1 = vrot.slane %v2121_v42, 1  ;;  %v3089_v58 = vsel %vm491_vm2, %v3087_v12, %v3088_v32 }
 0x2fb   : > { %v3001_v63 = vor.u32 %v3000_v24, %v2996_v55  ;;  %v1981_v24 = vld [vmem:[#allocation3 + $0x28] sm:$0xff] }
 0x2fc   : > { %v2185_v16 = vrot.slane %v2183_v51, 1  ;;  %v2269_v61 = vsel %vm491_vm2, %v2267_v17, %v2268_v1 }
 0x2fd   : > { %3103 = vrot.lane.b32.xlu1 %v5252_v31, %s4087_s22  ;;  %v2003_v31 = vshrl.u32 %v1980_v47, 16  ;;  %v5346_v59 = vsel %vm362_vm4, %v3001_v63, %v3005_v9  ;;  %v2006_v63 = vshrl.u32 %v1981_v24, 16  ;;  %v2801_v9 = vld [vmem:[#allocation3 + $0x68] sm:$0xff] }
 0x2fe   : > { %3049 = vrot.lane.b32.xlu0 %v2994_v13, %s4088_s23  ;;  %v5340_v8 = vsel %vm362_vm4, %v2181_v62, %v2185_v16  ;;  %v3091_v16 = vrot.slane %v2942_v29, 1  ;;  %v2826_v17 = vshrl.u32 %v2801_v9, 16  ;;  %v2872_v12 = vshll.u32 %v2801_v9, 16  ;;  %v2802_v9 = vld [vmem:[#allocation3 + $0x70] sm:$0xff] }
 0x2ff   : > { %v2047_v41 = vrot.slane %v2003_v31, 7 }
 0x300   : > { %v2871_v2 = vrot.slane %v2826_v17, 7 }
 0x301   : > { %2300 = vrot.lane.b32.xlu1 %v5242_v23, %s4086_s21  ;;  %v2050_v45 = vor.u32 %v2048_v6, %v2047_v41 }
 0x302   : > { %2285 = vrot.lane.b32.xlu0 %v2266_v7, %s4087_s22 }
 0x303   : > { %v5356_v0 = vsel %vm4141_vm3, %v2003_v31, %v2050_v45 }
 0x304   : > { %v2188_v39 = vshrl.u32 %v5356_v0, 16  ;;  %v2270_v50 = vrot.slane %v5356_v0, 1 }
 0x305   : > { %3120 = vrot.lane.b32.xlu1 %v5259_v14, %s4086_s21 }
 0x306   : > { %3105 = vrot.lane.b32.xlu0 %v3086_v35, %s4087_s22 }
 0x309   : > { %2328 = vrot.lane.b32.xlu1 %v2174_v26, %s4089_s24  ;;  %v2092_v26 = vrot.slane %v2048_v6, 7 }
 0x30a   : > { %2302 = vrot.lane.b32.xlu0 %v5313_v30, %s4086_s21 }
 0x30b   : > { %v2122_v5 = vsel %vm4141_vm3, %v2047_v41, %v2092_v26  ;;  %v2874_v26 = vor.u32 %v2872_v12, %v2871_v2 }
 0x30c   : > { %v2195_v46 = vshll.u32 %v2122_v5, 16  ;;  %v2271_v51 = vrot.slane %v2122_v5, 1 }
 0x30d   : > { %3148 = vrot.lane.b32.xlu1 %v2994_v13, %s4089_s24  ;;  %v2190_v13 = vshll.u32 %v5356_v0, 16 }
 0x30e   : > { %3122 = vrot.lane.b32.xlu0 %v5323_v44, %s4086_s21  ;;  %v2197_v54 = vrot.slane %v2195_v46, 1  ;;  %v5407_v10 = vsel %vm491_vm2, %v2270_v50, %v2271_v51  ;;  %v5462_v46 = vsel %vm4141_vm3, %v2826_v17, %v2874_v26  ;;  %v2829_v26 = vshrl.u32 %v2802_v9, 16 }
 0x311   : > { %2348 = vrot.lane.b32.xlu1 %v2266_v7, %s4090_s25  ;;  %v5367_v7 = vsel %vm4141_vm3, %v2823_v38, %v2870_v22  ;;  %v2052_v38 = vshll.u32 %v1981_v24, 16 }
 0x312   : > { %2330 = vrot.lane.b32.xlu0 %v5340_v8, %s4089_s24  ;;  %v3010_v53 = vshll.u32 %v5367_v7, 16  ;;  %v3008_v18 = vshrl.u32 %v5367_v7, 16  ;;  %v3090_v47 = vrot.slane %v5367_v7, 1 }
 0x313   : > { %v2093_v22 = vrot.slane %v2052_v38, 7 }
 0x314   : > { %v3012_v11 = vrot.slane %v3010_v53, 1  ;;  %v5419_v3 = vsel %vm491_vm2, %v3090_v47, %v3091_v16  ;;  %v3020_v16 = vshrl.u32 %v5462_v46, 16 }
 0x315   : > { %3168 = vrot.lane.b32.xlu1 %v3086_v35, %s4090_s25  ;;  %v2192_v35 = vrot.slane %v2190_v13, 1  ;;  %v2913_v13 = vrot.slane %v2872_v12, 7 }
 0x316   : > { %3150 = vrot.lane.b32.xlu0 %v5346_v59, %s4089_s24  ;;  %v3013_v42 = vor.u32 %v3012_v11, %v3008_v18  ;;  %v3022_v18 = vshll.u32 %v5462_v46, 16  ;;  %v1982_v11 = vld [vmem:[#allocation3 + $0x30] sm:$0xff] }
 0x317   : > { %v2193_v21 = vor.u32 %v2192_v35, %v2188_v39 }
 0x318   : > { %v5399_v27 = vsel %vm362_vm4, %v3013_v42, %v3017_v43  ;;  %v2009_v43 = vshrl.u32 %v1982_v11, 16  ;;  %v3024_v24 = vrot.slane %v3022_v18, 1  ;;  %v2875_v18 = vrot.slane %v2829_v26, 7 }
 0x319   : > { %2365 = vrot.lane.b32.xlu1 %v5313_v30, %s4091_s28  ;;  %v5390_v36 = vsel %vm362_vm4, %v2193_v21, %v2197_v54  ;;  %v2943_v21 = vsel %vm4141_vm3, %v2871_v2, %v2913_v13  ;;  %v2056_v2 = vshll.u32 %v1982_v11, 16  ;;  %v2876_v11 = vshll.u32 %v2802_v9, 16 }
 0x31a   : > { %2350 = vrot.lane.b32.xlu0 %v2269_v61, %s4090_s25  ;;  %v3027_v42 = vshll.u32 %v2943_v21, 16  ;;  %v3025_v17 = vor.u32 %v3024_v24, %v3020_v16 }
 0x31d   : > { %3185 = vrot.lane.b32.xlu1 %v5323_v44, %s4091_s28 }
 0x31e   : > { %3170 = vrot.lane.b32.xlu0 %v3089_v58, %s4090_s25 }
 0x321   : > { %2393 = vrot.lane.b32.xlu1 %v5340_v8, %s4092_s4 }
 0x322   : > { %2367 = vrot.lane.b32.xlu0 %v5356_v0, %s4091_s28 }
 0x325   : > { %3213 = vrot.lane.b32.xlu1 %v5346_v59, %s4092_s4 }
 0x326   : > { %3187 = vrot.lane.b32.xlu0 %v5367_v7, %s4091_s28 }
 0x327   : > { %v5385_v34 = vpop.permute.xlu0 %2281  ;;  %v5387_v49 = vpop.permute.xlu1 %2279 }
 0x329   : > { %2413 = vrot.lane.b32.xlu1 %v2269_v61, %s4093_s7 }
 0x32a   : > { %2395 = vrot.lane.b32.xlu0 %v5390_v36, %s4092_s4 }
 0x32b   : > { %v5396_v4 = vpop.permute.xlu1 %3099 }
 0x32c   : > { %v5401_v25 = vpop.permute.xlu0 %2223 }
 0x32d   : > { %3233 = vrot.lane.b32.xlu1 %v3089_v58, %s4093_s7 }
 0x32e   : > { %3215 = vrot.lane.b32.xlu0 %v5399_v27, %s4092_s4 }
 0x32f   : > { %v5410_v62 = vpop.permute.xlu1 %2296 }
 0x330   : > { %v5412_v55 = vpop.permute.xlu0 %3043 }
 0x331   : > { %2415 = vrot.lane.b32.xlu1 %v5407_v10, %s4093_s7 }
 0x332   : > { %2231 = vrot.lane.b32.xlu0 %v5340_v8, %s4088_s23  ;;  %v2051_v8 = vrot.slane %v2006_v63, 7 }
 0x333   : > { %v5421_v31 = vpop.permute.xlu1 %2225 }
 0x334   : > { %v5423_v33 = vpop.permute.xlu0 %3045  ;;  %v2054_v52 = vor.u32 %v2052_v38, %v2051_v8  ;;  %v2123_v39 = vsel %vm4141_vm3, %v2051_v8, %v2093_v22 }
 0x335   : > { %3235 = vrot.lane.b32.xlu1 %v5419_v3, %s4093_s7  ;;  %v2207_v54 = vshll.u32 %v2123_v39, 16  ;;  %v2274_v22 = vrot.slane %v2123_v39, 1 }
 0x336   : > { %3051 = vrot.lane.b32.xlu0 %v5346_v59, %s4088_s23 }
 0x337   : > { %v5429_v41 = vpop.permute.xlu1 %3116  ;;  %v2209_v47 = vrot.slane %v2207_v54, 1 }
 0x338   : > { %v5431_v6 = vpop.permute.xlu0 %3101 }
 0x339   : > { %2287 = vrot.lane.b32.xlu1 %v2269_v61, %s4087_s22  ;;  %v5449_v61 = vsel %vm4141_vm3, %v2006_v63, %v2054_v52  ;;  %v3029_v52 = vrot.slane %v3027_v42, 1  ;;  %v2094_v42 = vrot.slane %v2056_v2, 7 }
 0x33a   : > { %2233 = vrot.lane.b32.xlu0 %v5390_v36, %s4088_s23  ;;  %v2202_v5 = vshll.u32 %v5449_v61, 16  ;;  %v2200_v35 = vshrl.u32 %v5449_v61, 16 }
 0x33b   : > { %v5436_v1 = vpop.permute.xlu1 %2324 }
 0x33c   : > { %v5438_v45 = vpop.permute.xlu0 %2298  ;;  %v2204_v29 = vrot.slane %v2202_v5, 1  ;;  %v2426_v5 = vsel %vm662_vm6, %v5156_v56, %v5401_v25  ;;  %v3094_v25 = vrot.slane %v2943_v21, 1  ;;  %v2878_v21 = vor.u32 %v2876_v11, %v2875_v18 }
 0x33d   : > { %3107 = vrot.lane.b32.xlu1 %v3089_v58, %s4087_s22 }
 0x33e   : > { %3053 = vrot.lane.b32.xlu0 %v5399_v27, %s4088_s23  ;;  %v2205_v51 = vor.u32 %v2204_v29, %v2200_v35  ;;  %v5503_v35 = vsel %vm362_vm4, %v3025_v17, %v3029_v52 }
 0x33f   : > { %v5443_v59 = vpop.permute.xlu1 %3144 }
 0x340   : > { %v5445_v32 = vpop.permute.xlu0 %3118  ;;  %v5490_v38 = vsel %vm362_vm4, %v2205_v51, %v2209_v47  ;;  %v3246_v47 = vsel %vm662_vm6, %v5162_v48, %v5412_v55 }
 0x341   : > { %2304 = vrot.lane.b32.xlu1 %v5356_v0, %s4086_s21 }
 0x342   : > { %2289 = vrot.lane.b32.xlu0 %v5407_v10, %s4087_s22 }
 0x343   : > { %v5455_v58 = vpop.permute.xlu1 %2344 }
 0x344   : > { %v5458_v20 = vpop.permute.xlu0 %2326 }
 0x345   : > { %3124 = vrot.lane.b32.xlu1 %v5367_v7, %s4086_s21 }
 0x346   : > { %3109 = vrot.lane.b32.xlu0 %v5419_v3, %s4087_s22 }
 0x347   : > { %v5471_v53 = vpop.permute.xlu1 %3164 }
 0x348   : > { %v5476_v57 = vpop.permute.xlu0 %3146 }
 0x349   : > { %2332 = vrot.lane.b32.xlu1 %v5390_v36, %s4089_s24  ;;  %v2055_v36 = vrot.slane %v2009_v43, 7 }
 0x34a   : > { %2306 = vrot.lane.b32.xlu0 %v5449_v61, %s4086_s21 }
 0x34b   : > { %v2362_v50 = vpop.permute.xlu1 %2361  ;;  %v2058_v29 = vor.u32 %v2056_v2, %v2055_v36 }
 0x34c   : > { %v5483_v63 = vpop.permute.xlu0 %2346 }
 0x34d   : > { %3152 = vrot.lane.b32.xlu1 %v5399_v27, %s4089_s24  ;;  %v2273_v27 = vrot.slane %v5449_v61, 1 }
 0x34e   : > { %3126 = vrot.lane.b32.xlu0 %v5462_v46, %s4086_s21 }
 0x34f   : > { %v3182_v8 = vpop.permute.xlu1 %3181  ;;  %v5512_v39 = vsel %vm491_vm2, %v2273_v27, %v2274_v22 }
 0x350   : > { %v5492_v12 = vpop.permute.xlu0 %3166 }
 0x351   : > { %2352 = vrot.lane.b32.xlu1 %v5407_v10, %s4090_s25  ;;  %v2442_v10 = vsel %vm679_vm7, %v2426_v5, %v5387_v49  ;;  %v5522_v49 = vsel %vm4141_vm3, %v2009_v43, %v2058_v29  ;;  %v5537_v43 = vsel %vm4141_vm3, %v2055_v36, %v2094_v42  ;;  %v5554_v5 = vsel %vm4141_vm3, %v2829_v26, %v2878_v21 }
 0x352   : > { %2334 = vrot.lane.b32.xlu0 %v5490_v38, %s4089_s24  ;;  %v2458_v51 = vsel %vm696_vm8, %v2442_v10, %v5410_v62  ;;  %v3262_v62 = vsel %vm679_vm7, %v3246_v47, %v5396_v4  ;;  %v3248_v47 = vsel %vm662_vm6, %v5188_v37, %v5423_v33  ;;  %v3032_v37 = vshrl.u32 %v5554_v5, 16 }
 0x353   : > { %v2390_v13 = vpop.permute.xlu1 %2389  ;;  %v2474_v24 = vsel %vm713_vm9, %v2458_v51, %v5436_v1  ;;  %v2214_v1 = vshll.u32 %v5522_v49, 16  ;;  %v3278_v52 = vsel %vm696_vm8, %v3262_v62, %v5429_v41  ;;  %v2219_v41 = vshll.u32 %v5537_v43, 16 }
 0x354   : > { %v2364_v54 = vpop.permute.xlu0 %2363  ;;  %v2490_v17 = vsel %vm730_vm10, %v2474_v24, %v5455_v58  ;;  %v2428_v58 = vsel %vm662_vm6, %v5152_v40, %v5421_v31  ;;  %v2914_v40 = vrot.slane %v2876_v11, 7 }
 0x355   : > { %3172 = vrot.lane.b32.xlu1 %v5419_v3, %s4090_s25  ;;  %v3093_v3 = vrot.slane %v5462_v46, 1  ;;  %v2506_v55 = vsel %vm747_vm11, %v2490_v17, %v2362_v50  ;;  %v3294_v50 = vsel %vm713_vm9, %v3278_v52, %v5443_v59  ;;  %v2444_v59 = vsel %vm679_vm7, %v2428_v58, %v5385_v34 }
 0x356   : > { %3154 = vrot.lane.b32.xlu0 %v5503_v35, %s4089_s24  ;;  %v2522_v27 = vsel %vm764_vm12, %v2506_v55, %v2390_v13  ;;  %v3310_v31 = vsel %vm730_vm10, %v3294_v50, %v5471_v53  ;;  %v2212_v13 = vshrl.u32 %v5522_v49, 16  ;;  %v2216_v29 = vrot.slane %v2214_v1, 1 }
 0x357   : > { %v3210_v16 = vpop.permute.xlu1 %3209  ;;  %v5546_v4 = vsel %vm491_vm2, %v3093_v3, %v3094_v25  ;;  %v3326_v26 = vsel %vm747_vm11, %v3310_v31, %v3182_v8  ;;  %v2460_v53 = vsel %vm696_vm8, %v2444_v59, %v5438_v45  ;;  %v3034_v25 = vshll.u32 %v5554_v5, 16 }
 0x358   : > { %v3184_v9 = vpop.permute.xlu0 %3183  ;;  %v3342_v10 = vsel %vm764_vm12, %v3326_v26, %v3210_v16  ;;  %v2476_v42 = vsel %vm713_vm9, %v2460_v53, %v5458_v20  ;;  %v2944_v8 = vsel %vm4141_vm3, %v2875_v18, %v2914_v40  ;;  %v2221_v16 = vrot.slane %v2219_v41, 1 }
 0x359   : > { %2369 = vrot.lane.b32.xlu1 %v5449_v61, %s4091_s28  ;;  %v2492_v45 = vsel %vm730_vm10, %v2476_v42, %v5483_v63  ;;  %v3264_v20 = vsel %vm679_vm7, %v3248_v47, %v5431_v6  ;;  %v2217_v18 = vor.u32 %v2216_v29, %v2212_v13  ;;  %v3036_v21 = vrot.slane %v3034_v25, 1 }
 0x35a   : > { %2354 = vrot.lane.b32.xlu0 %v5512_v39, %s4090_s25  ;;  %v2508_v3 = vsel %vm747_vm11, %v2492_v45, %v2364_v54  ;;  %v3280_v33 = vsel %vm696_vm8, %v3264_v20, %v5445_v32  ;;  %v3039_v17 = vshll.u32 %v2944_v8, 16  ;;  %v2277_v50 = vrot.slane %v5537_v43, 1 }
 0x35b   : > { %v2410_v2 = vpop.permute.xlu1 %2409  ;;  %v3296_v62 = vsel %vm713_vm9, %v3280_v33, %v5476_v57  ;;  %v2222_v58 = vsel %vm362_vm4, %v2217_v18, %v2221_v16  ;;  %v3037_v52 = vor.u32 %v3036_v21, %v3032_v37  ;;  %v3096_v41 = vrot.slane %v5554_v5, 1 }
 0x35c   : > { %v2392_v36 = vpop.permute.xlu0 %2391  ;;  %v2538_v22 = vsel %vm781_vm13, %v2522_v27, %v2410_v2  ;;  %v3312_v55 = vsel %vm730_vm10, %v3296_v62, %v5492_v12  ;;  %v3041_v2 = vrot.slane %v3039_v17, 1  ;;  %v3097_v59 = vrot.slane %v2944_v8, 1 }
 0x35d   : > { %3189 = vrot.lane.b32.xlu1 %v5462_v46, %s4091_s28  ;;  %3978 = vmatprep.mubr.msk.bf16.mxu0 %vm813_vm14, %v2538_v22  ;;  %v2524_v24 = vsel %vm764_vm12, %v2508_v3, %v2392_v36  ;;  %v3328_v32 = vsel %vm747_vm11, %v3312_v55, %v3184_v9  ;;  %v2276_v9 = vrot.slane %v5522_v49, 1 }
 0x35e   : > { %3174 = vrot.lane.b32.xlu0 %v5546_v4, %s4090_s25  ;;  %v5621_v22 = vsel %vm362_vm4, %v3037_v52, %v3041_v2  ;;  %v5639_v13 = vsel %vm491_vm2, %v3096_v41, %v3097_v59 }
 0x35f   : > { %v3230_v11 = vpop.permute.xlu1 %3229  ;;  %v2278_v31 = vsel %vm491_vm2, %v2276_v9, %v2277_v50 }
 0x360   : > { %v3212_v34 = vpop.permute.xlu0 %3211  ;;  %v3358_v51 = vsel %vm781_vm13, %v3342_v10, %v3230_v11  ;;  %v2803_v11 = vld [vmem:[#allocation3 + $0x78] sm:$0xff] }
 0x361   : > { %2397 = vrot.lane.b32.xlu1 %v5490_v38, %s4092_s4  ;;  %4000 = vmatprep.mubr.msk.bf16.mxu1 %vm813_vm14, %v3358_v51  ;;  %v3344_v57 = vsel %vm764_vm12, %v3328_v32, %v3212_v34  ;;  %v2832_v42 = vshrl.u32 %v2803_v11, 16  ;;  %v2880_v8 = vshll.u32 %v2803_v11, 16 }
 0x362   : > { %2371 = vrot.lane.b32.xlu0 %v5522_v49, %s4091_s28 }
 0x363   : > { %v2412_v63 = vpop.permute.xlu1 %2411  ;;  %v2879_v51 = vrot.slane %v2832_v42, 7  ;;  %v2915_v3 = vrot.slane %v2880_v8, 7 }
 0x364   : > { %v2540_v6 = vsel %vm781_vm13, %v2524_v24, %v2412_v63  ;;  %v5597_v54 = vpop.permute.xlu0 %2227  ;;  %v1986_v63 = vld [vmem:[#allocation3 + $0x40] sm:$0xff] }
 0x365   : > { %3217 = vrot.lane.b32.xlu1 %v5503_v35, %s4092_s4  ;;  %3979 = vmatmul.mubr.msk.bf16.vlgmr.msra.gmra.mrb[16].mxu0 %vm813_vm14, %v2540_v6  ;;  %v2882_v45 = vor.u32 %v2880_v8, %v2879_v51  ;;  %v2945_v33 = vsel %vm4141_vm3, %v2879_v51, %v2915_v3  ;;  %v2015_v55 = vshrl.u32 %v1986_v63, 16  ;;  %v2064_v2 = vshll.u32 %v1986_v63, 16 }
 0x366   : > { %3191 = vrot.lane.b32.xlu0 %v5554_v5, %s4091_s28  ;;  %v3140_v62 = vshll.u32 %v2945_v33, 16  ;;  %v2430_v59 = vsel %vm662_vm6, %v5156_v56, %v5597_v54  ;;  %v3162_v8 = vrot.slane %v2945_v33, 1 }
 0x367   : > { %v3232_v1 = vpop.permute.xlu1 %3231  ;;  %v2935_v20 = vsel %vm4141_vm3, %v2832_v42, %v2882_v45  ;;  %v2096_v54 = vrot.slane %v2064_v2, 7 }
 0x368   : > { %v3360_v27 = vsel %vm781_vm13, %v3344_v57, %v3232_v1  ;;  %v5610_v12 = vpop.permute.xlu0 %3047  ;;  %v3135_v18 = vshll.u32 %v2935_v20, 16  ;;  %v3133_v21 = vshrl.u32 %v2935_v20, 16  ;;  %v3142_v57 = vrot.slane %v3140_v62, 1 }
 0x369   : > { %2417 = vrot.lane.b32.xlu1 %v5512_v39, %s4093_s7  ;;  %4001 = vmatmul.mubr.msk.bf16.vlgmr.msra.gmra.mrb[16].mxu1 %vm813_vm14, %v3360_v27  ;;  %v3161_v51 = vrot.slane %v2935_v20, 1 }
 0x36a   : > { %2399 = vrot.lane.b32.xlu0 %v2222_v58, %s4092_s4  ;;  %v3137_v17 = vrot.slane %v3135_v18, 1 }
 0x36b   : > { %v5618_v36 = vpop.permute.xlu1 %2283 }
 0x36c   : > { %v5623_v40 = vpop.permute.xlu0 %2229  ;;  %v3138_v1 = vor.u32 %v3137_v17, %v3133_v21  ;;  %v2446_v11 = vsel %vm679_vm7, %v2430_v59, %v5618_v36  ;;  %v3250_v36 = vsel %vm662_vm6, %v5214_v15, %v5610_v12  ;;  %v3163_v15 = vsel %vm491_vm2, %v3161_v51, %v3162_v8 }
 0x36d   : > { %3237 = vrot.lane.b32.xlu1 %v5546_v4, %s4093_s7  ;;  %v2432_v17 = vsel %vm662_vm6, %v5242_v23, %v5623_v40 }
 0x36e   : > { %3219 = vrot.lane.b32.xlu0 %v5621_v22, %s4092_s4  ;;  %v5689_v9 = vsel %vm362_vm4, %v3138_v1, %v3142_v57 }
 0x36f   : > { %v5631_v26 = vpop.permute.xlu1 %3103 }
 0x370   : > { %v5633_v43 = vpop.permute.xlu0 %3049 }
 0x371   : > { %2419 = vrot.lane.b32.xlu1 %v2278_v31, %s4093_s7 }
 0x372   : > { %2235 = vrot.lane.b32.xlu0 %v5490_v38, %s4088_s23 }
 0x373   : > { %v2301_v29 = vpop.permute.xlu1 %2300 }
 0x374   : > { %v5641_v53 = vpop.permute.xlu0 %2285 }
 0x375   : > { %3239 = vrot.lane.b32.xlu1 %v5639_v13, %s4093_s7  ;;  %v2448_v62 = vsel %vm679_vm7, %v2432_v17, %v5641_v53 }
 0x376   : > { %3055 = vrot.lane.b32.xlu0 %v5503_v35, %s4088_s23 }
 0x377   : > { %v5647_v10 = vpop.permute.xlu1 %3120 }
 0x378   : > { %v5649_v25 = vpop.permute.xlu0 %3105 }
 0x379   : > { %2291 = vrot.lane.b32.xlu1 %v5512_v39, %s4087_s22 }
 0x37a   : > { %2237 = vrot.lane.b32.xlu0 %v2222_v58, %s4088_s23 }
 0x37b   : > { %v2329_v38 = vpop.permute.xlu1 %2328 }
 0x37c   : > { %v5654_v34 = vpop.permute.xlu0 %2302 }
 0x37d   : > { %3111 = vrot.lane.b32.xlu1 %v5546_v4, %s4087_s22 }
 0x37e   : > { %3057 = vrot.lane.b32.xlu0 %v5621_v22, %s4088_s23 }
 0x37f   : > { %v3149_v35 = vpop.permute.xlu1 %3148 }
 0x380   : > { %v5660_v47 = vpop.permute.xlu0 %3122 }
 0x381   : > { %2308 = vrot.lane.b32.xlu1 %v5522_v49, %s4086_s21 }
 0x382   : > { %2293 = vrot.lane.b32.xlu0 %v2278_v31, %s4087_s22 }
 0x383   : > { %v2349_v39 = vpop.permute.xlu1 %2348 }
 0x384   : > { %v5665_v16 = vpop.permute.xlu0 %2330 }
 0x385   : > { %3128 = vrot.lane.b32.xlu1 %v5554_v5, %s4086_s21 }
 0x386   : > { %3113 = vrot.lane.b32.xlu0 %v5639_v13, %s4087_s22 }
 0x387   : > { %v3169_v4 = vpop.permute.xlu1 %3168 }
 0x388   : > { %v5673_v37 = vpop.permute.xlu0 %3150 }
 0x389   : > { %2336 = vrot.lane.b32.xlu1 %v2222_v58, %s4089_s24  ;;  %v2063_v58 = vrot.slane %v2015_v55, 7 }
 0x38a   : > { %2310 = vrot.lane.b32.xlu0 %v5162_v48, %s4086_s21 }
 0x38b   : > { %v2366_v24 = vpop.permute.xlu1 %2365  ;;  %v2066_v41 = vor.u32 %v2064_v2, %v2063_v58 }
 0x38c   : > { %v2351_v6 = vpop.permute.xlu0 %2350 }
 0x38d   : > { %3156 = vrot.lane.b32.xlu1 %v5621_v22, %s4089_s24  ;;  %v5704_v56 = vsel %vm4141_vm3, %v2015_v55, %v2066_v41  ;;  %v2464_v55 = vsel %vm696_vm8, %v2448_v62, %v5654_v34 }
 0x38e   : > { %3130 = vrot.lane.b32.xlu0 %v2935_v20, %s4086_s21  ;;  %v2380_v12 = vshll.u32 %v5704_v56, 16  ;;  %v2378_v19 = vshrl.u32 %v5704_v56, 16  ;;  %s5966_s21 = smov 0  }
 0x38f   : > { %v3186_v32 = vpop.permute.xlu1 %3185 }
 0x390   : > { %v5683_v52 = vpop.permute.xlu0 %3170 }
 0x391   : > { %2356 = vrot.lane.b32.xlu1 %v2278_v31, %s4090_s25  ;;  %v2462_v31 = vsel %vm696_vm8, %v2446_v11, %v2301_v29  ;;  %v3266_v29 = vsel %vm679_vm7, %v3250_v36, %v5631_v26 }
 0x392   : > { %2338 = vrot.lane.b32.xlu0 %v5200_v28, %s4089_s24  ;;  %v2478_v45 = vsel %vm713_vm9, %v2462_v31, %v2329_v38  ;;  %v3282_v33 = vsel %vm696_vm8, %v3266_v29, %v5647_v10 }
 0x393   : > { %v2394_v27 = vpop.permute.xlu1 %2393  ;;  %v2494_v18 = vsel %vm730_vm10, %v2478_v45, %v2349_v39 }
 0x394   : > { %v2368_v50 = vpop.permute.xlu0 %2367  ;;  %v2510_v38 = vsel %vm747_vm11, %v2494_v18, %v2366_v24  ;;  %v2126_v24 = vsel %vm4141_vm3, %v2063_v58, %v2096_v54 }
 0x395   : > { %3176 = vrot.lane.b32.xlu1 %v5639_v13, %s4090_s25  ;;  %v2526_v63 = vsel %vm764_vm12, %v2510_v38, %v2394_v27  ;;  %v2385_v1 = vshll.u32 %v2126_v24, 16  ;;  %v2407_v51 = vrot.slane %v2126_v24, 1 }
 0x396   : > { %3158 = vrot.lane.b32.xlu0 %v5689_v9, %s4089_s24 }
 0x397   : > { %v3214_v42 = vpop.permute.xlu1 %3213  ;;  %v2387_v27 = vrot.slane %v2385_v1, 1 }
 0x398   : > { %v3188_v3 = vpop.permute.xlu0 %3187 }
 0x399   : > { %2373 = vrot.lane.b32.xlu1 %v5162_v48, %s4091_s28  ;;  %v3298_v48 = vsel %vm713_vm9, %v3282_v33, %v3149_v35 }
 0x39a   : > { %2358 = vrot.lane.b32.xlu0 %v5180_v60, %s4090_s25  ;;  %v3314_v10 = vsel %vm730_vm10, %v3298_v48, %v3169_v4  ;;  %v2382_v4 = vrot.slane %v2380_v12, 1 }
 0x39b   : > { %v2414_v21 = vpop.permute.xlu1 %2413  ;;  %v3330_v35 = vsel %vm747_vm11, %v3314_v10, %v3186_v32  ;;  %v3252_v32 = vsel %vm662_vm6, %v5259_v14, %v5633_v43 }
 0x39c   : > { %v2542_v39 = vsel %vm781_vm13, %v2526_v63, %v2414_v21  ;;  %v2396_v26 = vpop.permute.xlu0 %2395  ;;  %v3346_v23 = vsel %vm764_vm12, %v3330_v35, %v3214_v42  ;;  %v3268_v34 = vsel %vm679_vm7, %v3252_v32, %v5649_v25 }
 0x39d   : > { %3193 = vrot.lane.b32.xlu1 %v2935_v20, %s4091_s28  ;;  %3982 = vmatprep.mubr.msk.bf16.mxu0 %vm813_vm14, %v2542_v39  ;;  %v2480_v20 = vsel %vm713_vm9, %v2464_v55, %v5665_v16  ;;  %v3284_v16 = vsel %vm696_vm8, %v3268_v34, %v5660_v47 }
 0x39e   : > { %3178 = vrot.lane.b32.xlu0 %v3163_v15, %s4090_s25  ;;  %v2496_v58 = vsel %vm730_vm10, %v2480_v20, %v2351_v6  ;;  %v2383_v6 = vor.u32 %v2382_v4, %v2378_v19 }
 0x39f   : > { %v3234_v40 = vpop.permute.xlu1 %3233  ;;  %v2512_v2 = vsel %vm747_vm11, %v2496_v58, %v2368_v50 }
 0x3a0   : > { %v3362_v57 = vsel %vm781_vm13, %v3346_v23, %v3234_v40  ;;  %v3216_v53 = vpop.permute.xlu0 %3215  ;;  %v2528_v14 = vsel %vm764_vm12, %v2512_v2, %v2396_v26 }
 0x3a1   : > { %2401 = vrot.lane.b32.xlu1 %v5200_v28, %s4092_s4  ;;  %4004 = vmatprep.mubr.msk.bf16.mxu1 %vm813_vm14, %v3362_v57  ;;  %v3300_v28 = vsel %vm713_vm9, %v3284_v16, %v5673_v37  ;;  %v2388_v37 = vsel %vm362_vm4, %v2383_v6, %v2387_v27 }
 0x3a2   : > { %2375 = vrot.lane.b32.xlu0 %v5704_v56, %s4091_s28  ;;  %v3316_v25 = vsel %vm730_vm10, %v3300_v28, %v5683_v52 }
 0x3a3   : > { %v2416_v43 = vpop.permute.xlu1 %2415  ;;  %v3332_v47 = vsel %vm747_vm11, %v3316_v25, %v3188_v3 }
 0x3a4   : > { %v2544_v41 = vsel %vm781_vm13, %v2528_v14, %v2416_v43  ;;  %v2232_v59 = vpop.permute.xlu0 %2231  ;;  %v3348_v50 = vsel %vm764_vm12, %v3332_v47, %v3216_v53 }
 0x3a5   : > { %3221 = vrot.lane.b32.xlu1 %v5689_v9, %s4092_s4  ;;  %3983 = vmatmul.mubr.msk.bf16.gmra.mrb[20].mxu0 %vm813_vm14, %v2544_v41  ;;  %v2406_v9 = vrot.slane %v5704_v56, 1  ;;  %v2434_v10 = vsel %vm662_vm6, %v5313_v30, %v2232_v59 }
 0x3a6   : > { %3195 = vrot.lane.b32.xlu0 %v5554_v5, %s4091_s28 }
 0x3a7   : > { %v3236_v11 = vpop.permute.xlu1 %3235  ;;  %v2408_v3 = vsel %vm491_vm2, %v2406_v9, %v2407_v51 }
 0x3a8   : > { %v3364_v31 = vsel %vm781_vm13, %v3348_v50, %v3236_v11  ;;  %v3052_v42 = vpop.permute.xlu0 %3051 }
 0x3a9   : > { %2421 = vrot.lane.b32.xlu1 %v5180_v60, %s4093_s7  ;;  %4005 = vmatmul.mubr.msk.bf16.gmra.mrb[20].mxu1 %vm813_vm14, %v3364_v31  ;;  %v3254_v40 = vsel %vm662_vm6, %v5323_v44, %v3052_v42 }
 0x3aa   : > { %2403 = vrot.lane.b32.xlu0 %v2388_v37, %s4092_s4 }
 0x3ab   : > { %v2288_v52 = vpop.permute.xlu1 %2287 }
 0x3ac   : > { %v2234_v8 = vpop.permute.xlu0 %2233  ;;  %v2450_v62 = vsel %vm679_vm7, %v2434_v10, %v2288_v52 }
 0x3ad   : > { %3241 = vrot.lane.b32.xlu1 %v3163_v15, %s4093_s7  ;;  %v2436_v2 = vsel %vm662_vm6, %v5356_v0, %v2234_v8 }
 0x3ae   : > { %3223 = vrot.lane.b32.xlu0 %v5621_v22, %s4092_s4 }
 0x3af   : > { %v3108_v45 = vpop.permute.xlu1 %3107 }
 0x3b0   : > { %v3054_v54 = vpop.permute.xlu0 %3053  ;;  %v3270_v1 = vsel %vm679_vm7, %v3254_v40, %v3108_v45 }
 0x3b1   : > { %3243 = vrot.lane.b32.xlu1 %v5639_v13, %s4093_s7  ;;  %v3256_v0 = vsel %vm662_vm6, %v5367_v7, %v3054_v54 }
 0x3b2   : > { %2423 = vrot.lane.b32.xlu0 %v2408_v3, %s4093_s7 }
 0x3b3   : > { %v2305_v60 = vpop.permute.xlu1 %2304 }
 0x3b4   : > { %v2290_v36 = vpop.permute.xlu0 %2289  ;;  %v2466_v35 = vsel %vm696_vm8, %v2450_v62, %v2305_v60 }
 0x3b5   : > { %v2452_v16 = vsel %vm679_vm7, %v2436_v2, %v2290_v36 }
 0x3b7   : > { %v3125_v18 = vpop.permute.xlu1 %3124 }
 0x3b8   : > { %v3110_v56 = vpop.permute.xlu0 %3109  ;;  %v3286_v57 = vsel %vm696_vm8, %v3270_v1, %v3125_v18 }
 0x3b9   : > { %v3272_v47 = vsel %vm679_vm7, %v3256_v0, %v3110_v56 }
 0x3bb   : > { %v2333_v29 = vpop.permute.xlu1 %2332 }
 0x3bc   : > { %v2307_v38 = vpop.permute.xlu0 %2306  ;;  %v2482_v55 = vsel %vm713_vm9, %v2466_v35, %v2333_v29 }
 0x3bd   : > { %v2468_v43 = vsel %vm696_vm8, %v2452_v16, %v2307_v38 }
 0x3bf   : > { %v3153_v33 = vpop.permute.xlu1 %3152 }
 0x3c0   : > { %v3127_v63 = vpop.permute.xlu0 %3126  ;;  %v3302_v32 = vsel %vm713_vm9, %v3286_v57, %v3153_v33 }
 0x3c1   : > { %v3288_v11 = vsel %vm696_vm8, %v3272_v47, %v3127_v63 }
 0x3c3   : > { %v2353_v21 = vpop.permute.xlu1 %2352 }
 0x3c4   : > { %v2335_v15 = vpop.permute.xlu0 %2334  ;;  %v2498_v4 = vsel %vm730_vm10, %v2482_v55, %v2353_v21 }
 0x3c5   : > { %v2484_v28 = vsel %vm713_vm9, %v2468_v43, %v2335_v15 }
 0x3c7   : > { %v3173_v22 = vpop.permute.xlu1 %3172 }
 0x3c8   : > { %v3155_v12 = vpop.permute.xlu0 %3154  ;;  %v3318_v44 = vsel %vm730_vm10, %v3302_v32, %v3173_v22 }
 0x3c9   : > { %v3304_v42 = vsel %vm713_vm9, %v3288_v11, %v3155_v12 }
 0x3cb   : > { %v2370_v48 = vpop.permute.xlu1 %2369 }
 0x3cc   : > { %v2355_v39 = vpop.permute.xlu0 %2354  ;;  %v2514_v20 = vsel %vm747_vm11, %v2498_v4, %v2370_v48 }
 0x3cd   : > { %v2500_v25 = vsel %vm730_vm10, %v2484_v28, %v2355_v39 }
 0x3cf   : > { %v3190_v26 = vpop.permute.xlu1 %3189 }
 0x3d0   : > { %v3175_v24 = vpop.permute.xlu0 %3174  ;;  %v3334_v14 = vsel %vm747_vm11, %v3318_v44, %v3190_v26 }
 0x3d1   : > { %v3320_v7 = vsel %vm730_vm10, %v3304_v42, %v3175_v24 }
 0x3d3   : > { %v2398_v17 = vpop.permute.xlu1 %2397 }
 0x3d4   : > { %v2372_v13 = vpop.permute.xlu0 %2371  ;;  %v2530_v30 = vsel %vm764_vm12, %v2514_v20, %v2398_v17 }
 0x3d5   : > { %v2516_v50 = vsel %vm747_vm11, %v2500_v25, %v2372_v13 }
 0x3d7   : > { %v3218_v19 = vpop.permute.xlu1 %3217 }
 0x3d8   : > { %v3192_v23 = vpop.permute.xlu0 %3191  ;;  %v3350_v6 = vsel %vm764_vm12, %v3334_v14, %v3218_v19 }
 0x3d9   : > { %v3336_v51 = vsel %vm747_vm11, %v3320_v7, %v3192_v23 }
 0x3db   : > { %v2418_v53 = vpop.permute.xlu1 %2417 }
 0x3dc   : > { %v2546_v58 = vsel %vm781_vm13, %v2530_v30, %v2418_v53  ;;  %v2400_v34 = vpop.permute.xlu0 %2399 }
 0x3dd   : > { %3986 = vmatprep.mubr.msk.bf16.mxu0 %vm813_vm14, %v2546_v58  ;;  %v2532_v37 = vsel %vm764_vm12, %v2516_v50, %v2400_v34 }
 0x3df   : > { %v3238_v27 = vpop.permute.xlu1 %3237 }
 0x3e0   : > { %v3366_v41 = vsel %vm781_vm13, %v3350_v6, %v3238_v27  ;;  %v3220_v59 = vpop.permute.xlu0 %3219 }
 0x3e1   : > { %4008 = vmatprep.mubr.msk.bf16.mxu1 %vm813_vm14, %v3366_v41  ;;  %v3352_v8 = vsel %vm764_vm12, %v3336_v51, %v3220_v59 }
 0x3e3   : > { %v2420_v31 = vpop.permute.xlu1 %2419 }
 0x3e4   : > { %v2548_v52 = vsel %vm781_vm13, %v2532_v37, %v2420_v31  ;;  %v2236_v9 = vpop.permute.xlu0 %2235 }
 0x3e5   : > { %3987 = vmatmul.mubr.msk.bf16.gmra.mrb[24].mxu0 %vm813_vm14, %v2548_v52  ;;  %v2438_v55 = vsel %vm662_vm6, %v5449_v61, %v2236_v9 }
 0x3e7   : > { %v3240_v45 = vpop.permute.xlu1 %3239 }
 0x3e8   : > { %v3368_v3 = vsel %vm781_vm13, %v3352_v8, %v3240_v45  ;;  %v3056_v54 = vpop.permute.xlu0 %3055 }
 0x3e9   : > { %4009 = vmatmul.mubr.msk.bf16.gmra.mrb[24].mxu1 %vm813_vm14, %v3368_v3  ;;  %v3258_v57 = vsel %vm662_vm6, %v5462_v46, %v3056_v54 }
 0x3eb   : > { %v2292_v60 = vpop.permute.xlu1 %2291 }
 0x3ec   : > { %v2238_v36 = vpop.permute.xlu0 %2237  ;;  %v2454_v23 = vsel %vm679_vm7, %v2438_v55, %v2292_v60 }
 0x3ed   : > { %v2440_v43 = vsel %vm662_vm6, %v5522_v49, %v2238_v36 }
 0x3ef   : > { %v3112_v18 = vpop.permute.xlu1 %3111 }
 0x3f0   : > { %v3058_v56 = vpop.permute.xlu0 %3057  ;;  %v3274_v53 = vsel %vm679_vm7, %v3258_v57, %v3112_v18 }
 0x3f1   : > { %v3260_v14 = vsel %vm662_vm6, %v5554_v5, %v3058_v56 }
 0x3f3   : > { %v2309_v29 = vpop.permute.xlu1 %2308 }
 0x3f4   : > { %v2294_v38 = vpop.permute.xlu0 %2293  ;;  %v2470_v40 = vsel %vm696_vm8, %v2454_v23, %v2309_v29 }
 0x3f5   : > { %v2456_v28 = vsel %vm679_vm7, %v2440_v43, %v2294_v38 }
 0x3f7   : > { %v3129_v33 = vpop.permute.xlu1 %3128 }
 0x3f8   : > { %v3114_v63 = vpop.permute.xlu0 %3113  ;;  %v3290_v58 = vsel %vm696_vm8, %v3274_v53, %v3129_v33 }
 0x3f9   : > { %v3276_v6 = vsel %vm679_vm7, %v3260_v14, %v3114_v63 }
 0x3fb   : > { %v2337_v21 = vpop.permute.xlu1 %2336 }
 0x3fc   : > { %v2311_v15 = vpop.permute.xlu0 %2310  ;;  %v2486_v1 = vsel %vm713_vm9, %v2470_v40, %v2337_v21 }
 0x3fd   : > { %v2472_v5 = vsel %vm696_vm8, %v2456_v28, %v2311_v15 }
 0x3ff   : > { %v3157_v22 = vpop.permute.xlu1 %3156 }
 0x400   : > { %v3131_v12 = vpop.permute.xlu0 %3130  ;;  %v3306_v2 = vsel %vm713_vm9, %v3290_v58, %v3157_v22 }
 0x401   : > { %v3292_v41 = vsel %vm696_vm8, %v3276_v6, %v3131_v12 }
 0x403   : > { %v2357_v48 = vpop.permute.xlu1 %2356 }
 0x404   : > { %v2339_v39 = vpop.permute.xlu0 %2338  ;;  %v2502_v30 = vsel %vm730_vm10, %v2486_v1, %v2357_v48 }
 0x405   : > { %v2488_v49 = vsel %vm713_vm9, %v2472_v5, %v2339_v39 }
 0x407   : > { %v3177_v26 = vpop.permute.xlu1 %3176 }
 0x408   : > { %v3159_v24 = vpop.permute.xlu0 %3158  ;;  %v3322_v46 = vsel %vm730_vm10, %v3306_v2, %v3177_v26 }
 0x409   : > { %v3308_v25 = vsel %vm713_vm9, %v3292_v41, %v3159_v24 }
 0x40b   : > { %v2374_v17 = vpop.permute.xlu1 %2373 }
 0x40c   : > { %v2359_v13 = vpop.permute.xlu0 %2358  ;;  %v2518_v32 = vsel %vm747_vm11, %v2502_v30, %v2374_v17 }
 0x40d   : > { %v2504_v37 = vsel %vm730_vm10, %v2488_v49, %v2359_v13 }
 0x40f   : > { %v3194_v10 = vpop.permute.xlu1 %3193 }
 0x410   : > { %v3179_v62 = vpop.permute.xlu0 %3178  ;;  %v3338_v27 = vsel %vm747_vm11, %v3322_v46, %v3194_v10 }
 0x411   : > { %v3324_v11 = vsel %vm730_vm10, %v3308_v25, %v3179_v62 }
 0x413   : > { %v2402_v35 = vpop.permute.xlu1 %2401 }
 0x414   : > { %v2376_v19 = vpop.permute.xlu0 %2375  ;;  %v2534_v61 = vsel %vm764_vm12, %v2518_v32, %v2402_v35 }
 0x415   : > { %v2520_v42 = vsel %vm747_vm11, %v2504_v37, %v2376_v19 }
 0x417   : > { %v3222_v4 = vpop.permute.xlu1 %3221 }
 0x418   : > { %v3196_v20 = vpop.permute.xlu0 %3195  ;;  %v3354_v59 = vsel %vm764_vm12, %v3338_v27, %v3222_v4 }
 0x419   : > { %v3340_v31 = vsel %vm747_vm11, %v3324_v11, %v3196_v20 }
 0x41b   : > { %v2422_v34 = vpop.permute.xlu1 %2421 }
 0x41c   : > { %v2550_v44 = vsel %vm781_vm13, %v2534_v61, %v2422_v34  ;;  %v2404_v16 = vpop.permute.xlu0 %2403 }
 0x41d   : > { %3990 = vmatprep.mubr.msk.bf16.mxu0 %vm813_vm14, %v2550_v44  ;;  %v2536_v7 = vsel %vm764_vm12, %v2520_v42, %v2404_v16 }
 0x41f   : > { %v3242_v0 = vpop.permute.xlu1 %3241 }
 0x420   : > { %v3370_v47 = vsel %vm781_vm13, %v3354_v59, %v3242_v0  ;;  %v3224_v50 = vpop.permute.xlu0 %3223 }
 0x421   : > { %4012 = vmatprep.mubr.msk.bf16.mxu1 %vm813_vm14, %v3370_v47  ;;  %v3356_v52 = vsel %vm764_vm12, %v3340_v31, %v3224_v50 }
 0x423   : > { %v3244_v9 = vpop.permute.xlu1 %3243 }
 0x424   : > { %v3372_v51 = vsel %vm781_vm13, %v3356_v52, %v3244_v9  ;;  %v2424_v8 = vpop.permute.xlu0 %2423 }
 0x425   : > { %v2552_v45 = vsel %vm781_vm13, %v2536_v7, %v2424_v8  ;;  %4013 = vmatmul.mubr.msk.bf16.gmra.mrb[28].mxu1 %vm813_vm14, %v3372_v51 }
 0x426   : > { %3991 = vmatmul.mubr.msk.bf16.gmra.mrb[28].mxu0 %vm813_vm14, %v2552_v45 }
 0x438   : > { %v3980_v3 = vpop.f32.mrb[16].mxu0 }
 0x439   : > { %2686 = vst.msk [vmem:[#allocation2 + $0x10] sm:$0xff] %vm662_vm6, %v3980_v3  ;;  %v2621_v54 = vpop.f32.mrb[17].mxu0  ;;  %v2740_v18 = vmul.f32 %v3980_v3, %v3980_v3  ;;  %v2703_v12 = vsel %vm662_vm6, %v3980_v3, 0.0 }
 0x43a   : > { %2684 = vst.msk [vmem:[#allocation2] sm:$0xff] %vm662_vm6, %v2621_v54  ;;  %v2738_v60 = vmul.f32 %v2621_v54, %v2621_v54  ;;  %v3981_v36 = vpop.f32.mrb[18].mxu0  ;;  %v2700_v29 = vsel %vm662_vm6, %v2621_v54, 0.0 }
 0x43b   : > { %2687 = vst.msk [vmem:[#allocation2 + $0x18] sm:$0xff] %vm662_vm6, %v3981_v36  ;;  %v2624_v56 = vpop.f32.mrb[19].mxu0  ;;  %v2741_v21 = vmul.f32 %v3981_v36, %v3981_v36  ;;  %v2757_v17 = vsel %vm662_vm6, %v2740_v18, 0.0  ;;  %v2705_v13 = vsel %vm662_vm6, %v3981_v36, 0.0 }
 0x43c   : > { %2685 = vst.msk [vmem:[#allocation2 + $0x8] sm:$0xff] %vm662_vm6, %v2624_v56  ;;  %v2701_v38 = vsel %vm662_vm6, %v2624_v56, 0.0  ;;  %v2739_v33 = vmul.f32 %v2624_v56, %v2624_v56  ;;  %v4002_v63 = vpop.f32.mrb[16].mxu1  ;;  %v2754_v48 = vsel %vm662_vm6, %v2738_v60, 0.0 }
 0x43d   : > { %v2702_v15 = vadd.f32 %v2701_v38, %v2700_v29  ;;  %3488 = vst.msk [vmem:[#allocation2 + $0x90] sm:$0xff] %vm662_vm6, %v4002_v63  ;;  %v3423_v22 = vpop.f32.mrb[17].mxu1  ;;  %v3542_v19 = vmul.f32 %v4002_v63, %v4002_v63  ;;  %v2759_v4 = vsel %vm662_vm6, %v2741_v21, 0.0  ;;  %v3505_v30 = vsel %vm662_vm6, %v4002_v63, 0.0 }
 0x43e   : > { %v2755_v39 = vsel %vm662_vm6, %v2739_v33, 0.0  ;;  %3486 = vst.msk [vmem:[#allocation2 + $0x80] sm:$0xff] %vm662_vm6, %v3423_v22  ;;  %v3540_v26 = vmul.f32 %v3423_v22, %v3423_v22  ;;  %v4003_v24 = vpop.f32.mrb[18].mxu1  ;;  %v3502_v55 = vsel %vm662_vm6, %v3423_v22, 0.0 }
 0x43f   : > { %v2704_v10 = vadd.f32 %v2703_v12, %v2702_v15  ;;  %v2756_v62 = vadd.f32 %v2755_v39, %v2754_v48  ;;  %3489 = vst.msk [vmem:[#allocation2 + $0x98] sm:$0xff] %vm662_vm6, %v4003_v24  ;;  %v3426_v35 = vpop.f32.mrb[19].mxu1  ;;  %v3543_v32 = vmul.f32 %v4003_v24, %v4003_v24  ;;  %v3559_v44 = vsel %vm662_vm6, %v3542_v19, 0.0 }
 0x440   : > { %3487 = vst.msk [vmem:[#allocation2 + $0x88] sm:$0xff] %vm662_vm6, %v3426_v35  ;;  %v3503_v23 = vsel %vm662_vm6, %v3426_v35, 0.0  ;;  %v3541_v40 = vmul.f32 %v3426_v35, %v3426_v35  ;;  %v3556_v53 = vsel %vm662_vm6, %v3540_v26, 0.0  ;;  %v3507_v16 = vsel %vm662_vm6, %v4003_v24, 0.0 }
 0x441   : > { %v2758_v1 = vadd.f32 %v2757_v17, %v2756_v62  ;;  %v3504_v20 = vadd.f32 %v3503_v23, %v3502_v55  ;;  %v2706_v57 = vadd.f32 %v2705_v13, %v2704_v10  ;;  %v3561_v43 = vsel %vm662_vm6, %v3543_v32, 0.0 }
 0x442   : > { %v3557_v58 = vsel %vm662_vm6, %v3541_v40, 0.0 }
 0x443   : > { %v3506_v61 = vadd.f32 %v3505_v30, %v3504_v20  ;;  %v3558_v34 = vadd.f32 %v3557_v58, %v3556_v53  ;;  %v2760_v2 = vadd.f32 %v2759_v4, %v2758_v1 }
 0x445   : > { %v3560_v14 = vadd.f32 %v3559_v44, %v3558_v34  ;;  %v3508_v46 = vadd.f32 %v3507_v16, %v3506_v61 }
 0x447   : > { %v3562_v6 = vadd.f32 %v3561_v43, %v3560_v14 }
 0x478   : > { %v3984_v27 = vpop.f32.mrb[20].mxu0 }
 0x479   : > { %2690 = vst.msk [vmem:[#allocation2 + $0x30] sm:$0xff] %vm662_vm6, %v3984_v27  ;;  %v2637_v28 = vpop.f32.mrb[21].mxu0  ;;  %v2744_v5 = vmul.f32 %v3984_v27, %v3984_v27  ;;  %v2711_v31 = vsel %vm662_vm6, %v3984_v27, 0.0 }
 0x47a   : > { %2688 = vst.msk [vmem:[#allocation2 + $0x20] sm:$0xff] %vm662_vm6, %v2637_v28  ;;  %v2707_v41 = vsel %vm662_vm6, %v2637_v28, 0.0  ;;  %v2742_v59 = vmul.f32 %v2637_v28, %v2637_v28  ;;  %v3985_v0 = vpop.f32.mrb[22].mxu0 }
 0x47b   : > { %v2708_v25 = vadd.f32 %v2707_v41, %v2706_v57  ;;  %2691 = vst.msk [vmem:[#allocation2 + $0x38] sm:$0xff] %vm662_vm6, %v3985_v0  ;;  %v2640_v47 = vpop.f32.mrb[23].mxu0  ;;  %v2745_v7 = vmul.f32 %v3985_v0, %v3985_v0  ;;  %v2765_v54 = vsel %vm662_vm6, %v2744_v5, 0.0  ;;  %v2713_v29 = vsel %vm662_vm6, %v3985_v0, 0.0 }
 0x47c   : > { %v2761_v50 = vsel %vm662_vm6, %v2742_v59, 0.0  ;;  %2689 = vst.msk [vmem:[#allocation2 + $0x28] sm:$0xff] %vm662_vm6, %v2640_v47  ;;  %v2709_v49 = vsel %vm662_vm6, %v2640_v47, 0.0  ;;  %v2743_v11 = vmul.f32 %v2640_v47, %v2640_v47  ;;  %v4006_v37 = vpop.f32.mrb[20].mxu1 }
 0x47d   : > { %v2762_v42 = vadd.f32 %v2761_v50, %v2760_v2  ;;  %v2710_v52 = vadd.f32 %v2709_v49, %v2708_v25  ;;  %3492 = vst.msk [vmem:[#allocation2 + $0xb0] sm:$0xff] %vm662_vm6, %v4006_v37  ;;  %v3439_v9 = vpop.f32.mrb[21].mxu1  ;;  %v3546_v38 = vmul.f32 %v4006_v37, %v4006_v37  ;;  %v2767_v48 = vsel %vm662_vm6, %v2745_v7, 0.0 }
 0x47e   : > { %v2763_v51 = vsel %vm662_vm6, %v2743_v11, 0.0  ;;  %3490 = vst.msk [vmem:[#allocation2 + $0xa0] sm:$0xff] %vm662_vm6, %v3439_v9  ;;  %v3509_v8 = vsel %vm662_vm6, %v3439_v9, 0.0  ;;  %v3544_v45 = vmul.f32 %v3439_v9, %v3439_v9  ;;  %v4007_v3 = vpop.f32.mrb[22].mxu1  ;;  %v3513_v39 = vsel %vm662_vm6, %v4006_v37, 0.0 }
 0x47f   : > { %v2712_v60 = vadd.f32 %v2711_v31, %v2710_v52  ;;  %v2764_v36 = vadd.f32 %v2763_v51, %v2762_v42  ;;  %v3510_v18 = vadd.f32 %v3509_v8, %v3508_v46  ;;  %3493 = vst.msk [vmem:[#allocation2 + $0xb8] sm:$0xff] %vm662_vm6, %v4007_v3  ;;  %v3442_v56 = vpop.f32.mrb[23].mxu1  ;;  %v3547_v24 = vmul.f32 %v4007_v3, %v4007_v3 }
 0x480   : > { %v3563_v33 = vsel %vm662_vm6, %v3544_v45, 0.0  ;;  %3491 = vst.msk [vmem:[#allocation2 + $0xa8] sm:$0xff] %vm662_vm6, %v3442_v56  ;;  %v3511_v63 = vsel %vm662_vm6, %v3442_v56, 0.0  ;;  %v3545_v12 = vmul.f32 %v3442_v56, %v3442_v56  ;;  %v3515_v62 = vsel %vm662_vm6, %v4007_v3, 0.0 }
 0x481   : > { %v2766_v21 = vadd.f32 %v2765_v54, %v2764_v36  ;;  %v3564_v15 = vadd.f32 %v3563_v33, %v3562_v6  ;;  %v3512_v22 = vadd.f32 %v3511_v63, %v3510_v18  ;;  %v2714_v26 = vadd.f32 %v2713_v29, %v2712_v60 }
 0x482   : > { %v3565_v13 = vsel %vm662_vm6, %v3545_v12, 0.0  ;;  %v3567_v19 = vsel %vm662_vm6, %v3546_v38, 0.0  ;;  %v3569_v40 = vsel %vm662_vm6, %v3547_v24, 0.0 }
 0x483   : > { %v3514_v17 = vadd.f32 %v3513_v39, %v3512_v22  ;;  %v2768_v10 = vadd.f32 %v2767_v48, %v2766_v21  ;;  %v3566_v35 = vadd.f32 %v3565_v13, %v3564_v15 }
 0x485   : > { %v3516_v55 = vadd.f32 %v3515_v62, %v3514_v17  ;;  %v3568_v23 = vadd.f32 %v3567_v19, %v3566_v35 }
 0x487   : > { %v3570_v4 = vadd.f32 %v3569_v40, %v3568_v23 }
 0x4b8   : > { %v3988_v1 = vpop.f32.mrb[24].mxu0 }
 0x4b9   : > { %2694 = vst.msk [vmem:[#allocation2 + $0x50] sm:$0xff] %vm662_vm6, %v3988_v1  ;;  %v2653_v20 = vpop.f32.mrb[25].mxu0  ;;  %v2748_v32 = vmul.f32 %v3988_v1, %v3988_v1  ;;  %v2719_v14 = vsel %vm662_vm6, %v3988_v1, 0.0 }
 0x4ba   : > { %2692 = vst.msk [vmem:[#allocation2 + $0x40] sm:$0xff] %vm662_vm6, %v2653_v20  ;;  %v2715_v57 = vsel %vm662_vm6, %v2653_v20, 0.0  ;;  %v2746_v30 = vmul.f32 %v2653_v20, %v2653_v20  ;;  %v3989_v53 = vpop.f32.mrb[26].mxu0 }
 0x4bb   : > { %v2716_v58 = vadd.f32 %v2715_v57, %v2714_v26  ;;  %2695 = vst.msk [vmem:[#allocation2 + $0x58] sm:$0xff] %vm662_vm6, %v3989_v53  ;;  %v2656_v61 = vpop.f32.mrb[27].mxu0  ;;  %v2749_v27 = vmul.f32 %v3989_v53, %v3989_v53  ;;  %v2773_v5 = vsel %vm662_vm6, %v2748_v32, 0.0  ;;  %v2721_v11 = vsel %vm662_vm6, %v3989_v53, 0.0 }
 0x4bc   : > { %v2769_v34 = vsel %vm662_vm6, %v2746_v30, 0.0  ;;  %2693 = vst.msk [vmem:[#allocation2 + $0x48] sm:$0xff] %vm662_vm6, %v2656_v61  ;;  %v2717_v2 = vsel %vm662_vm6, %v2656_v61, 0.0  ;;  %v2747_v44 = vmul.f32 %v2656_v61, %v2656_v61  ;;  %v4010_v16 = vpop.f32.mrb[24].mxu1 }
 0x4bd   : > { %v2770_v46 = vadd.f32 %v2769_v34, %v2768_v10  ;;  %v2718_v43 = vadd.f32 %v2717_v2, %v2716_v58  ;;  %3496 = vst.msk [vmem:[#allocation2 + $0xd0] sm:$0xff] %vm662_vm6, %v4010_v16  ;;  %v3455_v6 = vpop.f32.mrb[25].mxu1  ;;  %v3550_v37 = vmul.f32 %v4010_v16, %v4010_v16  ;;  %v2775_v8 = vsel %vm662_vm6, %v2749_v27, 0.0 }
 0x4be   : > { %v2771_v28 = vsel %vm662_vm6, %v2747_v44, 0.0  ;;  %3494 = vst.msk [vmem:[#allocation2 + $0xc0] sm:$0xff] %vm662_vm6, %v3455_v6  ;;  %v3517_v41 = vsel %vm662_vm6, %v3455_v6, 0.0  ;;  %v3548_v59 = vmul.f32 %v3455_v6, %v3455_v6  ;;  %v4011_v0 = vpop.f32.mrb[26].mxu1  ;;  %v3521_v45 = vsel %vm662_vm6, %v4010_v16, 0.0 }
 0x4bf   : > { %v2720_v25 = vadd.f32 %v2719_v14, %v2718_v43  ;;  %v2772_v47 = vadd.f32 %v2771_v28, %v2770_v46  ;;  %v3518_v50 = vadd.f32 %v3517_v41, %v3516_v55  ;;  %3497 = vst.msk [vmem:[#allocation2 + $0xd8] sm:$0xff] %vm662_vm6, %v4011_v0  ;;  %v3458_v49 = vpop.f32.mrb[27].mxu1  ;;  %v3551_v54 = vmul.f32 %v4011_v0, %v4011_v0 }
 0x4c0   : > { %v3571_v31 = vsel %vm662_vm6, %v3548_v59, 0.0  ;;  %3495 = vst.msk [vmem:[#allocation2 + $0xc8] sm:$0xff] %vm662_vm6, %v3458_v49  ;;  %v3519_v42 = vsel %vm662_vm6, %v3458_v49, 0.0  ;;  %v3549_v51 = vmul.f32 %v3458_v49, %v3458_v49  ;;  %v3523_v56 = vsel %vm662_vm6, %v4011_v0, 0.0 }
 0x4c1   : > { %v2774_v52 = vadd.f32 %v2773_v5, %v2772_v47  ;;  %v3572_v9 = vadd.f32 %v3571_v31, %v3570_v4  ;;  %v3520_v7 = vadd.f32 %v3519_v42, %v3518_v50  ;;  %v2722_v3 = vadd.f32 %v2721_v11, %v2720_v25 }
 0x4c2   : > { %v3573_v36 = vsel %vm662_vm6, %v3549_v51, 0.0  ;;  %v3575_v38 = vsel %vm662_vm6, %v3550_v37, 0.0  ;;  %v3577_v21 = vsel %vm662_vm6, %v3551_v54, 0.0 }
 0x4c3   : > { %v3522_v60 = vadd.f32 %v3521_v45, %v3520_v7  ;;  %v2776_v18 = vadd.f32 %v2775_v8, %v2774_v52  ;;  %v3574_v29 = vadd.f32 %v3573_v36, %v3572_v9 }
 0x4c5   : > { %v3524_v33 = vadd.f32 %v3523_v56, %v3522_v60  ;;  %v3576_v63 = vadd.f32 %v3575_v38, %v3574_v29 }
 0x4c7   : > { %v3578_v15 = vadd.f32 %v3577_v21, %v3576_v63 }
 0x4f8   : > { %v4014_v22 = vpop.f32.mrb[28].mxu1 }
 0x4f9   : > { %v3992_v12 = vpop.f32.mrb[28].mxu0  ;;  %3500 = vst.msk [vmem:[#allocation2 + $0xf0] sm:$0xff] %vm662_vm6, %v4014_v22  ;;  %v3471_v48 = vpop.f32.mrb[29].mxu1  ;;  %v3529_v4 = vsel %vm662_vm6, %v4014_v22, 0.0  ;;  %v3554_v58 = vmul.f32 %v4014_v22, %v4014_v22 }
 0x4fa   : > { %2698 = vst.msk [vmem:[#allocation2 + $0x70] sm:$0xff] %vm662_vm6, %v3992_v12  ;;  %v2669_v39 = vpop.f32.mrb[29].mxu0  ;;  %3498 = vst.msk [vmem:[#allocation2 + $0xe0] sm:$0xff] %vm662_vm6, %v3471_v48  ;;  %v3525_v26 = vsel %vm662_vm6, %v3471_v48, 0.0  ;;  %v3552_v24 = vmul.f32 %v3471_v48, %v3471_v48  ;;  %v4015_v17 = vpop.f32.mrb[30].mxu1  ;;  %v2752_v57 = vmul.f32 %v3992_v12, %v3992_v12  ;;  %v2727_v44 = vsel %vm662_vm6, %v3992_v12, 0.0 }
 0x4fb   : > { %2696 = vst.msk [vmem:[#allocation2 + $0x60] sm:$0xff] %vm662_vm6, %v2669_v39  ;;  %v2723_v13 = vsel %vm662_vm6, %v2669_v39, 0.0  ;;  %v2750_v10 = vmul.f32 %v2669_v39, %v2669_v39  ;;  %v3526_v62 = vadd.f32 %v3525_v26, %v3524_v33  ;;  %v3993_v35 = vpop.f32.mrb[30].mxu0  ;;  %3501 = vst.msk [vmem:[#allocation2 + $0xf8] sm:$0xff] %vm662_vm6, %v4015_v17  ;;  %v3474_v19 = vpop.f32.mrb[31].mxu1  ;;  %v3555_v43 = vmul.f32 %v4015_v17, %v4015_v17 }
 0x4fc   : > { %v2724_v55 = vadd.f32 %v2723_v13, %v2722_v3  ;;  %v3579_v23 = vsel %vm662_vm6, %v3552_v24, 0.0  ;;  %2699 = vst.msk [vmem:[#allocation2 + $0x78] sm:$0xff] %vm662_vm6, %v3993_v35  ;;  %v2672_v40 = vpop.f32.mrb[31].mxu0  ;;  %3499 = vst.msk [vmem:[#allocation2 + $0xe8] sm:$0xff] %vm662_vm6, %v3474_v19  ;;  %v3527_v34 = vsel %vm662_vm6, %v3474_v19, 0.0  ;;  %v3553_v2 = vmul.f32 %v3474_v19, %v3474_v19 }
 0x4fd   : > { %v2777_v1 = vsel %vm662_vm6, %v2750_v10, 0.0  ;;  %v3580_v20 = vadd.f32 %v3579_v23, %v3578_v15  ;;  %2697 = vst.msk [vmem:[#allocation2 + $0x68] sm:$0xff] %vm662_vm6, %v2672_v40  ;;  %v2725_v53 = vsel %vm662_vm6, %v2672_v40, 0.0  ;;  %v2751_v32 = vmul.f32 %v2672_v40, %v2672_v40 }
 0x4fe   : > { %v2778_v30 = vadd.f32 %v2777_v1, %v2776_v18  ;;  %v2726_v61 = vadd.f32 %v2725_v53, %v2724_v55  ;;  %v2753_v16 = vmul.f32 %v3993_v35, %v3993_v35  ;;  %v3528_v46 = vadd.f32 %v3527_v34, %v3526_v62 }
 0x4ff   : > { %v2779_v14 = vsel %vm662_vm6, %v2751_v32, 0.0  ;;  %v3581_v28 = vsel %vm662_vm6, %v3553_v2, 0.0  ;;  %v2781_v41 = vsel %vm662_vm6, %v2752_v57, 0.0  ;;  %v2729_v59 = vsel %vm662_vm6, %v3993_v35, 0.0 }
 0x500   : > { %v2728_v6 = vadd.f32 %v2727_v44, %v2726_v61  ;;  %v2780_v27 = vadd.f32 %v2779_v14, %v2778_v30  ;;  %v3530_v0 = vadd.f32 %v3529_v4, %v3528_v46  ;;  %v3582_v5 = vadd.f32 %v3581_v28, %v3580_v20 }
 0x501   : > { %v3583_v25 = vsel %vm662_vm6, %v3554_v58, 0.0  ;;  %v3531_v47 = vsel %vm662_vm6, %v4015_v17, 0.0  ;;  %v2783_v11 = vsel %vm662_vm6, %v2753_v16, 0.0  ;;  %v3585_v42 = vsel %vm662_vm6, %v3555_v43, 0.0 }
 0x502   : > { %v2730_v50 = vadd.f32 %v2729_v59, %v2728_v6  ;;  %v2782_v49 = vadd.f32 %v2781_v41, %v2780_v27  ;;  %v3532_v37 = vadd.f32 %v3531_v47, %v3530_v0  ;;  %v3584_v31 = vadd.f32 %v3583_v25, %v3582_v5 }
 0x504   : > { %v2731_v52 = vrot.slane %v2730_v50, 4  ;;  %v2784_v9 = vadd.f32 %v2783_v11, %v2782_v49  ;;  %v3533_v7 = vrot.slane %v3532_v37, 4  ;;  %v3586_v51 = vadd.f32 %v3585_v42, %v3584_v31 }
 0x506   : > { %v2732_v8 = vadd.f32 %v2731_v52, %v2730_v50  ;;  %v2785_v45 = vrot.slane %v2784_v9, 4  ;;  %v3534_v3 = vadd.f32 %v3533_v7, %v3532_v37  ;;  %v3587_v54 = vrot.slane %v3586_v51, 4 }
 0x508   : > { %v2733_v60 = vrot.slane %v2732_v8, 2  ;;  %v2786_v36 = vadd.f32 %v2785_v45, %v2784_v9  ;;  %v3535_v18 = vrot.slane %v3534_v3, 2  ;;  %v3588_v56 = vadd.f32 %v3587_v54, %v3586_v51 }
 0x50a   : > { %v2734_v29 = vadd.f32 %v2733_v60, %v2732_v8  ;;  %v2787_v38 = vrot.slane %v2786_v36, 2  ;;  %v3536_v33 = vadd.f32 %v3535_v18, %v3534_v3  ;;  %v3589_v63 = vrot.slane %v3588_v56, 2 }
 0x50c   : > { %v2735_v21 = vrot.slane %v2734_v29, 1  ;;  %v2788_v15 = vadd.f32 %v2787_v38, %v2786_v36  ;;  %v3537_v22 = vrot.slane %v3536_v33, 1  ;;  %v3590_v12 = vadd.f32 %v3589_v63, %v3588_v56 }
 0x50e   : > { %v2736_v48 = vadd.f32 %v2735_v21, %v2734_v29  ;;  %v2789_v39 = vrot.slane %v2788_v15, 1  ;;  %v3538_v26 = vadd.f32 %v3537_v22, %v3536_v33  ;;  %v3591_v24 = vrot.slane %v3590_v12, 1 }
 0x510   : > { %v2790_v17 = vadd.f32 %v2789_v39, %v2788_v15  ;;  %v3539_v13 = vadd.f32 %v3538_v26, %v2736_v48  ;;  %v3592_v10 = vadd.f32 %v3591_v24, %v3590_v12 }
 0x512   : > { %v3593_v62 = vadd.f32 %v3592_v10, %v2790_v17  ;;  %v5960_v35 = vmul.f32 0.00390625, %v3539_v13 }
 0x514   : > { %v3595_v19 = vmul.f32 0.00390625, %v3593_v62  ;;  %v3596_v55 = vmul.f32 %v5960_v35, %v5960_v35 }
 0x516   : > { %v3597_v23 = vsub.f32 %v3595_v19, %v3596_v55 }
 0x518   : > { %v3598_v40 = vmax.f32 %v3597_v23, 0.0 }
 0x51a   : > { %v3599_v4 = vadd.f32 1e-05, %v3598_v40 }
 0x51c   : > { %4060 = vrsqrt.f32 %v3599_v4 }
 0x526   : > { %v5964_v1 = vpop.eup %4060 }
 0x527 LB: >> { %s3883_s22 = sshll.u32 %s4084_s21, 7  ;;  %s3606_s21 = sadd.s32 1, %s4084_s21   ;;  %s4084_s21 = sphi %s5966_s21, %s3606_s21  }
 0x528   : >> { %s5973_s23 = scalar_lea.vmem %s4125_s17, %s3883_s22  ;;  %s5975_s24 = scalar_lea.vmem [#allocation2], %s3883_s22 }
 0x529   : >> { %v3610_v20 = vld [vmem:[%s5975_s24] sm:$0xff]  ;;  %v3611_v57 = vld [vmem:[%s5975_s24 + $0x8] sm:$0xff]  ;;  %v3612_v58 = vld [vmem:[%s5975_s24 + $0x10] sm:$0xff]  ;;  %s5995_s25 = scalar_lea.vmem %s4130_s20, %s3883_s22  ;;  %p3603_p5 = scmp.ge.s32.totalorder %s3606_s21, 2  }
 0x52a   : >> { %v3627_v30 = vld [vmem:[%s5973_s23] sm:$0xff]  ;;  %v3643_v53 = vsub.f32 %v3610_v20, %v5960_v35  ;;  %v3644_v32 = vsub.f32 %v3611_v57, %v5960_v35  ;;  %v3628_v61 = vld [vmem:[%s5973_s23 + $0x8] sm:$0xff]  ;;  %v3645_v34 = vsub.f32 %v3612_v58, %v5960_v35  ;;  %v3613_v2 = vld [vmem:[%s5975_s24 + $0x18] sm:$0xff] }
 0x52b   : >> { %v3614_v44 = vld [vmem:[%s5975_s24 + $0x20] sm:$0xff]  ;;  %v3629_v46 = vld [vmem:[%s5973_s23 + $0x10] sm:$0xff]  ;;  %v3630_v43 = vld [vmem:[%s5973_s23 + $0x18] sm:$0xff]  ;;  %v3646_v6 = vsub.f32 %v3613_v2, %v5960_v35 }
 0x52c   : >> { %v3659_v16 = vmul.f32 %v5964_v1, %v3643_v53  ;;  %v3660_v14 = vmul.f32 %v5964_v1, %v3644_v32  ;;  %v3647_v27 = vsub.f32 %v3614_v44, %v5960_v35  ;;  %v3615_v28 = vld [vmem:[%s5975_s24 + $0x28] sm:$0xff]  ;;  %v3661_v41 = vmul.f32 %v5964_v1, %v3645_v34  ;;  %v3631_v59 = vld [vmem:[%s5973_s23 + $0x20] sm:$0xff]  ;;  %v3616_v5 = vld [vmem:[%s5975_s24 + $0x30] sm:$0xff] }
 0x52d   : >> { %v3648_v0 = vsub.f32 %v3615_v28, %v5960_v35  ;;  %v3617_v25 = vld [vmem:[%s5975_s24 + $0x38] sm:$0xff]  ;;  %v3662_v49 = vmul.f32 %v5964_v1, %v3646_v6  ;;  %v3632_v37 = vld [vmem:[%s5973_s23 + $0x28] sm:$0xff]  ;;  %v3618_v31 = vld [vmem:[%s5975_s24 + $0x40] sm:$0xff]  ;;  %v3649_v7 = vsub.f32 %v3616_v5, %v5960_v35 }
 0x52e   : >> { %v3675_v47 = vadd.f32 %v3659_v16, %v3627_v30  ;;  %v3676_v50 = vadd.f32 %v3660_v14, %v3628_v61  ;;  %v3663_v11 = vmul.f32 %v5964_v1, %v3647_v27  ;;  %v3677_v42 = vadd.f32 %v3661_v41, %v3629_v46  ;;  %v3633_v9 = vld [vmem:[%s5973_s23 + $0x30] sm:$0xff]  ;;  %v3619_v8 = vld [vmem:[%s5975_s24 + $0x48] sm:$0xff]  ;;  %v3634_v60 = vld [vmem:[%s5973_s23 + $0x38] sm:$0xff] }
 0x52f   : >> { %v3664_v52 = vmul.f32 %v5964_v1, %v3648_v0  ;;  %v3650_v51 = vsub.f32 %v3617_v25, %v5960_v35  ;;  %v3620_v45 = vld [vmem:[%s5975_s24 + $0x50] sm:$0xff]  ;;  %v3678_v3 = vadd.f32 %v3662_v49, %v3630_v43  ;;  %v3635_v36 = vld [vmem:[%s5973_s23 + $0x40] sm:$0xff]  ;;  %v3651_v18 = vsub.f32 %v3618_v31, %v5960_v35  ;;  %v3621_v29 = vld [vmem:[%s5975_s24 + $0x58] sm:$0xff] }
 0x530   : >> { %3692 = vst.msk [vmem:[%s5995_s25] sm:$0xff] %vm662_vm6, %v3675_v47  ;;  %3693 = vst.msk [vmem:[%s5995_s25 + $0x8] sm:$0xff] %vm662_vm6, %v3676_v50  ;;  %v3679_v54 = vadd.f32 %v3663_v11, %v3631_v59  ;;  %v3652_v56 = vsub.f32 %v3619_v8, %v5960_v35  ;;  %v3665_v33 = vmul.f32 %v5964_v1, %v3649_v7  ;;  %v3636_v21 = vld [vmem:[%s5973_s23 + $0x48] sm:$0xff]  ;;  %v3622_v22 = vld [vmem:[%s5975_s24 + $0x60] sm:$0xff] }
 0x531   : >> { %3694 = vst.msk [vmem:[%s5995_s25 + $0x10] sm:$0xff] %vm662_vm6, %v3677_v42  ;;  %v3680_v38 = vadd.f32 %v3664_v52, %v3632_v37  ;;  %v3666_v63 = vmul.f32 %v5964_v1, %v3650_v51  ;;  %v3653_v15 = vsub.f32 %v3620_v45, %v5960_v35  ;;  %v3623_v12 = vld [vmem:[%s5975_s24 + $0x68] sm:$0xff]  ;;  %3695 = vst.msk [vmem:[%s5995_s25 + $0x18] sm:$0xff] %vm662_vm6, %v3678_v3  ;;  %v3637_v26 = vld [vmem:[%s5973_s23 + $0x50] sm:$0xff] }
 0x532   : >> { %3696 = vst.msk [vmem:[%s5995_s25 + $0x20] sm:$0xff] %vm662_vm6, %v3679_v54  ;;  %v3667_v48 = vmul.f32 %v5964_v1, %v3651_v18  ;;  %v3668_v39 = vmul.f32 %v5964_v1, %v3652_v56  ;;  %v3654_v24 = vsub.f32 %v3621_v29, %v5960_v35  ;;  %v3655_v17 = vsub.f32 %v3622_v22, %v5960_v35  ;;  %v3624_v13 = vld [vmem:[%s5975_s24 + $0x70] sm:$0xff]  ;;  %v3638_v55 = vld [vmem:[%s5973_s23 + $0x58] sm:$0xff]  ;;  %v3639_v23 = vld [vmem:[%s5973_s23 + $0x60] sm:$0xff] }
 0x533   : >> { %3697 = vst.msk [vmem:[%s5995_s25 + $0x28] sm:$0xff] %vm662_vm6, %v3680_v38  ;;  %v3681_v10 = vadd.f32 %v3665_v33, %v3633_v9  ;;  %v3682_v62 = vadd.f32 %v3666_v63, %v3634_v60  ;;  %v3669_v19 = vmul.f32 %v5964_v1, %v3653_v15  ;;  %v3656_v40 = vsub.f32 %v3623_v12, %v5960_v35  ;;  %v3625_v4 = vld [vmem:[%s5975_s24 + $0x78] sm:$0xff]  ;;  %v3640_v32 = vld [vmem:[%s5973_s23 + $0x68] sm:$0xff]  ;;  %v3641_v14 = vld [vmem:[%s5973_s23 + $0x70] sm:$0xff] }
 0x534   : >> { %v3683_v20 = vadd.f32 %v3667_v48, %v3635_v36  ;;  %v3684_v57 = vadd.f32 %v3668_v39, %v3636_v21  ;;  %v3670_v30 = vmul.f32 %v5964_v1, %v3654_v24  ;;  %v3671_v53 = vmul.f32 %v5964_v1, %v3655_v17  ;;  %v3642_v46 = vld [vmem:[%s5973_s23 + $0x78] sm:$0xff] }
 0x535   : >> { %3698 = vst.msk [vmem:[%s5995_s25 + $0x30] sm:$0xff] %vm662_vm6, %v3681_v10  ;;  %3699 = vst.msk [vmem:[%s5995_s25 + $0x38] sm:$0xff] %vm662_vm6, %v3682_v62  ;;  %v3685_v58 = vadd.f32 %v3669_v19, %v3637_v26  ;;  %v3672_v61 = vmul.f32 %v5964_v1, %v3656_v40  ;;  %v3657_v34 = vsub.f32 %v3624_v13, %v5960_v35 }
 0x536   : >> { %v3658_v2 = vsub.f32 %v3625_v4, %v5960_v35  ;;  %3700 = vst.msk [vmem:[%s5995_s25 + $0x40] sm:$0xff] %vm662_vm6, %v3683_v20  ;;  %3701 = vst.msk [vmem:[%s5995_s25 + $0x48] sm:$0xff] %vm662_vm6, %v3684_v57  ;;  %v3686_v44 = vadd.f32 %v3670_v30, %v3638_v55  ;;  %v3687_v16 = vadd.f32 %v3671_v53, %v3639_v23  ;;  %3605 = sbr.rel (!%p3603_p5) target bundleno = 1319 (0x527), region = 105 }
 0x537   : >> { %3702 = vst.msk [vmem:[%s5995_s25 + $0x50] sm:$0xff] %vm662_vm6, %v3685_v58  ;;  %v3688_v43 = vadd.f32 %v3672_v61, %v3640_v32  ;;  %v3673_v6 = vmul.f32 %v5964_v1, %v3657_v34 }
 0x538   : >> { %v3674_v27 = vmul.f32 %v5964_v1, %v3658_v2  ;;  %3703 = vst.msk [vmem:[%s5995_s25 + $0x58] sm:$0xff] %vm662_vm6, %v3686_v44  ;;  %3704 = vst.msk [vmem:[%s5995_s25 + $0x60] sm:$0xff] %vm662_vm6, %v3687_v16 }
 0x539   : >> { %3705 = vst.msk [vmem:[%s5995_s25 + $0x68] sm:$0xff] %vm662_vm6, %v3688_v43  ;;  %v3689_v28 = vadd.f32 %v3673_v6, %v3641_v14 }
 0x53a   : >> { %v3690_v41 = vadd.f32 %v3674_v27, %v3642_v46 }
 0x53b   : >> { %3706 = vst.msk [vmem:[%s5995_s25 + $0x70] sm:$0xff] %vm662_vm6, %v3689_v28 }
 0x53c   : >> { %3707 = vst.msk [vmem:[%s5995_s25 + $0x78] sm:$0xff] %vm662_vm6, %v3690_v41 }
 0x53d PF: > { %s13_s12 = sadd.s32 1, %s4076_s12  }
 0x53e   : > { %p10_p6 = scmp.ge.s32.totalorder %s13_s12, 4  }
 0x540   :  { %12 = sbr.rel (!%p10_p6) target bundleno = 1 (0x1), region = 116 }

</bundles_post_ra>
